<compile_context>
chip_gen: v5e
topology: v5e:2x2
jax: 0.10.0
libtpu: 0.0.40
codegen_flags: <defaults>
</compile_context>

<pallas_src>
import functools

import jax
import jax.numpy as jnp
from jax import lax
from jax.experimental import pallas as pl
from jax.experimental.pallas import tpu as pltpu

C2 = 40       # atrConvBlock channels (input_2)
C1 = 6        # num_classes == Residual131 in/out channels (input_1)
CM = 32       # Residual131 mid channels
BN_EPS = 1e-5


# ----------------------------------------------------------------------------
# Fused kernel: one grid step == `nb` batch elements, everything VMEM-resident
# ----------------------------------------------------------------------------
def _fusion_kernel(x2f_ref, x1f_ref, mask_ref,
                   w_atr_ref, s_atr_ref, b_atr_ref,
                   w_c1_ref, b_c1_ref,
                   w_in_ref, s_in_ref, b_in_ref,
                   w_mid_ref, s_mid_ref, b_mid_ref,
                   w_out_ref, b_out_ref, s_bnf_ref, b_bnf_ref,
                   o_ref, apad_ref, *, h, w, nb):
    wp = w + 8                      # padded row stride of the atrous input
    m = h * wp                      # "wide" output rows: (y, x), x in [0, wp)
    r = apad_ref.shape[1]

    # Border-only zeroing of the 3x3 scratch (top pad row + bottom pad row
    # regions).  Junk columns inside the stored region are zeroed by the mask
    # multiply below.  Done every grid step -> megacore-safe.
    apad_ref[:, 0:wp + 1] = jnp.zeros((CM, wp + 1), jnp.bfloat16)
    apad_ref[:, (h + 1) * wp + 1:r] = jnp.zeros(
        (CM, r - (h + 1) * wp - 1), jnp.bfloat16)

    for b in range(nb):
        # ---- atrConvBlock: 5x5 conv, dilation 2 (pad 4 done in wrapper) -----
        # Each tap is a contiguous lane slice of the flattened padded image;
        # 25 accumulating MXU dots with a 15-vreg lane-dense f32 accumulator.
        acc = jnp.zeros((C2, m), jnp.float32)
        for ky in range(5):
            for kx in range(5):
                off = 2 * ky * wp + 2 * kx
                acc = acc + jnp.dot(w_atr_ref[ky * 5 + kx],
                                    x2f_ref[b, :, off:off + m],
                                    preferred_element_type=jnp.float32)
        feat = jnp.maximum(acc * s_atr_ref[...] + b_atr_ref[...], 0.0)  # [40,m]

        # ---- con1: 1x1 conv 40 -> 6 (+bias), then add input_1 ---------------
        y = jnp.dot(w_c1_ref[...], feat.astype(jnp.bfloat16),
                    preferred_element_type=jnp.float32) + b_c1_ref[...]
        t = y + x1f_ref[b]                                              # [6,m]

        # ---- Residual131.convblock_in: 1x1 6 -> 32, BN, ReLU (one MXU dot) --
        a = jnp.dot(w_in_ref[...], t.astype(jnp.bfloat16),
                    preferred_element_type=jnp.float32)
        a = jnp.maximum(a * s_in_ref[...] + b_in_ref[...], 0.0)
        a = a * mask_ref[...]     # zero junk columns -> 3x3 conv zero padding

        # ---- Residual131.convblock_mid: 3x3 32 -> 32 (pad 1), BN, ReLU ------
        apad_ref[:, wp + 1:wp + 1 + m] = a.astype(jnp.bfloat16)
        accm = jnp.zeros((CM, m), jnp.float32)
        for ky in range(3):
            for kx in range(3):
                off = ky * wp + kx
                accm = accm + jnp.dot(w_mid_ref[ky * 3 + kx],
                                      apad_ref[:, off:off + m],
                                      preferred_element_type=jnp.float32)
        bm = jnp.maximum(accm * s_mid_ref[...] + b_mid_ref[...], 0.0)   # [32,m]

        # ---- conv1_out: 1x1 32 -> 6 (+bias), BN, add t, ReLU ----------------
        c = jnp.dot(w_out_ref[...], bm.astype(jnp.bfloat16),
                    preferred_element_type=jnp.float32) + b_out_ref[...]
        c = c * s_bnf_ref[...] + b_bnf_ref[...]
        o_ref[b] = jnp.maximum(c + t, 0.0)                              # [6,m]


# ----------------------------------------------------------------------------
# Wrapper: NCHW in, NCHW out.  Padding / flattening / bf16 cast done once here.
# ----------------------------------------------------------------------------
def feature_fusion_forward(input_1, input_2, params, images_per_step=None):
    n, c1, h, w = input_1.shape
    assert c1 == C1 and input_2.shape == (n, C2, h, w)
    hp, wp = h + 8, w + 8
    m = h * wp
    flat_len = hp * wp + 8          # +8 tail so the last wide tap stays in-bounds

    if images_per_step is None:
        # keep >= 2 parallel grid steps (both v7x TensorCores busy), cap at 8
        images_per_step = min(8, max(1, n // 2))
    nb = images_per_step
    while n % nb:
        nb -= 1

    # channel-major, spatially flattened inputs (no transposes anywhere)
    x2p = jnp.pad(input_2.astype(jnp.float32),
                  ((0, 0), (0, 0), (4, 4), (4, 4)))                 # pad 4
    x2f = jnp.pad(x2p.reshape(n, C2, hp * wp),
                  ((0, 0), (0, 0), (0, 8))).astype(jnp.bfloat16)    # bf16 in HBM
    x1f = jnp.pad(input_1.astype(jnp.float32),
                  ((0, 0), (0, 0), (0, 0), (0, wp - w))).reshape(n, C1, m)
    mask = jnp.tile(jnp.arange(wp) < w, h).astype(jnp.float32).reshape(1, m)

    r = (h + 2) * wp + 8            # lanes of the 3x3 zero-bordered scratch

    kernel = functools.partial(_fusion_kernel, h=h, w=w, nb=nb)
    out = pl.pallas_call(
        kernel,
        out_shape=jax.ShapeDtypeStruct((n, C1, m), jnp.float32),
        grid=(n // nb,),
        in_specs=[
            pl.BlockSpec((nb, C2, flat_len), lambda i: (i, 0, 0)),
            pl.BlockSpec((nb, C1, m), lambda i: (i, 0, 0)),
            pl.BlockSpec((1, m), lambda i: (0, 0)),
            pl.BlockSpec((25, C2, C2), lambda i: (0, 0, 0)),
            pl.BlockSpec((C2, 1), lambda i: (0, 0)),
            pl.BlockSpec((C2, 1), lambda i: (0, 0)),
            pl.BlockSpec((C1, C2), lambda i: (0, 0)),
            pl.BlockSpec((C1, 1), lambda i: (0, 0)),
            pl.BlockSpec((CM, C1), lambda i: (0, 0)),
            pl.BlockSpec((CM, 1), lambda i: (0, 0)),
            pl.BlockSpec((CM, 1), lambda i: (0, 0)),
            pl.BlockSpec((9, CM, CM), lambda i: (0, 0, 0)),
            pl.BlockSpec((CM, 1), lambda i: (0, 0)),
            pl.BlockSpec((CM, 1), lambda i: (0, 0)),
            pl.BlockSpec((C1, CM), lambda i: (0, 0)),
            pl.BlockSpec((C1, 1), lambda i: (0, 0)),
            pl.BlockSpec((C1, 1), lambda i: (0, 0)),
            pl.BlockSpec((C1, 1), lambda i: (0, 0)),
        ],
        out_specs=pl.BlockSpec((nb, C1, m), lambda i: (i, 0, 0)),
        scratch_shapes=[pltpu.VMEM((CM, r), jnp.bfloat16)],
        compiler_params=pltpu.CompilerParams(
            dimension_semantics=("parallel",)),
    )(x2f, x1f, mask,
      params["w_atr"], params["s_atr"], params["b_atr"],
      params["w_c1"], params["b_c1"],
      params["w_in"], params["s_in"], params["b_in"],
      params["w_mid"], params["s_mid"], params["b_mid"],
      params["w_out"], params["b_out"], params["s_bnf"], params["b_bnf"])

    # lane-dense kernel output -> NCHW is just a reshape + column slice
    return out.reshape(n, C1, h, wp)[:, :, :, :w]


# ----------------------------------------------------------------------------
# Pure-JAX (XLA) reference for validation
# ----------------------------------------------------------------------------
def _bn_fold(gamma, beta, mean, var, eps=BN_EPS):
    s = gamma / jnp.sqrt(var + eps)
    return s, beta - mean * s


def _conv_nchw(x, w, padding=0, dilation=1):
    return lax.conv_general_dilated(
        x, w, window_strides=(1, 1),
        padding=((padding, padding), (padding, padding)),
        rhs_dilation=(dilation, dilation),
        dimension_numbers=("NCHW", "OIHW", "NCHW"))


def reference(input_1, input_2, raw):
    def bn(x, p):
        s, b = _bn_fold(*p)
        return x * s[None, :, None, None] + b[None, :, None, None]

    x = jnp.maximum(bn(_conv_nchw(input_2, raw["atr_w"], padding=4, dilation=2),
                       raw["atr_bn"]), 0.0)
    x = _conv_nchw(x, raw["con1_w"]) + raw["con1_b"][None, :, None, None]
    t = input_1 + x
    a = jnp.maximum(bn(_conv_nchw(t, raw["in_w"]), raw["in_bn"]), 0.0)
    b = jnp.maximum(bn(_conv_nchw(a, raw["mid_w"], padding=1), raw["mid_bn"]), 0.0)
    c = bn(_conv_nchw(b, raw["out_w"]) + raw["out_b"][None, :, None, None],
           raw["f_bn"])
    return jnp.maximum(c + t, 0.0)


if __name__ == "__main__":
    N, H, W = 2, 16, 16
    key = jax.random.PRNGKey(0)
    ks = jax.random.split(key, 13)

    input_1 = jax.random.normal(ks[0], (N, C1, H, W), jnp.float32)
    input_2 = jax.random.normal(ks[1], (N, C2, H, W), jnp.float32)

    def rand_bn(k, c):
        k1, k2, k3, k4 = jax.random.split(k, 4)
        return (jax.random.uniform(k1, (c,), jnp.float32, 0.5, 1.5),   # gamma
                jax.random.normal(k2, (c,), jnp.float32) * 0.1,        # beta
                jax.random.normal(k3, (c,), jnp.float32) * 0.1,        # running mean
                jax.random.uniform(k4, (c,), jnp.float32, 0.5, 1.5))   # running var

    raw = dict(
        atr_w=jax.random.normal(ks[2], (C2, C2, 5, 5), jnp.float32) / jnp.sqrt(25.0 * C2),
        atr_bn=rand_bn(ks[3], C2),
        con1_w=jax.random.normal(ks[4], (C1, C2, 1, 1), jnp.float32) / jnp.sqrt(1.0 * C2),
        con1_b=jax.random.normal(ks[5], (C1,), jnp.float32) * 0.1,
        in_w=jax.random.normal(ks[6], (CM, C1, 1, 1), jnp.float32) / jnp.sqrt(1.0 * C1),
        in_bn=rand_bn(ks[7], CM),
        mid_w=jax.random.normal(ks[8], (CM, CM, 3, 3), jnp.float32) / jnp.sqrt(9.0 * CM),
        mid_bn=rand_bn(ks[9], CM),
        out_w=jax.random.normal(ks[10], (C1, CM, 1, 1), jnp.float32) / jnp.sqrt(1.0 * CM),
        out_b=jax.random.normal(ks[11], (C1,), jnp.float32) * 0.1,
        f_bn=rand_bn(ks[12], C1),
    )

    s_atr, b_atr = _bn_fold(*raw["atr_bn"])
    s_in, b_in = _bn_fold(*raw["in_bn"])
    s_mid, b_mid = _bn_fold(*raw["mid_bn"])
    s_bnf, b_bnf = _bn_fold(*raw["f_bn"])

    params = dict(
        # tap-major [ky*5+kx, Cout, Cin] (channel-major matmul LHS), bf16
        w_atr=jnp.transpose(raw["atr_w"], (2, 3, 0, 1)).reshape(25, C2, C2).astype(jnp.bfloat16),
        s_atr=s_atr.reshape(C2, 1), b_atr=b_atr.reshape(C2, 1),
        w_c1=raw["con1_w"][:, :, 0, 0].astype(jnp.bfloat16),               # [6, 40]
        b_c1=raw["con1_b"].reshape(C1, 1),
        w_in=raw["in_w"][:, :, 0, 0].astype(jnp.bfloat16),                 # [32, 6]
        s_in=s_in.reshape(CM, 1), b_in=b_in.reshape(CM, 1),
        w_mid=jnp.transpose(raw["mid_w"], (2, 3, 0, 1)).reshape(9, CM, CM).astype(jnp.bfloat16),
        s_mid=s_mid.reshape(CM, 1), b_mid=b_mid.reshape(CM, 1),
        w_out=raw["out_w"][:, :, 0, 0].astype(jnp.bfloat16),               # [6, 32]
        b_out=raw["out_b"].reshape(C1, 1),
        s_bnf=s_bnf.reshape(C1, 1), b_bnf=b_bnf.reshape(C1, 1),
    )

    out = feature_fusion_forward(input_1, input_2, params)
    out = jax.block_until_ready(out)
    assert out.shape == (N, C1, H, W)

    ref = reference(input_1, input_2, raw)
    err = float(jnp.max(jnp.abs(out - ref)))
    # bf16 matmul operands with f32 accumulation -> tolerance loosened vs pure f32.
    assert err < 5e-2, f"max abs err {err}"
    print("KERNEL_OK")
</pallas_src>

<mosaic_0001>
module attributes {stable_mosaic.version = 11 : i64} {
  func.func @_fusion_kernel(%arg0: i32, %arg1: memref<1x40x584xbf16, #tpu.memory_space<vmem>>, %arg2: memref<1x6x384xf32, #tpu.memory_space<vmem>>, %arg3: memref<1x384xf32, #tpu.memory_space<vmem>>, %arg4: memref<25x40x40xbf16, #tpu.memory_space<vmem>>, %arg5: memref<40x1xf32, #tpu.memory_space<vmem>>, %arg6: memref<40x1xf32, #tpu.memory_space<vmem>>, %arg7: memref<6x40xbf16, #tpu.memory_space<vmem>>, %arg8: memref<6x1xf32, #tpu.memory_space<vmem>>, %arg9: memref<32x6xbf16, #tpu.memory_space<vmem>>, %arg10: memref<32x1xf32, #tpu.memory_space<vmem>>, %arg11: memref<32x1xf32, #tpu.memory_space<vmem>>, %arg12: memref<9x32x32xbf16, #tpu.memory_space<vmem>>, %arg13: memref<32x1xf32, #tpu.memory_space<vmem>>, %arg14: memref<32x1xf32, #tpu.memory_space<vmem>>, %arg15: memref<6x32xbf16, #tpu.memory_space<vmem>>, %arg16: memref<6x1xf32, #tpu.memory_space<vmem>>, %arg17: memref<6x1xf32, #tpu.memory_space<vmem>>, %arg18: memref<6x1xf32, #tpu.memory_space<vmem>>, %arg19: memref<1x6x384xf32, #tpu.memory_space<vmem>>, %arg20: memref<32x440xbf16, #tpu.memory_space<vmem>>) attributes {dimension_semantics = [#tpu.dimension_semantics<parallel>], iteration_bounds = array<i64: 2>, scalar_prefetch = 0 : i64, scratch_operands = 1 : i64, tpu.core_type = #tpu.core_type<tc>, window_params = [{transform_indices = @transform_0, window_bounds = array<i64: 1, 40, 584>}, {transform_indices = @transform_1, window_bounds = array<i64: 1, 6, 384>}, {pipeline_mode = #tpu.pipeline_mode<synchronous>, transform_indices = @transform_2, window_bounds = array<i64: 1, 384>}, {pipeline_mode = #tpu.pipeline_mode<synchronous>, transform_indices = @transform_3, window_bounds = array<i64: 25, 40, 40>}, {pipeline_mode = #tpu.pipeline_mode<synchronous>, transform_indices = @transform_4, window_bounds = array<i64: 40, 1>}, {pipeline_mode = #tpu.pipeline_mode<synchronous>, transform_indices = @transform_5, window_bounds = array<i64: 40, 1>}, {pipeline_mode = #tpu.pipeline_mode<synchronous>, transform_indices = @transform_6, window_bounds = array<i64: 6, 40>}, {pipeline_mode = #tpu.pipeline_mode<synchronous>, transform_indices = @transform_7, window_bounds = array<i64: 6, 1>}, {pipeline_mode = #tpu.pipeline_mode<synchronous>, transform_indices = @transform_8, window_bounds = array<i64: 32, 6>}, {pipeline_mode = #tpu.pipeline_mode<synchronous>, transform_indices = @transform_9, window_bounds = array<i64: 32, 1>}, {pipeline_mode = #tpu.pipeline_mode<synchronous>, transform_indices = @transform_10, window_bounds = array<i64: 32, 1>}, {pipeline_mode = #tpu.pipeline_mode<synchronous>, transform_indices = @transform_11, window_bounds = array<i64: 9, 32, 32>}, {pipeline_mode = #tpu.pipeline_mode<synchronous>, transform_indices = @transform_12, window_bounds = array<i64: 32, 1>}, {pipeline_mode = #tpu.pipeline_mode<synchronous>, transform_indices = @transform_13, window_bounds = array<i64: 32, 1>}, {pipeline_mode = #tpu.pipeline_mode<synchronous>, transform_indices = @transform_14, window_bounds = array<i64: 6, 32>}, {pipeline_mode = #tpu.pipeline_mode<synchronous>, transform_indices = @transform_15, window_bounds = array<i64: 6, 1>}, {pipeline_mode = #tpu.pipeline_mode<synchronous>, transform_indices = @transform_16, window_bounds = array<i64: 6, 1>}, {pipeline_mode = #tpu.pipeline_mode<synchronous>, transform_indices = @transform_17, window_bounds = array<i64: 6, 1>}, {transform_indices = @transform_18, window_bounds = array<i64: 1, 6, 384>}]} {
    %cst = arith.constant 0.000000e+00 : bf16
    %0 = vector.broadcast %cst : bf16 to vector<32x25xbf16>
    %c0 = arith.constant 0 : index
    %c0_0 = arith.constant 0 : index
    %1 = vector.load %arg20[%c0, %c0_0] : memref<32x440xbf16, #tpu.memory_space<vmem>>, vector<32x25xbf16>
    tpu.vector_store %arg20[%c0, %c0_0], %0 {strides = array<i32>} : memref<32x440xbf16, #tpu.memory_space<vmem>>, vector<32x25xbf16>,
    %cst_1 = arith.constant 0.000000e+00 : bf16
    %2 = vector.broadcast %cst_1 : bf16 to vector<32x31xbf16>
    %c0_2 = arith.constant 0 : index
    %c409 = arith.constant 409 : index
    %3 = vector.load %arg20[%c0_2, %c409] : memref<32x440xbf16, #tpu.memory_space<vmem>>, vector<32x31xbf16>
    tpu.vector_store %arg20[%c0_2, %c409], %2 {strides = array<i32>} : memref<32x440xbf16, #tpu.memory_space<vmem>>, vector<32x31xbf16>,
    %cst_3 = arith.constant 0.000000e+00 : f32
    %4 = vector.broadcast %cst_3 : f32 to vector<40x384xf32>
    %c0_4 = arith.constant 0 : index
    %c0_5 = arith.constant 0 : index
    %c0_6 = arith.constant 0 : index
    %5 = vector.load %arg4[%c0_4, %c0_5, %c0_6] : memref<25x40x40xbf16, #tpu.memory_space<vmem>>, vector<1x40x40xbf16>
    %6 = vector.shape_cast %5 : vector<1x40x40xbf16> to vector<40x40xbf16>
    %c0_7 = arith.constant 0 : index
    %c0_8 = arith.constant 0 : index
    %c0_9 = arith.constant 0 : index
    %7 = vector.load %arg1[%c0_7, %c0_8, %c0_9] : memref<1x40x584xbf16, #tpu.memory_space<vmem>>, vector<1x40x384xbf16>
    %8 = vector.shape_cast %7 : vector<1x40x384xbf16> to vector<40x384xbf16>
    %cst_10 = arith.constant dense<0.000000e+00> : vector<40x384xf32>
    %9 = tpu.matmul %6, %8, %cst_10 {dimension_numbers = #tpu.dot_dimension_numbers<[1], [0], [0], [1], [0, 0, 1, 1], [], []>} : vector<40x40xbf16>, vector<40x384xbf16>, vector<40x384xf32> -> vector<40x384xf32>
    %10 = arith.addf %4, %9 : vector<40x384xf32>
    %c1 = arith.constant 1 : index
    %c0_11 = arith.constant 0 : index
    %c0_12 = arith.constant 0 : index
    %11 = vector.load %arg4[%c1, %c0_11, %c0_12] : memref<25x40x40xbf16, #tpu.memory_space<vmem>>, vector<1x40x40xbf16>
    %12 = vector.shape_cast %11 : vector<1x40x40xbf16> to vector<40x40xbf16>
    %c0_13 = arith.constant 0 : index
    %c0_14 = arith.constant 0 : index
    %c2 = arith.constant 2 : index
    %13 = vector.load %arg1[%c0_13, %c0_14, %c2] : memref<1x40x584xbf16, #tpu.memory_space<vmem>>, vector<1x40x384xbf16>
    %14 = vector.shape_cast %13 : vector<1x40x384xbf16> to vector<40x384xbf16>
    %cst_15 = arith.constant dense<0.000000e+00> : vector<40x384xf32>
    %15 = tpu.matmul %12, %14, %cst_15 {dimension_numbers = #tpu.dot_dimension_numbers<[1], [0], [0], [1], [0, 0, 1, 1], [], []>} : vector<40x40xbf16>, vector<40x384xbf16>, vector<40x384xf32> -> vector<40x384xf32>
    %16 = arith.addf %10, %15 : vector<40x384xf32>
    %c2_16 = arith.constant 2 : index
    %c0_17 = arith.constant 0 : index
    %c0_18 = arith.constant 0 : index
    %17 = vector.load %arg4[%c2_16, %c0_17, %c0_18] : memref<25x40x40xbf16, #tpu.memory_space<vmem>>, vector<1x40x40xbf16>
    %18 = vector.shape_cast %17 : vector<1x40x40xbf16> to vector<40x40xbf16>
    %c0_19 = arith.constant 0 : index
    %c0_20 = arith.constant 0 : index
    %c4 = arith.constant 4 : index
    %19 = vector.load %arg1[%c0_19, %c0_20, %c4] : memref<1x40x584xbf16, #tpu.memory_space<vmem>>, vector<1x40x384xbf16>
    %20 = vector.shape_cast %19 : vector<1x40x384xbf16> to vector<40x384xbf16>
    %cst_21 = arith.constant dense<0.000000e+00> : vector<40x384xf32>
    %21 = tpu.matmul %18, %20, %cst_21 {dimension_numbers = #tpu.dot_dimension_numbers<[1], [0], [0], [1], [0, 0, 1, 1], [], []>} : vector<40x40xbf16>, vector<40x384xbf16>, vector<40x384xf32> -> vector<40x384xf32>
    %22 = arith.addf %16, %21 : vector<40x384xf32>
    %c3 = arith.constant 3 : index
    %c0_22 = arith.constant 0 : index
    %c0_23 = arith.constant 0 : index
    %23 = vector.load %arg4[%c3, %c0_22, %c0_23] : memref<25x40x40xbf16, #tpu.memory_space<vmem>>, vector<1x40x40xbf16>
    %24 = vector.shape_cast %23 : vector<1x40x40xbf16> to vector<40x40xbf16>
    %c0_24 = arith.constant 0 : index
    %c0_25 = arith.constant 0 : index
    %c6 = arith.constant 6 : index
    %25 = vector.load %arg1[%c0_24, %c0_25, %c6] : memref<1x40x584xbf16, #tpu.memory_space<vmem>>, vector<1x40x384xbf16>
    %26 = vector.shape_cast %25 : vector<1x40x384xbf16> to vector<40x384xbf16>
    %cst_26 = arith.constant dense<0.000000e+00> : vector<40x384xf32>
    %27 = tpu.matmul %24, %26, %cst_26 {dimension_numbers = #tpu.dot_dimension_numbers<[1], [0], [0], [1], [0, 0, 1, 1], [], []>} : vector<40x40xbf16>, vector<40x384xbf16>, vector<40x384xf32> -> vector<40x384xf32>
    %28 = arith.addf %22, %27 : vector<40x384xf32>
    %c4_27 = arith.constant 4 : index
    %c0_28 = arith.constant 0 : index
    %c0_29 = arith.constant 0 : index
    %29 = vector.load %arg4[%c4_27, %c0_28, %c0_29] : memref<25x40x40xbf16, #tpu.memory_space<vmem>>, vector<1x40x40xbf16>
    %30 = vector.shape_cast %29 : vector<1x40x40xbf16> to vector<40x40xbf16>
    %c0_30 = arith.constant 0 : index
    %c0_31 = arith.constant 0 : index
    %c8 = arith.constant 8 : index
    %31 = vector.load %arg1[%c0_30, %c0_31, %c8] : memref<1x40x584xbf16, #tpu.memory_space<vmem>>, vector<1x40x384xbf16>
    %32 = vector.shape_cast %31 : vector<1x40x384xbf16> to vector<40x384xbf16>
    %cst_32 = arith.constant dense<0.000000e+00> : vector<40x384xf32>
    %33 = tpu.matmul %30, %32, %cst_32 {dimension_numbers = #tpu.dot_dimension_numbers<[1], [0], [0], [1], [0, 0, 1, 1], [], []>} : vector<40x40xbf16>, vector<40x384xbf16>, vector<40x384xf32> -> vector<40x384xf32>
    %34 = arith.addf %28, %33 : vector<40x384xf32>
    %c5 = arith.constant 5 : index
    %c0_33 = arith.constant 0 : index
    %c0_34 = arith.constant 0 : index
    %35 = vector.load %arg4[%c5, %c0_33, %c0_34] : memref<25x40x40xbf16, #tpu.memory_space<vmem>>, vector<1x40x40xbf16>
    %36 = vector.shape_cast %35 : vector<1x40x40xbf16> to vector<40x40xbf16>
    %c0_35 = arith.constant 0 : index
    %c0_36 = arith.constant 0 : index
    %c48 = arith.constant 48 : index
    %37 = vector.load %arg1[%c0_35, %c0_36, %c48] : memref<1x40x584xbf16, #tpu.memory_space<vmem>>, vector<1x40x384xbf16>
    %38 = vector.shape_cast %37 : vector<1x40x384xbf16> to vector<40x384xbf16>
    %cst_37 = arith.constant dense<0.000000e+00> : vector<40x384xf32>
    %39 = tpu.matmul %36, %38, %cst_37 {dimension_numbers = #tpu.dot_dimension_numbers<[1], [0], [0], [1], [0, 0, 1, 1], [], []>} : vector<40x40xbf16>, vector<40x384xbf16>, vector<40x384xf32> -> vector<40x384xf32>
    %40 = arith.addf %34, %39 : vector<40x384xf32>
    %c6_38 = arith.constant 6 : index
    %c0_39 = arith.constant 0 : index
    %c0_40 = arith.constant 0 : index
    %41 = vector.load %arg4[%c6_38, %c0_39, %c0_40] : memref<25x40x40xbf16, #tpu.memory_space<vmem>>, vector<1x40x40xbf16>
    %42 = vector.shape_cast %41 : vector<1x40x40xbf16> to vector<40x40xbf16>
    %c0_41 = arith.constant 0 : index
    %c0_42 = arith.constant 0 : index
    %c50 = arith.constant 50 : index
    %43 = vector.load %arg1[%c0_41, %c0_42, %c50] : memref<1x40x584xbf16, #tpu.memory_space<vmem>>, vector<1x40x384xbf16>
    %44 = vector.shape_cast %43 : vector<1x40x384xbf16> to vector<40x384xbf16>
    %cst_43 = arith.constant dense<0.000000e+00> : vector<40x384xf32>
    %45 = tpu.matmul %42, %44, %cst_43 {dimension_numbers = #tpu.dot_dimension_numbers<[1], [0], [0], [1], [0, 0, 1, 1], [], []>} : vector<40x40xbf16>, vector<40x384xbf16>, vector<40x384xf32> -> vector<40x384xf32>
    %46 = arith.addf %40, %45 : vector<40x384xf32>
    %c7 = arith.constant 7 : index
    %c0_44 = arith.constant 0 : index
    %c0_45 = arith.constant 0 : index
    %47 = vector.load %arg4[%c7, %c0_44, %c0_45] : memref<25x40x40xbf16, #tpu.memory_space<vmem>>, vector<1x40x40xbf16>
    %48 = vector.shape_cast %47 : vector<1x40x40xbf16> to vector<40x40xbf16>
    %c0_46 = arith.constant 0 : index
    %c0_47 = arith.constant 0 : index
    %c52 = arith.constant 52 : index
    %49 = vector.load %arg1[%c0_46, %c0_47, %c52] : memref<1x40x584xbf16, #tpu.memory_space<vmem>>, vector<1x40x384xbf16>
    %50 = vector.shape_cast %49 : vector<1x40x384xbf16> to vector<40x384xbf16>
    %cst_48 = arith.constant dense<0.000000e+00> : vector<40x384xf32>
    %51 = tpu.matmul %48, %50, %cst_48 {dimension_numbers = #tpu.dot_dimension_numbers<[1], [0], [0], [1], [0, 0, 1, 1], [], []>} : vector<40x40xbf16>, vector<40x384xbf16>, vector<40x384xf32> -> vector<40x384xf32>
    %52 = arith.addf %46, %51 : vector<40x384xf32>
    %c8_49 = arith.constant 8 : index
    %c0_50 = arith.constant 0 : index
    %c0_51 = arith.constant 0 : index
    %53 = vector.load %arg4[%c8_49, %c0_50, %c0_51] : memref<25x40x40xbf16, #tpu.memory_space<vmem>>, vector<1x40x40xbf16>
    %54 = vector.shape_cast %53 : vector<1x40x40xbf16> to vector<40x40xbf16>
    %c0_52 = arith.constant 0 : index
    %c0_53 = arith.constant 0 : index
    %c54 = arith.constant 54 : index
    %55 = vector.load %arg1[%c0_52, %c0_53, %c54] : memref<1x40x584xbf16, #tpu.memory_space<vmem>>, vector<1x40x384xbf16>
    %56 = vector.shape_cast %55 : vector<1x40x384xbf16> to vector<40x384xbf16>
    %cst_54 = arith.constant dense<0.000000e+00> : vector<40x384xf32>
    %57 = tpu.matmul %54, %56, %cst_54 {dimension_numbers = #tpu.dot_dimension_numbers<[1], [0], [0], [1], [0, 0, 1, 1], [], []>} : vector<40x40xbf16>, vector<40x384xbf16>, vector<40x384xf32> -> vector<40x384xf32>
    %58 = arith.addf %52, %57 : vector<40x384xf32>
    %c9 = arith.constant 9 : index
    %c0_55 = arith.constant 0 : index
    %c0_56 = arith.constant 0 : index
    %59 = vector.load %arg4[%c9, %c0_55, %c0_56] : memref<25x40x40xbf16, #tpu.memory_space<vmem>>, vector<1x40x40xbf16>
    %60 = vector.shape_cast %59 : vector<1x40x40xbf16> to vector<40x40xbf16>
    %c0_57 = arith.constant 0 : index
    %c0_58 = arith.constant 0 : index
    %c56 = arith.constant 56 : index
    %61 = vector.load %arg1[%c0_57, %c0_58, %c56] : memref<1x40x584xbf16, #tpu.memory_space<vmem>>, vector<1x40x384xbf16>
    %62 = vector.shape_cast %61 : vector<1x40x384xbf16> to vector<40x384xbf16>
    %cst_59 = arith.constant dense<0.000000e+00> : vector<40x384xf32>
    %63 = tpu.matmul %60, %62, %cst_59 {dimension_numbers = #tpu.dot_dimension_numbers<[1], [0], [0], [1], [0, 0, 1, 1], [], []>} : vector<40x40xbf16>, vector<40x384xbf16>, vector<40x384xf32> -> vector<40x384xf32>
    %64 = arith.addf %58, %63 : vector<40x384xf32>
    %c10 = arith.constant 10 : index
    %c0_60 = arith.constant 0 : index
    %c0_61 = arith.constant 0 : index
    %65 = vector.load %arg4[%c10, %c0_60, %c0_61] : memref<25x40x40xbf16, #tpu.memory_space<vmem>>, vector<1x40x40xbf16>
    %66 = vector.shape_cast %65 : vector<1x40x40xbf16> to vector<40x40xbf16>
    %c0_62 = arith.constant 0 : index
    %c0_63 = arith.constant 0 : index
    %c96 = arith.constant 96 : index
    %67 = vector.load %arg1[%c0_62, %c0_63, %c96] : memref<1x40x584xbf16, #tpu.memory_space<vmem>>, vector<1x40x384xbf16>
    %68 = vector.shape_cast %67 : vector<1x40x384xbf16> to vector<40x384xbf16>
    %cst_64 = arith.constant dense<0.000000e+00> : vector<40x384xf32>
    %69 = tpu.matmul %66, %68, %cst_64 {dimension_numbers = #tpu.dot_dimension_numbers<[1], [0], [0], [1], [0, 0, 1, 1], [], []>} : vector<40x40xbf16>, vector<40x384xbf16>, vector<40x384xf32> -> vector<40x384xf32>
    %70 = arith.addf %64, %69 : vector<40x384xf32>
    %c11 = arith.constant 11 : index
    %c0_65 = arith.constant 0 : index
    %c0_66 = arith.constant 0 : index
    %71 = vector.load %arg4[%c11, %c0_65, %c0_66] : memref<25x40x40xbf16, #tpu.memory_space<vmem>>, vector<1x40x40xbf16>
    %72 = vector.shape_cast %71 : vector<1x40x40xbf16> to vector<40x40xbf16>
    %c0_67 = arith.constant 0 : index
    %c0_68 = arith.constant 0 : index
    %c98 = arith.constant 98 : index
    %73 = vector.load %arg1[%c0_67, %c0_68, %c98] : memref<1x40x584xbf16, #tpu.memory_space<vmem>>, vector<1x40x384xbf16>
    %74 = vector.shape_cast %73 : vector<1x40x384xbf16> to vector<40x384xbf16>
    %cst_69 = arith.constant dense<0.000000e+00> : vector<40x384xf32>
    %75 = tpu.matmul %72, %74, %cst_69 {dimension_numbers = #tpu.dot_dimension_numbers<[1], [0], [0], [1], [0, 0, 1, 1], [], []>} : vector<40x40xbf16>, vector<40x384xbf16>, vector<40x384xf32> -> vector<40x384xf32>
    %76 = arith.addf %70, %75 : vector<40x384xf32>
    %c12 = arith.constant 12 : index
    %c0_70 = arith.constant 0 : index
    %c0_71 = arith.constant 0 : index
    %77 = vector.load %arg4[%c12, %c0_70, %c0_71] : memref<25x40x40xbf16, #tpu.memory_space<vmem>>, vector<1x40x40xbf16>
    %78 = vector.shape_cast %77 : vector<1x40x40xbf16> to vector<40x40xbf16>
    %c0_72 = arith.constant 0 : index
    %c0_73 = arith.constant 0 : index
    %c100 = arith.constant 100 : index
    %79 = vector.load %arg1[%c0_72, %c0_73, %c100] : memref<1x40x584xbf16, #tpu.memory_space<vmem>>, vector<1x40x384xbf16>
    %80 = vector.shape_cast %79 : vector<1x40x384xbf16> to vector<40x384xbf16>
    %cst_74 = arith.constant dense<0.000000e+00> : vector<40x384xf32>
    %81 = tpu.matmul %78, %80, %cst_74 {dimension_numbers = #tpu.dot_dimension_numbers<[1], [0], [0], [1], [0, 0, 1, 1], [], []>} : vector<40x40xbf16>, vector<40x384xbf16>, vector<40x384xf32> -> vector<40x384xf32>
    %82 = arith.addf %76, %81 : vector<40x384xf32>
    %c13 = arith.constant 13 : index
    %c0_75 = arith.constant 0 : index
    %c0_76 = arith.constant 0 : index
    %83 = vector.load %arg4[%c13, %c0_75, %c0_76] : memref<25x40x40xbf16, #tpu.memory_space<vmem>>, vector<1x40x40xbf16>
    %84 = vector.shape_cast %83 : vector<1x40x40xbf16> to vector<40x40xbf16>
    %c0_77 = arith.constant 0 : index
    %c0_78 = arith.constant 0 : index
    %c102 = arith.constant 102 : index
    %85 = vector.load %arg1[%c0_77, %c0_78, %c102] : memref<1x40x584xbf16, #tpu.memory_space<vmem>>, vector<1x40x384xbf16>
    %86 = vector.shape_cast %85 : vector<1x40x384xbf16> to vector<40x384xbf16>
    %cst_79 = arith.constant dense<0.000000e+00> : vector<40x384xf32>
    %87 = tpu.matmul %84, %86, %cst_79 {dimension_numbers = #tpu.dot_dimension_numbers<[1], [0], [0], [1], [0, 0, 1, 1], [], []>} : vector<40x40xbf16>, vector<40x384xbf16>, vector<40x384xf32> -> vector<40x384xf32>
    %88 = arith.addf %82, %87 : vector<40x384xf32>
    %c14 = arith.constant 14 : index
    %c0_80 = arith.constant 0 : index
    %c0_81 = arith.constant 0 : index
    %89 = vector.load %arg4[%c14, %c0_80, %c0_81] : memref<25x40x40xbf16, #tpu.memory_space<vmem>>, vector<1x40x40xbf16>
    %90 = vector.shape_cast %89 : vector<1x40x40xbf16> to vector<40x40xbf16>
    %c0_82 = arith.constant 0 : index
    %c0_83 = arith.constant 0 : index
    %c104 = arith.constant 104 : index
    %91 = vector.load %arg1[%c0_82, %c0_83, %c104] : memref<1x40x584xbf16, #tpu.memory_space<vmem>>, vector<1x40x384xbf16>
    %92 = vector.shape_cast %91 : vector<1x40x384xbf16> to vector<40x384xbf16>
    %cst_84 = arith.constant dense<0.000000e+00> : vector<40x384xf32>
    %93 = tpu.matmul %90, %92, %cst_84 {dimension_numbers = #tpu.dot_dimension_numbers<[1], [0], [0], [1], [0, 0, 1, 1], [], []>} : vector<40x40xbf16>, vector<40x384xbf16>, vector<40x384xf32> -> vector<40x384xf32>
    %94 = arith.addf %88, %93 : vector<40x384xf32>
    %c15 = arith.constant 15 : index
    %c0_85 = arith.constant 0 : index
    %c0_86 = arith.constant 0 : index
    %95 = vector.load %arg4[%c15, %c0_85, %c0_86] : memref<25x40x40xbf16, #tpu.memory_space<vmem>>, vector<1x40x40xbf16>
    %96 = vector.shape_cast %95 : vector<1x40x40xbf16> to vector<40x40xbf16>
    %c0_87 = arith.constant 0 : index
    %c0_88 = arith.constant 0 : index
    %c144 = arith.constant 144 : index
    %97 = vector.load %arg1[%c0_87, %c0_88, %c144] : memref<1x40x584xbf16, #tpu.memory_space<vmem>>, vector<1x40x384xbf16>
    %98 = vector.shape_cast %97 : vector<1x40x384xbf16> to vector<40x384xbf16>
    %cst_89 = arith.constant dense<0.000000e+00> : vector<40x384xf32>
    %99 = tpu.matmul %96, %98, %cst_89 {dimension_numbers = #tpu.dot_dimension_numbers<[1], [0], [0], [1], [0, 0, 1, 1], [], []>} : vector<40x40xbf16>, vector<40x384xbf16>, vector<40x384xf32> -> vector<40x384xf32>
    %100 = arith.addf %94, %99 : vector<40x384xf32>
    %c16 = arith.constant 16 : index
    %c0_90 = arith.constant 0 : index
    %c0_91 = arith.constant 0 : index
    %101 = vector.load %arg4[%c16, %c0_90, %c0_91] : memref<25x40x40xbf16, #tpu.memory_space<vmem>>, vector<1x40x40xbf16>
    %102 = vector.shape_cast %101 : vector<1x40x40xbf16> to vector<40x40xbf16>
    %c0_92 = arith.constant 0 : index
    %c0_93 = arith.constant 0 : index
    %c146 = arith.constant 146 : index
    %103 = vector.load %arg1[%c0_92, %c0_93, %c146] : memref<1x40x584xbf16, #tpu.memory_space<vmem>>, vector<1x40x384xbf16>
    %104 = vector.shape_cast %103 : vector<1x40x384xbf16> to vector<40x384xbf16>
    %cst_94 = arith.constant dense<0.000000e+00> : vector<40x384xf32>
    %105 = tpu.matmul %102, %104, %cst_94 {dimension_numbers = #tpu.dot_dimension_numbers<[1], [0], [0], [1], [0, 0, 1, 1], [], []>} : vector<40x40xbf16>, vector<40x384xbf16>, vector<40x384xf32> -> vector<40x384xf32>
    %106 = arith.addf %100, %105 : vector<40x384xf32>
    %c17 = arith.constant 17 : index
    %c0_95 = arith.constant 0 : index
    %c0_96 = arith.constant 0 : index
    %107 = vector.load %arg4[%c17, %c0_95, %c0_96] : memref<25x40x40xbf16, #tpu.memory_space<vmem>>, vector<1x40x40xbf16>
    %108 = vector.shape_cast %107 : vector<1x40x40xbf16> to vector<40x40xbf16>
    %c0_97 = arith.constant 0 : index
    %c0_98 = arith.constant 0 : index
    %c148 = arith.constant 148 : index
    %109 = vector.load %arg1[%c0_97, %c0_98, %c148] : memref<1x40x584xbf16, #tpu.memory_space<vmem>>, vector<1x40x384xbf16>
    %110 = vector.shape_cast %109 : vector<1x40x384xbf16> to vector<40x384xbf16>
    %cst_99 = arith.constant dense<0.000000e+00> : vector<40x384xf32>
    %111 = tpu.matmul %108, %110, %cst_99 {dimension_numbers = #tpu.dot_dimension_numbers<[1], [0], [0], [1], [0, 0, 1, 1], [], []>} : vector<40x40xbf16>, vector<40x384xbf16>, vector<40x384xf32> -> vector<40x384xf32>
    %112 = arith.addf %106, %111 : vector<40x384xf32>
    %c18 = arith.constant 18 : index
    %c0_100 = arith.constant 0 : index
    %c0_101 = arith.constant 0 : index
    %113 = vector.load %arg4[%c18, %c0_100, %c0_101] : memref<25x40x40xbf16, #tpu.memory_space<vmem>>, vector<1x40x40xbf16>
    %114 = vector.shape_cast %113 : vector<1x40x40xbf16> to vector<40x40xbf16>
    %c0_102 = arith.constant 0 : index
    %c0_103 = arith.constant 0 : index
    %c150 = arith.constant 150 : index
    %115 = vector.load %arg1[%c0_102, %c0_103, %c150] : memref<1x40x584xbf16, #tpu.memory_space<vmem>>, vector<1x40x384xbf16>
    %116 = vector.shape_cast %115 : vector<1x40x384xbf16> to vector<40x384xbf16>
    %cst_104 = arith.constant dense<0.000000e+00> : vector<40x384xf32>
    %117 = tpu.matmul %114, %116, %cst_104 {dimension_numbers = #tpu.dot_dimension_numbers<[1], [0], [0], [1], [0, 0, 1, 1], [], []>} : vector<40x40xbf16>, vector<40x384xbf16>, vector<40x384xf32> -> vector<40x384xf32>
    %118 = arith.addf %112, %117 : vector<40x384xf32>
    %c19 = arith.constant 19 : index
    %c0_105 = arith.constant 0 : index
    %c0_106 = arith.constant 0 : index
    %119 = vector.load %arg4[%c19, %c0_105, %c0_106] : memref<25x40x40xbf16, #tpu.memory_space<vmem>>, vector<1x40x40xbf16>
    %120 = vector.shape_cast %119 : vector<1x40x40xbf16> to vector<40x40xbf16>
    %c0_107 = arith.constant 0 : index
    %c0_108 = arith.constant 0 : index
    %c152 = arith.constant 152 : index
    %121 = vector.load %arg1[%c0_107, %c0_108, %c152] : memref<1x40x584xbf16, #tpu.memory_space<vmem>>, vector<1x40x384xbf16>
    %122 = vector.shape_cast %121 : vector<1x40x384xbf16> to vector<40x384xbf16>
    %cst_109 = arith.constant dense<0.000000e+00> : vector<40x384xf32>
    %123 = tpu.matmul %120, %122, %cst_109 {dimension_numbers = #tpu.dot_dimension_numbers<[1], [0], [0], [1], [0, 0, 1, 1], [], []>} : vector<40x40xbf16>, vector<40x384xbf16>, vector<40x384xf32> -> vector<40x384xf32>
    %124 = arith.addf %118, %123 : vector<40x384xf32>
    %c20 = arith.constant 20 : index
    %c0_110 = arith.constant 0 : index
    %c0_111 = arith.constant 0 : index
    %125 = vector.load %arg4[%c20, %c0_110, %c0_111] : memref<25x40x40xbf16, #tpu.memory_space<vmem>>, vector<1x40x40xbf16>
    %126 = vector.shape_cast %125 : vector<1x40x40xbf16> to vector<40x40xbf16>
    %c0_112 = arith.constant 0 : index
    %c0_113 = arith.constant 0 : index
    %c192 = arith.constant 192 : index
    %127 = vector.load %arg1[%c0_112, %c0_113, %c192] : memref<1x40x584xbf16, #tpu.memory_space<vmem>>, vector<1x40x384xbf16>
    %128 = vector.shape_cast %127 : vector<1x40x384xbf16> to vector<40x384xbf16>
    %cst_114 = arith.constant dense<0.000000e+00> : vector<40x384xf32>
    %129 = tpu.matmul %126, %128, %cst_114 {dimension_numbers = #tpu.dot_dimension_numbers<[1], [0], [0], [1], [0, 0, 1, 1], [], []>} : vector<40x40xbf16>, vector<40x384xbf16>, vector<40x384xf32> -> vector<40x384xf32>
    %130 = arith.addf %124, %129 : vector<40x384xf32>
    %c21 = arith.constant 21 : index
    %c0_115 = arith.constant 0 : index
    %c0_116 = arith.constant 0 : index
    %131 = vector.load %arg4[%c21, %c0_115, %c0_116] : memref<25x40x40xbf16, #tpu.memory_space<vmem>>, vector<1x40x40xbf16>
    %132 = vector.shape_cast %131 : vector<1x40x40xbf16> to vector<40x40xbf16>
    %c0_117 = arith.constant 0 : index
    %c0_118 = arith.constant 0 : index
    %c194 = arith.constant 194 : index
    %133 = vector.load %arg1[%c0_117, %c0_118, %c194] : memref<1x40x584xbf16, #tpu.memory_space<vmem>>, vector<1x40x384xbf16>
    %134 = vector.shape_cast %133 : vector<1x40x384xbf16> to vector<40x384xbf16>
    %cst_119 = arith.constant dense<0.000000e+00> : vector<40x384xf32>
    %135 = tpu.matmul %132, %134, %cst_119 {dimension_numbers = #tpu.dot_dimension_numbers<[1], [0], [0], [1], [0, 0, 1, 1], [], []>} : vector<40x40xbf16>, vector<40x384xbf16>, vector<40x384xf32> -> vector<40x384xf32>
    %136 = arith.addf %130, %135 : vector<40x384xf32>
    %c22 = arith.constant 22 : index
    %c0_120 = arith.constant 0 : index
    %c0_121 = arith.constant 0 : index
    %137 = vector.load %arg4[%c22, %c0_120, %c0_121] : memref<25x40x40xbf16, #tpu.memory_space<vmem>>, vector<1x40x40xbf16>
    %138 = vector.shape_cast %137 : vector<1x40x40xbf16> to vector<40x40xbf16>
    %c0_122 = arith.constant 0 : index
    %c0_123 = arith.constant 0 : index
    %c196 = arith.constant 196 : index
    %139 = vector.load %arg1[%c0_122, %c0_123, %c196] : memref<1x40x584xbf16, #tpu.memory_space<vmem>>, vector<1x40x384xbf16>
    %140 = vector.shape_cast %139 : vector<1x40x384xbf16> to vector<40x384xbf16>
    %cst_124 = arith.constant dense<0.000000e+00> : vector<40x384xf32>
    %141 = tpu.matmul %138, %140, %cst_124 {dimension_numbers = #tpu.dot_dimension_numbers<[1], [0], [0], [1], [0, 0, 1, 1], [], []>} : vector<40x40xbf16>, vector<40x384xbf16>, vector<40x384xf32> -> vector<40x384xf32>
    %142 = arith.addf %136, %141 : vector<40x384xf32>
    %c23 = arith.constant 23 : index
    %c0_125 = arith.constant 0 : index
    %c0_126 = arith.constant 0 : index
    %143 = vector.load %arg4[%c23, %c0_125, %c0_126] : memref<25x40x40xbf16, #tpu.memory_space<vmem>>, vector<1x40x40xbf16>
    %144 = vector.shape_cast %143 : vector<1x40x40xbf16> to vector<40x40xbf16>
    %c0_127 = arith.constant 0 : index
    %c0_128 = arith.constant 0 : index
    %c198 = arith.constant 198 : index
    %145 = vector.load %arg1[%c0_127, %c0_128, %c198] : memref<1x40x584xbf16, #tpu.memory_space<vmem>>, vector<1x40x384xbf16>
    %146 = vector.shape_cast %145 : vector<1x40x384xbf16> to vector<40x384xbf16>
    %cst_129 = arith.constant dense<0.000000e+00> : vector<40x384xf32>
    %147 = tpu.matmul %144, %146, %cst_129 {dimension_numbers = #tpu.dot_dimension_numbers<[1], [0], [0], [1], [0, 0, 1, 1], [], []>} : vector<40x40xbf16>, vector<40x384xbf16>, vector<40x384xf32> -> vector<40x384xf32>
    %148 = arith.addf %142, %147 : vector<40x384xf32>
    %c24 = arith.constant 24 : index
    %c0_130 = arith.constant 0 : index
    %c0_131 = arith.constant 0 : index
    %149 = vector.load %arg4[%c24, %c0_130, %c0_131] : memref<25x40x40xbf16, #tpu.memory_space<vmem>>, vector<1x40x40xbf16>
    %150 = vector.shape_cast %149 : vector<1x40x40xbf16> to vector<40x40xbf16>
    %c0_132 = arith.constant 0 : index
    %c0_133 = arith.constant 0 : index
    %c200 = arith.constant 200 : index
    %151 = vector.load %arg1[%c0_132, %c0_133, %c200] : memref<1x40x584xbf16, #tpu.memory_space<vmem>>, vector<1x40x384xbf16>
    %152 = vector.shape_cast %151 : vector<1x40x384xbf16> to vector<40x384xbf16>
    %cst_134 = arith.constant dense<0.000000e+00> : vector<40x384xf32>
    %153 = tpu.matmul %150, %152, %cst_134 {dimension_numbers = #tpu.dot_dimension_numbers<[1], [0], [0], [1], [0, 0, 1, 1], [], []>} : vector<40x40xbf16>, vector<40x384xbf16>, vector<40x384xf32> -> vector<40x384xf32>
    %154 = arith.addf %148, %153 : vector<40x384xf32>
    %c0_135 = arith.constant 0 : index
    %c0_136 = arith.constant 0 : index
    %155 = vector.load %arg5[%c0_135, %c0_136] : memref<40x1xf32, #tpu.memory_space<vmem>>, vector<40x1xf32>
    %156 = vector.broadcast %155 : vector<40x1xf32> to vector<40x384xf32>
    %157 = arith.mulf %154, %156 : vector<40x384xf32>
    %c0_137 = arith.constant 0 : index
    %c0_138 = arith.constant 0 : index
    %158 = vector.load %arg6[%c0_137, %c0_138] : memref<40x1xf32, #tpu.memory_space<vmem>>, vector<40x1xf32>
    %159 = vector.broadcast %158 : vector<40x1xf32> to vector<40x384xf32>
    %160 = arith.addf %157, %159 : vector<40x384xf32>
    %cst_139 = arith.constant 0.000000e+00 : f32
    %161 = vector.broadcast %cst_139 : f32 to vector<40x384xf32>
    %162 = arith.maximumf %160, %161 : vector<40x384xf32>
    %c0_140 = arith.constant 0 : index
    %c0_141 = arith.constant 0 : index
    %163 = vector.load %arg7[%c0_140, %c0_141] : memref<6x40xbf16, #tpu.memory_space<vmem>>, vector<6x40xbf16>
    %164 = arith.truncf %162 : vector<40x384xf32> to vector<40x384xbf16>
    %cst_142 = arith.constant dense<0.000000e+00> : vector<6x384xf32>
    %165 = tpu.matmul %163, %164, %cst_142 {dimension_numbers = #tpu.dot_dimension_numbers<[1], [0], [0], [1], [0, 0, 1, 1], [], []>} : vector<6x40xbf16>, vector<40x384xbf16>, vector<6x384xf32> -> vector<6x384xf32>
    %c0_143 = arith.constant 0 : index
    %c0_144 = arith.constant 0 : index
    %166 = vector.load %arg8[%c0_143, %c0_144] : memref<6x1xf32, #tpu.memory_space<vmem>>, vector<6x1xf32>
    %167 = vector.broadcast %166 : vector<6x1xf32> to vector<6x384xf32>
    %168 = arith.addf %165, %167 : vector<6x384xf32>
    %c0_145 = arith.constant 0 : index
    %c0_146 = arith.constant 0 : index
    %c0_147 = arith.constant 0 : index
    %169 = vector.load %arg2[%c0_145, %c0_146, %c0_147] : memref<1x6x384xf32, #tpu.memory_space<vmem>>, vector<1x6x384xf32>
    %170 = vector.shape_cast %169 : vector<1x6x384xf32> to vector<6x384xf32>
    %171 = arith.addf %168, %170 : vector<6x384xf32>
    %c0_148 = arith.constant 0 : index
    %c0_149 = arith.constant 0 : index
    %172 = vector.load %arg9[%c0_148, %c0_149] : memref<32x6xbf16, #tpu.memory_space<vmem>>, vector<32x6xbf16>
    %173 = arith.truncf %171 : vector<6x384xf32> to vector<6x384xbf16>
    %cst_150 = arith.constant dense<0.000000e+00> : vector<32x384xf32>
    %174 = tpu.matmul %172, %173, %cst_150 {dimension_numbers = #tpu.dot_dimension_numbers<[1], [0], [0], [1], [0, 0, 1, 1], [], []>} : vector<32x6xbf16>, vector<6x384xbf16>, vector<32x384xf32> -> vector<32x384xf32>
    %c0_151 = arith.constant 0 : index
    %c0_152 = arith.constant 0 : index
    %175 = vector.load %arg10[%c0_151, %c0_152] : memref<32x1xf32, #tpu.memory_space<vmem>>, vector<32x1xf32>
    %176 = vector.broadcast %175 : vector<32x1xf32> to vector<32x384xf32>
    %177 = arith.mulf %174, %176 : vector<32x384xf32>
    %c0_153 = arith.constant 0 : index
    %c0_154 = arith.constant 0 : index
    %178 = vector.load %arg11[%c0_153, %c0_154] : memref<32x1xf32, #tpu.memory_space<vmem>>, vector<32x1xf32>
    %179 = vector.broadcast %178 : vector<32x1xf32> to vector<32x384xf32>
    %180 = arith.addf %177, %179 : vector<32x384xf32>
    %cst_155 = arith.constant 0.000000e+00 : f32
    %181 = vector.broadcast %cst_155 : f32 to vector<32x384xf32>
    %182 = arith.maximumf %180, %181 : vector<32x384xf32>
    %c0_156 = arith.constant 0 : index
    %c0_157 = arith.constant 0 : index
    %183 = vector.load %arg3[%c0_156, %c0_157] : memref<1x384xf32, #tpu.memory_space<vmem>>, vector<1x384xf32>
    %184 = vector.broadcast %183 : vector<1x384xf32> to vector<32x384xf32>
    %185 = arith.mulf %182, %184 : vector<32x384xf32>
    %186 = arith.truncf %185 : vector<32x384xf32> to vector<32x384xbf16>
    %c0_158 = arith.constant 0 : index
    %c25 = arith.constant 25 : index
    %187 = vector.load %arg20[%c0_158, %c25] : memref<32x440xbf16, #tpu.memory_space<vmem>>, vector<32x384xbf16>
    tpu.vector_store %arg20[%c0_158, %c25], %186 {strides = array<i32>} : memref<32x440xbf16, #tpu.memory_space<vmem>>, vector<32x384xbf16>,
    %cst_159 = arith.constant 0.000000e+00 : f32
    %188 = vector.broadcast %cst_159 : f32 to vector<32x384xf32>
    %c0_160 = arith.constant 0 : index
    %c0_161 = arith.constant 0 : index
    %c0_162 = arith.constant 0 : index
    %189 = vector.load %arg12[%c0_160, %c0_161, %c0_162] : memref<9x32x32xbf16, #tpu.memory_space<vmem>>, vector<1x32x32xbf16>
    %190 = vector.shape_cast %189 : vector<1x32x32xbf16> to vector<32x32xbf16>
    %c0_163 = arith.constant 0 : index
    %c0_164 = arith.constant 0 : index
    %191 = vector.load %arg20[%c0_163, %c0_164] : memref<32x440xbf16, #tpu.memory_space<vmem>>, vector<32x384xbf16>
    %cst_165 = arith.constant dense<0.000000e+00> : vector<32x384xf32>
    %192 = tpu.matmul %190, %191, %cst_165 {dimension_numbers = #tpu.dot_dimension_numbers<[1], [0], [0], [1], [0, 0, 1, 1], [], []>} : vector<32x32xbf16>, vector<32x384xbf16>, vector<32x384xf32> -> vector<32x384xf32>
    %193 = arith.addf %188, %192 : vector<32x384xf32>
    %c1_166 = arith.constant 1 : index
    %c0_167 = arith.constant 0 : index
    %c0_168 = arith.constant 0 : index
    %194 = vector.load %arg12[%c1_166, %c0_167, %c0_168] : memref<9x32x32xbf16, #tpu.memory_space<vmem>>, vector<1x32x32xbf16>
    %195 = vector.shape_cast %194 : vector<1x32x32xbf16> to vector<32x32xbf16>
    %c0_169 = arith.constant 0 : index
    %c1_170 = arith.constant 1 : index
    %196 = vector.load %arg20[%c0_169, %c1_170] : memref<32x440xbf16, #tpu.memory_space<vmem>>, vector<32x384xbf16>
    %cst_171 = arith.constant dense<0.000000e+00> : vector<32x384xf32>
    %197 = tpu.matmul %195, %196, %cst_171 {dimension_numbers = #tpu.dot_dimension_numbers<[1], [0], [0], [1], [0, 0, 1, 1], [], []>} : vector<32x32xbf16>, vector<32x384xbf16>, vector<32x384xf32> -> vector<32x384xf32>
    %198 = arith.addf %193, %197 : vector<32x384xf32>
    %c2_172 = arith.constant 2 : index
    %c0_173 = arith.constant 0 : index
    %c0_174 = arith.constant 0 : index
    %199 = vector.load %arg12[%c2_172, %c0_173, %c0_174] : memref<9x32x32xbf16, #tpu.memory_space<vmem>>, vector<1x32x32xbf16>
    %200 = vector.shape_cast %199 : vector<1x32x32xbf16> to vector<32x32xbf16>
    %c0_175 = arith.constant 0 : index
    %c2_176 = arith.constant 2 : index
    %201 = vector.load %arg20[%c0_175, %c2_176] : memref<32x440xbf16, #tpu.memory_space<vmem>>, vector<32x384xbf16>
    %cst_177 = arith.constant dense<0.000000e+00> : vector<32x384xf32>
    %202 = tpu.matmul %200, %201, %cst_177 {dimension_numbers = #tpu.dot_dimension_numbers<[1], [0], [0], [1], [0, 0, 1, 1], [], []>} : vector<32x32xbf16>, vector<32x384xbf16>, vector<32x384xf32> -> vector<32x384xf32>
    %203 = arith.addf %198, %202 : vector<32x384xf32>
    %c3_178 = arith.constant 3 : index
    %c0_179 = arith.constant 0 : index
    %c0_180 = arith.constant 0 : index
    %204 = vector.load %arg12[%c3_178, %c0_179, %c0_180] : memref<9x32x32xbf16, #tpu.memory_space<vmem>>, vector<1x32x32xbf16>
    %205 = vector.shape_cast %204 : vector<1x32x32xbf16> to vector<32x32xbf16>
    %c0_181 = arith.constant 0 : index
    %c24_182 = arith.constant 24 : index
    %206 = vector.load %arg20[%c0_181, %c24_182] : memref<32x440xbf16, #tpu.memory_space<vmem>>, vector<32x384xbf16>
    %cst_183 = arith.constant dense<0.000000e+00> : vector<32x384xf32>
    %207 = tpu.matmul %205, %206, %cst_183 {dimension_numbers = #tpu.dot_dimension_numbers<[1], [0], [0], [1], [0, 0, 1, 1], [], []>} : vector<32x32xbf16>, vector<32x384xbf16>, vector<32x384xf32> -> vector<32x384xf32>
    %208 = arith.addf %203, %207 : vector<32x384xf32>
    %c4_184 = arith.constant 4 : index
    %c0_185 = arith.constant 0 : index
    %c0_186 = arith.constant 0 : index
    %209 = vector.load %arg12[%c4_184, %c0_185, %c0_186] : memref<9x32x32xbf16, #tpu.memory_space<vmem>>, vector<1x32x32xbf16>
    %210 = vector.shape_cast %209 : vector<1x32x32xbf16> to vector<32x32xbf16>
    %c0_187 = arith.constant 0 : index
    %c25_188 = arith.constant 25 : index
    %211 = vector.load %arg20[%c0_187, %c25_188] : memref<32x440xbf16, #tpu.memory_space<vmem>>, vector<32x384xbf16>
    %cst_189 = arith.constant dense<0.000000e+00> : vector<32x384xf32>
    %212 = tpu.matmul %210, %211, %cst_189 {dimension_numbers = #tpu.dot_dimension_numbers<[1], [0], [0], [1], [0, 0, 1, 1], [], []>} : vector<32x32xbf16>, vector<32x384xbf16>, vector<32x384xf32> -> vector<32x384xf32>
    %213 = arith.addf %208, %212 : vector<32x384xf32>
    %c5_190 = arith.constant 5 : index
    %c0_191 = arith.constant 0 : index
    %c0_192 = arith.constant 0 : index
    %214 = vector.load %arg12[%c5_190, %c0_191, %c0_192] : memref<9x32x32xbf16, #tpu.memory_space<vmem>>, vector<1x32x32xbf16>
    %215 = vector.shape_cast %214 : vector<1x32x32xbf16> to vector<32x32xbf16>
    %c0_193 = arith.constant 0 : index
    %c26 = arith.constant 26 : index
    %216 = vector.load %arg20[%c0_193, %c26] : memref<32x440xbf16, #tpu.memory_space<vmem>>, vector<32x384xbf16>
    %cst_194 = arith.constant dense<0.000000e+00> : vector<32x384xf32>
    %217 = tpu.matmul %215, %216, %cst_194 {dimension_numbers = #tpu.dot_dimension_numbers<[1], [0], [0], [1], [0, 0, 1, 1], [], []>} : vector<32x32xbf16>, vector<32x384xbf16>, vector<32x384xf32> -> vector<32x384xf32>
    %218 = arith.addf %213, %217 : vector<32x384xf32>
    %c6_195 = arith.constant 6 : index
    %c0_196 = arith.constant 0 : index
    %c0_197 = arith.constant 0 : index
    %219 = vector.load %arg12[%c6_195, %c0_196, %c0_197] : memref<9x32x32xbf16, #tpu.memory_space<vmem>>, vector<1x32x32xbf16>
    %220 = vector.shape_cast %219 : vector<1x32x32xbf16> to vector<32x32xbf16>
    %c0_198 = arith.constant 0 : index
    %c48_199 = arith.constant 48 : index
    %221 = vector.load %arg20[%c0_198, %c48_199] : memref<32x440xbf16, #tpu.memory_space<vmem>>, vector<32x384xbf16>
    %cst_200 = arith.constant dense<0.000000e+00> : vector<32x384xf32>
    %222 = tpu.matmul %220, %221, %cst_200 {dimension_numbers = #tpu.dot_dimension_numbers<[1], [0], [0], [1], [0, 0, 1, 1], [], []>} : vector<32x32xbf16>, vector<32x384xbf16>, vector<32x384xf32> -> vector<32x384xf32>
    %223 = arith.addf %218, %222 : vector<32x384xf32>
    %c7_201 = arith.constant 7 : index
    %c0_202 = arith.constant 0 : index
    %c0_203 = arith.constant 0 : index
    %224 = vector.load %arg12[%c7_201, %c0_202, %c0_203] : memref<9x32x32xbf16, #tpu.memory_space<vmem>>, vector<1x32x32xbf16>
    %225 = vector.shape_cast %224 : vector<1x32x32xbf16> to vector<32x32xbf16>
    %c0_204 = arith.constant 0 : index
    %c49 = arith.constant 49 : index
    %226 = vector.load %arg20[%c0_204, %c49] : memref<32x440xbf16, #tpu.memory_space<vmem>>, vector<32x384xbf16>
    %cst_205 = arith.constant dense<0.000000e+00> : vector<32x384xf32>
    %227 = tpu.matmul %225, %226, %cst_205 {dimension_numbers = #tpu.dot_dimension_numbers<[1], [0], [0], [1], [0, 0, 1, 1], [], []>} : vector<32x32xbf16>, vector<32x384xbf16>, vector<32x384xf32> -> vector<32x384xf32>
    %228 = arith.addf %223, %227 : vector<32x384xf32>
    %c8_206 = arith.constant 8 : index
    %c0_207 = arith.constant 0 : index
    %c0_208 = arith.constant 0 : index
    %229 = vector.load %arg12[%c8_206, %c0_207, %c0_208] : memref<9x32x32xbf16, #tpu.memory_space<vmem>>, vector<1x32x32xbf16>
    %230 = vector.shape_cast %229 : vector<1x32x32xbf16> to vector<32x32xbf16>
    %c0_209 = arith.constant 0 : index
    %c50_210 = arith.constant 50 : index
    %231 = vector.load %arg20[%c0_209, %c50_210] : memref<32x440xbf16, #tpu.memory_space<vmem>>, vector<32x384xbf16>
    %cst_211 = arith.constant dense<0.000000e+00> : vector<32x384xf32>
    %232 = tpu.matmul %230, %231, %cst_211 {dimension_numbers = #tpu.dot_dimension_numbers<[1], [0], [0], [1], [0, 0, 1, 1], [], []>} : vector<32x32xbf16>, vector<32x384xbf16>, vector<32x384xf32> -> vector<32x384xf32>
    %233 = arith.addf %228, %232 : vector<32x384xf32>
    %c0_212 = arith.constant 0 : index
    %c0_213 = arith.constant 0 : index
    %234 = vector.load %arg13[%c0_212, %c0_213] : memref<32x1xf32, #tpu.memory_space<vmem>>, vector<32x1xf32>
    %235 = vector.broadcast %234 : vector<32x1xf32> to vector<32x384xf32>
    %236 = arith.mulf %233, %235 : vector<32x384xf32>
    %c0_214 = arith.constant 0 : index
    %c0_215 = arith.constant 0 : index
    %237 = vector.load %arg14[%c0_214, %c0_215] : memref<32x1xf32, #tpu.memory_space<vmem>>, vector<32x1xf32>
    %238 = vector.broadcast %237 : vector<32x1xf32> to vector<32x384xf32>
    %239 = arith.addf %236, %238 : vector<32x384xf32>
    %cst_216 = arith.constant 0.000000e+00 : f32
    %240 = vector.broadcast %cst_216 : f32 to vector<32x384xf32>
    %241 = arith.maximumf %239, %240 : vector<32x384xf32>
    %c0_217 = arith.constant 0 : index
    %c0_218 = arith.constant 0 : index
    %242 = vector.load %arg15[%c0_217, %c0_218] : memref<6x32xbf16, #tpu.memory_space<vmem>>, vector<6x32xbf16>
    %243 = arith.truncf %241 : vector<32x384xf32> to vector<32x384xbf16>
    %cst_219 = arith.constant dense<0.000000e+00> : vector<6x384xf32>
    %244 = tpu.matmul %242, %243, %cst_219 {dimension_numbers = #tpu.dot_dimension_numbers<[1], [0], [0], [1], [0, 0, 1, 1], [], []>} : vector<6x32xbf16>, vector<32x384xbf16>, vector<6x384xf32> -> vector<6x384xf32>
    %c0_220 = arith.constant 0 : index
    %c0_221 = arith.constant 0 : index
    %245 = vector.load %arg16[%c0_220, %c0_221] : memref<6x1xf32, #tpu.memory_space<vmem>>, vector<6x1xf32>
    %246 = vector.broadcast %245 : vector<6x1xf32> to vector<6x384xf32>
    %247 = arith.addf %244, %246 : vector<6x384xf32>
    %c0_222 = arith.constant 0 : index
    %c0_223 = arith.constant 0 : index
    %248 = vector.load %arg17[%c0_222, %c0_223] : memref<6x1xf32, #tpu.memory_space<vmem>>, vector<6x1xf32>
    %249 = vector.broadcast %248 : vector<6x1xf32> to vector<6x384xf32>
    %250 = arith.mulf %247, %249 : vector<6x384xf32>
    %c0_224 = arith.constant 0 : index
    %c0_225 = arith.constant 0 : index
    %251 = vector.load %arg18[%c0_224, %c0_225] : memref<6x1xf32, #tpu.memory_space<vmem>>, vector<6x1xf32>
    %252 = vector.broadcast %251 : vector<6x1xf32> to vector<6x384xf32>
    %253 = arith.addf %250, %252 : vector<6x384xf32>
    %254 = arith.addf %253, %171 : vector<6x384xf32>
    %cst_226 = arith.constant 0.000000e+00 : f32
    %255 = vector.broadcast %cst_226 : f32 to vector<6x384xf32>
    %256 = arith.maximumf %254, %255 : vector<6x384xf32>
    %c0_227 = arith.constant 0 : index
    %c0_228 = arith.constant 0 : index
    %c0_229 = arith.constant 0 : index
    %257 = vector.load %arg19[%c0_227, %c0_228, %c0_229] : memref<1x6x384xf32, #tpu.memory_space<vmem>>, vector<1x6x384xf32>
    %258 = vector.shape_cast %257 : vector<1x6x384xf32> to vector<6x384xf32>
    %259 = vector.shape_cast %256 : vector<6x384xf32> to vector<1x6x384xf32>
    tpu.vector_store %arg19[%c0_227, %c0_228, %c0_229], %259 {strides = array<i32>} : memref<1x6x384xf32, #tpu.memory_space<vmem>>, vector<1x6x384xf32>,
    return
  }
  func.func @transform_0(%arg0: i32) -> (i32, i32, i32) {
    %c0_i32 = arith.constant 0 : i32
    %c0_i32_0 = arith.constant 0 : i32
    %c0_i32_1 = arith.constant 0 : i32
    return %arg0, %c0_i32, %c0_i32_0 : i32, i32, i32
  }
  func.func @transform_1(%arg0: i32) -> (i32, i32, i32) {
    %c0_i32 = arith.constant 0 : i32
    %c0_i32_0 = arith.constant 0 : i32
    %c0_i32_1 = arith.constant 0 : i32
    return %arg0, %c0_i32, %c0_i32_0 : i32, i32, i32
  }
  func.func @transform_2(%arg0: i32) -> (i32, i32) {
    %c0_i32 = arith.constant 0 : i32
    %c0_i32_0 = arith.constant 0 : i32
    %c0_i32_1 = arith.constant 0 : i32
    return %c0_i32, %c0_i32_0 : i32, i32
  }
  func.func @transform_3(%arg0: i32) -> (i32, i32, i32) {
    %c0_i32 = arith.constant 0 : i32
    %c0_i32_0 = arith.constant 0 : i32
    %c0_i32_1 = arith.constant 0 : i32
    %c0_i32_2 = arith.constant 0 : i32
    return %c0_i32, %c0_i32_0, %c0_i32_1 : i32, i32, i32
  }
  func.func @transform_4(%arg0: i32) -> (i32, i32) {
    %c0_i32 = arith.constant 0 : i32
    %c0_i32_0 = arith.constant 0 : i32
    %c0_i32_1 = arith.constant 0 : i32
    return %c0_i32, %c0_i32_0 : i32, i32
  }
  func.func @transform_5(%arg0: i32) -> (i32, i32) {
    %c0_i32 = arith.constant 0 : i32
    %c0_i32_0 = arith.constant 0 : i32
    %c0_i32_1 = arith.constant 0 : i32
    return %c0_i32, %c0_i32_0 : i32, i32
  }
  func.func @transform_6(%arg0: i32) -> (i32, i32) {
    %c0_i32 = arith.constant 0 : i32
    %c0_i32_0 = arith.constant 0 : i32
    %c0_i32_1 = arith.constant 0 : i32
    return %c0_i32, %c0_i32_0 : i32, i32
  }
  func.func @transform_7(%arg0: i32) -> (i32, i32) {
    %c0_i32 = arith.constant 0 : i32
    %c0_i32_0 = arith.constant 0 : i32
    %c0_i32_1 = arith.constant 0 : i32
    return %c0_i32, %c0_i32_0 : i32, i32
  }
  func.func @transform_8(%arg0: i32) -> (i32, i32) {
    %c0_i32 = arith.constant 0 : i32
    %c0_i32_0 = arith.constant 0 : i32
    %c0_i32_1 = arith.constant 0 : i32
    return %c0_i32, %c0_i32_0 : i32, i32
  }
  func.func @transform_9(%arg0: i32) -> (i32, i32) {
    %c0_i32 = arith.constant 0 : i32
    %c0_i32_0 = arith.constant 0 : i32
    %c0_i32_1 = arith.constant 0 : i32
    return %c0_i32, %c0_i32_0 : i32, i32
  }
  func.func @transform_10(%arg0: i32) -> (i32, i32) {
    %c0_i32 = arith.constant 0 : i32
    %c0_i32_0 = arith.constant 0 : i32
    %c0_i32_1 = arith.constant 0 : i32
    return %c0_i32, %c0_i32_0 : i32, i32
  }
  func.func @transform_11(%arg0: i32) -> (i32, i32, i32) {
    %c0_i32 = arith.constant 0 : i32
    %c0_i32_0 = arith.constant 0 : i32
    %c0_i32_1 = arith.constant 0 : i32
    %c0_i32_2 = arith.constant 0 : i32
    return %c0_i32, %c0_i32_0, %c0_i32_1 : i32, i32, i32
  }
  func.func @transform_12(%arg0: i32) -> (i32, i32) {
    %c0_i32 = arith.constant 0 : i32
    %c0_i32_0 = arith.constant 0 : i32
    %c0_i32_1 = arith.constant 0 : i32
    return %c0_i32, %c0_i32_0 : i32, i32
  }
  func.func @transform_13(%arg0: i32) -> (i32, i32) {
    %c0_i32 = arith.constant 0 : i32
    %c0_i32_0 = arith.constant 0 : i32
    %c0_i32_1 = arith.constant 0 : i32
    return %c0_i32, %c0_i32_0 : i32, i32
  }
  func.func @transform_14(%arg0: i32) -> (i32, i32) {
    %c0_i32 = arith.constant 0 : i32
    %c0_i32_0 = arith.constant 0 : i32
    %c0_i32_1 = arith.constant 0 : i32
    return %c0_i32, %c0_i32_0 : i32, i32
  }
  func.func @transform_15(%arg0: i32) -> (i32, i32) {
    %c0_i32 = arith.constant 0 : i32
    %c0_i32_0 = arith.constant 0 : i32
    %c0_i32_1 = arith.constant 0 : i32
    return %c0_i32, %c0_i32_0 : i32, i32
  }
  func.func @transform_16(%arg0: i32) -> (i32, i32) {
    %c0_i32 = arith.constant 0 : i32
    %c0_i32_0 = arith.constant 0 : i32
    %c0_i32_1 = arith.constant 0 : i32
    return %c0_i32, %c0_i32_0 : i32, i32
  }
  func.func @transform_17(%arg0: i32) -> (i32, i32) {
    %c0_i32 = arith.constant 0 : i32
    %c0_i32_0 = arith.constant 0 : i32
    %c0_i32_1 = arith.constant 0 : i32
    return %c0_i32, %c0_i32_0 : i32, i32
  }
  func.func @transform_18(%arg0: i32) -> (i32, i32, i32) {
    %c0_i32 = arith.constant 0 : i32
    %c0_i32_0 = arith.constant 0 : i32
    %c0_i32_1 = arith.constant 0 : i32
    return %arg0, %c0_i32, %c0_i32_0 : i32, i32, i32
  }
}

</mosaic_0001>

<bundles_post_ra>
// kernel: tpu_custom_call.1
= control target key start
LH: loop header
LB: loop body
LE: loop exit
PB: predicated region body
PF: predicated region fallthrough
CT: control target
= control target key end

     0   :  { %s11238_s0 = inlined_call_operand.hbm [shape: bf16[2,40,584], index: 0, kind: input, shape index: {}]   ;;  %s11239_s1 = inlined_call_operand.vmem [shape: f32[2,6,384], index: 1, kind: input, shape index: {}]   ;;  %s11240_s2 = inlined_call_operand.vmem [shape: f32[1,384], index: 2, kind: input, shape index: {}]   ;;  %s11241_s3 = inlined_call_operand.hbm [shape: bf16[25,40,40], index: 3, kind: input, shape index: {}]   ;;  %s11242_s4 = inlined_call_operand.vmem [shape: f32[40,1], index: 4, kind: input, shape index: {}]   ;;  %s11243_s5 = inlined_call_operand.vmem [shape: f32[40,1], index: 5, kind: input, shape index: {}]   ;;  %s11244_s6 = inlined_call_operand.vmem [shape: bf16[6,40], index: 6, kind: input, shape index: {}]   ;;  %s11245_s7 = inlined_call_operand.vmem [shape: f32[6,1], index: 7, kind: input, shape index: {}]   ;;  %s11246_s8 = inlined_call_operand.vmem [shape: bf16[32,6], index: 8, kind: input, shape index: {}]   ;;  %s11247_s9 = inlined_call_operand.vmem [shape: f32[32,1], index: 9, kind: input, shape index: {}]   ;;  %s11248_s10 = inlined_call_operand.vmem [shape: f32[32,1], index: 10, kind: input, shape index: {}]   ;;  %s11249_s11 = inlined_call_operand.hbm [shape: bf16[9,32,32], index: 11, kind: input, shape index: {}]   ;;  %s11250_s12 = inlined_call_operand.vmem [shape: f32[32,1], index: 12, kind: input, shape index: {}]   ;;  %s11251_s13 = inlined_call_operand.vmem [shape: f32[32,1], index: 13, kind: input, shape index: {}]   ;;  %s11252_s14 = inlined_call_operand.vmem [shape: bf16[6,32], index: 14, kind: input, shape index: {}]   ;;  %s11253_s15 = inlined_call_operand.vmem [shape: f32[6,1], index: 15, kind: input, shape index: {}]   ;;  %s11254_s16 = inlined_call_operand.vmem [shape: f32[6,1], index: 16, kind: input, shape index: {}]   ;;  %s11255_s17 = inlined_call_operand.vmem [shape: f32[6,1], index: 17, kind: input, shape index: {}]   ;;  %s11256_s18 = inlined_call_operand.vmem [shape: f32[2,6,384], index: 18, kind: output, shape index: {}]  }
   0x1   :  { %11263 = sst [smem:[#allocation18_spill]] %s11238_s0 }
   0x2   :  { %11264 = sst [smem:[#allocation19_spill]] %s11239_s1 }
   0x3   :  { %11265 = sst [smem:[#allocation20_spill]] %s11240_s2 }
   0x4   :  { %11266 = sst [smem:[#allocation21_spill]] %s11241_s3 }
   0x5   :  { %11267 = sst [smem:[#allocation22_spill]] %s11249_s11 }
   0x6   :  { %11268 = sst [smem:[#allocation23_spill]] %s11252_s14 }
   0x7   :  { %11269 = sst [smem:[#allocation24_spill]] %s11254_s16 }
   0x8   :  { %11270 = sst [smem:[#allocation25_spill]] %s11255_s17 }
   0x9   :  { %11271 = sst [smem:[#allocation26_spill]] %s11256_s18 }
   0xa   :  { %23 = vsyncpa [#allocation4], 0 }
   0xb   :  { %25 = vsyncpa [#allocation4 + $0x1], 0 }
   0xc   :  { %26 = vsyncpa [#allocation6], 0  ;;  %s7688_s27 = smov 0   ;;  %s7690_s28 = smov 0  }
   0xd   :  { %s7692_s29 = smov 0   ;;  %s7694_s30 = smov 0  }
   0xe LB: > { %11272 = sst [smem:[#allocation10_spill]] %s7551_s29  ;;  %s7707_s0 = sadd.s32 4294967295, %s7555_s30   ;;  %s7555_s30 = sphi %s7694_s30, %s11303_s30   ;;  %s7551_s29 = sphi %s7692_s29, %s11305_s29   ;;  %s7547_s28 = sphi %s7690_s28, %s11307_s28   ;;  %s7543_s27 = sphi %s7688_s27, %s11306_s27  }
   0xf   : > { %p52_p0 = scmp.ne.s32.totalorder %s7547_s28, %s7543_s27  ;;  %p53_p1 = scmp.eq.s32.totalorder %s7707_s0, 0 }
  0x10   : > { %p6533_p2 = scmp.ge.s32.totalorder %s7555_s30, 1  ;;  %p451_p3 = scmp.lt.s32.totalorder %s7555_s30, 3 }
  0x11   : > { %p7715_p4 = por %p53_p1, %p52_p0  ;;  %s11274_s3 = sld [smem:[#allocation21_spill]] }
  0x12   : > { %p7722_p5 = pnand %p6533_p2, %p451_p3  ;;  %s7557_s2 = smov [#allocation5]  }
  0x13   : > { %s467_s23 = sshll.u32 %s7557_s2, 4  ;;  %s11276_s11 = sld [smem:[#allocation22_spill]]  ;;  %s468_s23 = int_to_ptr.vmem [resolvable:$true] %s467_s23 }
  0x14   : > { %p7340_p6 = pneg %p7722_p5  ;;  %s7558_s27 = smov 64  }
  0x15   : > { %s7559_s1 = smov 4   ;;  %s7560_s20 = smov [#allocation7]  }
  0x16   : > { %p7341_p7 = pnand %p7340_p6, %p53_p1  ;;  %s7734_s2 = sadd.s32 1, %s7555_s30  }
  0x17   : > { %s465_s21 = sshll.u32 %s11274_s3, 4  ;;  %s502_s3 = sshll.u32 %s7560_s20, 4  ;;  %s466_s21 = int_to_ptr.hbm [resolvable:$true] %s465_s21  ;;  %s503_s3 = int_to_ptr.vmem [resolvable:$true] %s502_s3 }
  0x18   : > { %7343 = dma.hbm_to_vmem [thread:$0]  (!%p7341_p7), %s466_s21, 8000, %s468_s23, [#allocation6], %s7558_s27, %s7558_s27, %s7559_s1  }
  0x19   : > { %s500_s26 = sshll.u32 %s11276_s11, 4  ;;  %11277 = sst [smem:[#allocation11_spill]] %s7734_s2  ;;  %s501_s26 = int_to_ptr.hbm [resolvable:$true] %s500_s26 }
  0x1a   : > { %7346 = dma.hbm_to_vmem [thread:$0]  (!%p7341_p7), %s501_s26, 2304, %s503_s3, [#allocation6], %s7558_s27, %s7558_s27, %s7559_s1  }
  0x1b   : > { %s39_s18 = sadd.s32 1, %s7551_s29  ;;  %s36_s14 = ssub.s32 %s7555_s30, %s7734_s2 }
  0x1c   : > { %p46_p8 = scmp.ne.s32.totalorder %s7551_s29, %s7547_s28  ;;  %p37_p9 = scmp.eq.s32.totalorder %s36_s14, 0 }
  0x1d   : > { %p47_p10 = scmp.eq.s32.totalorder %s7555_s30, 0  ;;  %p7353_p11 = scmp.lt.s32.totalorder %s7555_s30, 2 }
  0x1e   : > { %s534_s24 = sand.u32 1, %s7551_s29   ;;  %s7327_s21 = smul.u32 100, %s7555_s30 }
  0x1f   : > { %s7745_s25 = scalar_select %p37_p9, %s7551_s29, %s39_s18  }
  0x20   : > { %p48_p12 = por %p47_p10, %p46_p8  ;;  %s7326_s11 = smul.u32 100, %s534_s24 }
  0x21   : > { %11278 = sst [smem:[#allocation12_spill]] %s7745_s25  ;;  %s535_s16 = scalar_lea.sflag [#allocation4], %s534_s24 }
  0x22   : > { %p7748_p13 = pnand %p7353_p11, %p48_p12  ;;  %s11280_s27 = sld [smem:[#allocation18_spill]] }
  0x23   : > { %s538_s2 = scalar_lea.vmem [#allocation3], %s7326_s11 }
  0x24   : > { %s546_s17 = sshll.u32 %s538_s2, 4  ;;  %p7491_p2 = pneg %p7748_p13  ;;  %s547_s17 = int_to_ptr.vmem [resolvable:$true] %s546_s17 }
  0x28   : > { %s11281_s1 = smov %s11280_s27  ;;  %s543_s20 = scalar_lea.hbm %s11280_s27, %s7327_s21 }
  0x29   : > { %s544_s14 = sshll.u32 %s543_s20, 4  ;;  %s7494_s3 = scalar_lea.hbm %s11281_s1, 200  ;;  %s545_s14 = int_to_ptr.hbm [resolvable:$true] %s544_s14 }
  0x2a   : > { %s7487_s18 = sshra.s32 %s545_s14, 4  ;;  %s7488_s18 = int_to_ptr.hbm [resolvable:$true] %s7487_s18 }
  0x2b   : > { %s7489_s25 = scalar_lea.hbm %s7488_s18, 100  ;;  %p7495_p7 = scmp.lt.s32.totalorder %s7488_s18, %s11281_s1 }
  0x2c   : > { %p7490_p0 = scmp.ne.s32.totalorder %s7488_s18, %s7489_s25  ;;  %p7496_p8 = scmp.lt.s32.totalorder %s7494_s3, %s7489_s25 }
  0x2e   : > { %p7492_p3 = pnand %p7491_p2, %p7490_p0  ;;  %p7497_p9 = por %p7496_p8, %p7495_p7 }
  0x30   : > { %p7493_p6 = pneg %p7492_p3 }
  0x32   : > { %p7498_p10 = pnand %p7497_p9, %p7493_p6 }
  0x34   : > { %7501 = shalt.err (!%p7498_p10)
}
  0x35   : > { %s7561_s11 = smov 320   ;;  %s7562_s2 = smov 20  }
  0x36   : > { %7350 = dma.hbm_to_vmem [thread:$0]  (!%p7748_p13), %s545_s14, 1600, %s547_s17, %s535_s16, %s7561_s11, %s7561_s11, %s7562_s2  }
  0x37   : > { %566 = sbr.rel (%p7722_p5) target bundleno = 2352 (0x930), region = 92 }
  0x3c   : > { %s568_s29 = sand.u32 1, %s7547_s28  }
  0x3d   : > { %s7328_s24 = smul.u32 100, %s568_s29  ;;  %s569_s27 = scalar_lea.sflag [#allocation4], %s568_s29 }
  0x3f   : > { %s7768_s20 = scalar_lea.vmem [#allocation3], %s7328_s24 }
  0x40   : > { %7534 = dma.done.wait (%p7715_p4), %s569_s27, 1600  }
  0x41   : > { %7536 = vsyncadd (%p7715_p4), %s569_s27, 4294965696 }
  0x42   : > { %7538 = dma.done.wait (%p53_p1), [#allocation6], 10304  }
  0x43   : > { %7540 = vsyncadd (%p53_p1), [#allocation6], 4294956992  ;;  %v6569_v0 = vld [vmem:[%s7768_s20 + $0x28] sm:$0xf]  ;;  %v7234_v1 = vld [vmem:[%s7768_s20 + $0x38] sm:$0xf0] }
  0x44   : > { %v675_v2 = vld [vmem:[%s7768_s20 + $0x50] sm:$0xff]  ;;  %v7781_v3 = vor.u32 %v7234_v1, %v6569_v0  ;;  %s7563_s16 = smov 126   ;;  %v6553_v6 = vld [vmem:[%s7768_s20] sm:$0xf]  ;;  %v7233_v8 = vld [vmem:[%s7768_s20 + $0x2c] sm:$0xf] }
  0x45   : > { %v727_v4 = vunpack.c.l.b16 %v675_v2  ;;  %v7231_v7 = vld [vmem:[%s7768_s20 + $0x10] sm:$0xf0]  ;;  %v6571_v9 = vld [vmem:[%s7768_s20 + $0x3c] sm:$0xf0]  ;;  %v728_v11 = vunpack.c.h.b16 %v675_v2  ;;  %v7230_v13 = vld [vmem:[%s7768_s20 + $0x4] sm:$0xf] }
  0x46   : > { %751 = vrot.lane.b32.xlu1 %v7781_v3, %s7563_s16  ;;  %v7791_v10 = vor.u32 %v7231_v7, %v6553_v6  ;;  %v7797_v12 = vor.u32 %v7233_v8, %v6571_v9  ;;  %v6555_v14 = vld [vmem:[%s7768_s20 + $0x14] sm:$0xf0]  ;;  %v6577_v18 = vld [vmem:[%s7768_s20 + $0x30] sm:$0xf]  ;;  %v7241_v19 = vld [vmem:[%s7768_s20 + $0x40] sm:$0xf0] }
  0x47   : > { %v7785_v5 = vpack.c.b16 %v727_v4, %v727_v4  ;;  %v7801_v15 = vpack.c.b16 %v728_v11, %v728_v11  ;;  %v687_v16 = vld [vmem:[%s7768_s20 + $0x58] sm:$0xff]  ;;  %v7804_v17 = vor.u32 %v7230_v13, %v6555_v14  ;;  %v7814_v21 = vor.u32 %v7241_v19, %v6577_v18  ;;  %v6561_v22 = vld [vmem:[%s7768_s20 + $0x8] sm:$0xf]  ;;  %v7240_v26 = vld [vmem:[%s7768_s20 + $0x34] sm:$0xf]  ;;  %s7564_s17 = smov 124  }
  0x48   : > { %743 = vrot.lane.b32.xlu2 %v7791_v10, %s7563_s16  ;;  %v729_v20 = vunpack.c.l.b16 %v687_v16  ;;  %v7239_v23 = vld [vmem:[%s7768_s20 + $0x18] sm:$0xf0]  ;;  %v6579_v27 = vld [vmem:[%s7768_s20 + $0x44] sm:$0xf0]  ;;  %v730_v28 = vunpack.c.h.b16 %v687_v16  ;;  %v7238_v30 = vld [vmem:[%s7768_s20 + $0xc] sm:$0xf] }
  0x49   : > { %759 = vrot.lane.b32.xlu0 %v7785_v5, %s7563_s16  ;;  %v7820_v25 = vor.u32 %v7239_v23, %v6561_v22  ;;  %v7830_v29 = vor.u32 %v7240_v26, %v6579_v27  ;;  %v6563_v31 = vld [vmem:[%s7768_s20 + $0x1c] sm:$0xf0]  ;;  %s7565_s19 = smov 122   ;;  %vm793_vm0 = vcmask 1043456   ;;  %s7566_s22 = smov 120   ;;  %v7888_v36 = vld [vmem:[#allocation5] sm:$0xff] }
  0x4a   : > { %v7818_v24 = vpack.c.b16 %v729_v20, %v729_v20  ;;  %v7834_v32 = vpack.c.b16 %v730_v28, %v730_v28  ;;  %v7836_v33 = vor.u32 %v7238_v30, %v6563_v31  ;;  %v914_v34 = vsel %vm793_vm0, %v7785_v5, 0  ;;  %v7906_v40 = vld [vmem:[#allocation5 + $0x8] sm:$0xff]  ;;  %s7567_s25 = smov 80   ;;  %v666_v48 = vld [vmem:[#allocation5 + $0x10] sm:$0xf]  ;;  %v7236_v58 = vld [vmem:[#allocation5 + $0x14] sm:$0xff] }
  0x4b   : > { %927 = vmatpush.bf16.msra.mxu3 %v914_v34  ;;  %vm783_vm1 = vcmask 326656   ;;  %vm767_vm2 = vcmask 1031168   ;;  %v881_v49 = vunpack.c.l.b16 %v666_v48  ;;  %v917_v62 = vsel %vm793_vm0, %v7801_v15, 0  ;;  %v676_v7 = vld [vmem:[%s7768_s20 + $0x58] sm:$0xf]  ;;  %v7237_v16 = vld [vmem:[#allocation5 + $0x1c] sm:$0xff] }
  0x4c   : > { %v894_v8 = vunpack.c.l.b16 %v676_v7  ;;  %s7568_s23 = smov 78   ;;  %v6606_v19 = vld [vmem:[%s7768_s20 + $0x30] sm:$0xf]  ;;  %v7235_v20 = vld [vmem:[%s7768_s20 + $0x40] sm:$0xf0]  ;;  %vm1034_vm3 = vcmask 1014784  }
  0x4d   : > { %v7927_v52 = vpack.c.b16 %v881_v49, %v881_v49  ;;  %v6607_v23 = vor.u32 %v7235_v20, %v6606_v19  ;;  %v6602_v27 = vld [vmem:[%s7768_s20 + $0x8] sm:$0xf]  ;;  %v7232_v28 = vld [vmem:[%s7768_s20 + $0x18] sm:$0xf0]  ;;  %vm1195_vm4 = vcmask 998400   ;;  %s7569_s14 = smov 76  }
  0x4e   : > { %753 = vrot.lane.b32.xlu1 %v7797_v12, %s7563_s16  ;;  %v897_v14 = vpack.c.b16 %v894_v8, %v894_v8  ;;  %v6603_v34 = vor.u32 %v7232_v28, %v6602_v27  ;;  %vm1356_vm5 = vcmask 982016   ;;  %s7570_s18 = smov 74   ;;  %vm1517_vm6 = vcmask 654336   ;;  %s7571_s30 = smov 72  }
  0x4f   : > { %928 = vmatpush.bf16.msra.mxu3 %v7781_v3  ;;  %s7572_s3 = smov 32   ;;  %vm1678_vm7 = vcmask 637952   ;;  %s7573_s26 = smov 30   ;;  %vm1839_vm8 = vcmask 621568   ;;  %vm2000_vm9 = vcmask 605184   ;;  %vm2161_vm10 = vcmask 588800  }
  0x50   : > { %745 = vrot.lane.b32.xlu2 %v7804_v17, %s7563_s16  ;;  %v920_v18 = vsel %vm793_vm0, %v897_v14, 0  ;;  %s7574_s21 = smov 28   ;;  %s7575_s11 = smov 26   ;;  %vm2322_vm11 = vcmask 261120   ;;  %vm2483_vm12 = vcmask 244736   ;;  %vm2644_vm13 = vcmask 228352  }
  0x51   : > { %761 = vrot.lane.b32.xlu0 %v7801_v15, %s7563_s16  ;;  %s7576_s2 = smov 24   ;;  %s7577_s29 = smov 112   ;;  %vm2805_vm14 = vcmask 211968   ;;  %vm2966_vm15 = vcmask 195584  }
  0x52   : > { %s7578_s24 = smov 110   ;;  %s7579_s27 = smov 108  }
  0x53   : > { %929 = vmatpush.bf16.msra.mxu3 %v7791_v10  ;;  %p641_p1 = scmp.lt.s32.totalorder %s7707_s0, 1 }
  0x55   : > { %s11309_s0 = smov (!%p641_p1, %s7707_s0), 1 }
  0x56   : > { %755 = vrot.lane.b32.xlu1 %v7814_v21, %s7563_s16  ;;  %6608 = vmatmul.msk.bf16.vlgmr.msra.gmra.mxu3 %vm783_vm1, %v7888_v36 }
  0x58   : > { %747 = vrot.lane.b32.xlu2 %v7820_v25, %s7563_s16 }
  0x59   : > { %763 = vrot.lane.b32.xlu0 %v7818_v24, %s7563_s16 }
  0x5e   : > { %757 = vrot.lane.b32.xlu1 %v7830_v29, %s7563_s16 }
  0x60   : > { %749 = vrot.lane.b32.xlu2 %v7836_v33, %s7563_s16 }
  0x61   : > { %765 = vrot.lane.b32.xlu0 %v7834_v32, %s7563_s16 }
  0x66   : > { %1028 = vrot.lane.b32.xlu1 %v7801_v15, %s7564_s17  ;;  %6609 = vmatmul.msk.bf16.gmra.mxu3 %vm783_vm1, %v7906_v40 }
  0x68   : > { %1018 = vrot.lane.b32.xlu2 %v7781_v3, %s7564_s17 }
  0x69   : > { %1026 = vrot.lane.b32.xlu0 %v7785_v5, %s7564_s17 }
  0x6e   : > { %1010 = vrot.lane.b32.xlu1 %v7791_v10, %s7564_s17 }
  0x70   : > { %1012 = vrot.lane.b32.xlu2 %v7804_v17, %s7564_s17 }
  0x71   : > { %1020 = vrot.lane.b32.xlu0 %v7797_v12, %s7564_s17 }
  0x76   : > { %1032 = vrot.lane.b32.xlu1 %v7834_v32, %s7564_s17  ;;  %6610 = vmatmul.msk.bf16.gmra.mxu3 %vm783_vm1, %v7927_v52 }
  0x78   : > { %1022 = vrot.lane.b32.xlu2 %v7814_v21, %s7564_s17 }
  0x79   : > { %1030 = vrot.lane.b32.xlu0 %v7818_v24, %s7564_s17 }
  0x7e   : > { %1014 = vrot.lane.b32.xlu1 %v7820_v25, %s7564_s17 }
  0x80   : > { %1016 = vrot.lane.b32.xlu2 %v7836_v33, %s7564_s17 }
  0x81   : > { %1024 = vrot.lane.b32.xlu0 %v7830_v29, %s7564_s17  ;;  %s7581_s17 = smov 104  }
  0x86   : > { %1189 = vrot.lane.b32.xlu1 %v7801_v15, %s7565_s19 }
  0x88   : > { %1179 = vrot.lane.b32.xlu2 %v7781_v3, %s7565_s19 }
  0x89   : > { %1187 = vrot.lane.b32.xlu0 %v7785_v5, %s7565_s19 }
  0x8e   : > { %1171 = vrot.lane.b32.xlu1 %v7791_v10, %s7565_s19 }
  0x90   : > { %1173 = vrot.lane.b32.xlu2 %v7804_v17, %s7565_s19 }
  0x91   : > { %1181 = vrot.lane.b32.xlu0 %v7797_v12, %s7565_s19 }
  0x96   : > { %1183 = vrot.lane.b32.xlu1 %v7814_v21, %s7565_s19 }
  0x98   : > { %1175 = vrot.lane.b32.xlu2 %v7820_v25, %s7565_s19 }
  0x99   : > { %1191 = vrot.lane.b32.xlu0 %v7818_v24, %s7565_s19 }
  0x9e   : > { %1350 = vrot.lane.b32.xlu1 %v7801_v15, %s7566_s22 }
  0xa0   : > { %1340 = vrot.lane.b32.xlu2 %v7781_v3, %s7566_s22 }
  0xa1   : > { %1348 = vrot.lane.b32.xlu0 %v7785_v5, %s7566_s22 }
  0xa2   : > { %v744_v35 = vpop.permute.xlu2 %743 }
  0xa6   : > { %1332 = vrot.lane.b32.xlu1 %v7791_v10, %s7566_s22 }
  0xa8   : > { %1334 = vrot.lane.b32.xlu2 %v7804_v17, %s7566_s22 }
  0xa9   : > { %1342 = vrot.lane.b32.xlu0 %v7797_v12, %s7566_s22 }
  0xaa   : > { %v746_v37 = vpop.permute.xlu2 %745 }
  0xab   : > { %v768_v56 = vsel %vm767_vm2, %v744_v35, %v746_v37 }
  0xae   : > { %1344 = vrot.lane.b32.xlu1 %v7814_v21, %s7566_s22 }
  0xb0   : > { %1193 = vrot.lane.b32.xlu2 %v7834_v32, %s7565_s19 }
  0xb1   : > { %1352 = vrot.lane.b32.xlu0 %v7818_v24, %s7566_s22 }
  0xb2   : > { %v7900_v38 = vpop.permute.xlu2 %747 }
  0xb3   : > { %v769_v1 = vsel %vm767_vm2, %v746_v37, %v7900_v38  ;;  %v682_v37 = vld [vmem:[#allocation5 + $0x24] sm:$0xf] }
  0xb6   : > { %1354 = vrot.lane.b32.xlu1 %v7834_v32, %s7566_s22 }
  0xb8   : > { %v752_v39 = vpop.permute.xlu1 %751  ;;  %1185 = vrot.lane.b32.xlu2 %v7830_v29, %s7565_s19 }
  0xb9   : > { %1336 = vrot.lane.b32.xlu0 %v7820_v25, %s7566_s22 }
  0xba   : > { %v750_v42 = vpop.permute.xlu2 %749 }
  0xbb   : > { %v760_v41 = vpop.permute.xlu0 %759  ;;  %v770_v11 = vsel %vm767_vm2, %v7900_v38, %v750_v42 }
  0xbe   : > { %1177 = vrot.lane.b32.xlu1 %v7836_v33, %s7565_s19  ;;  %s7582_s19 = smov 64  }
  0xc0   : > { %v754_v43 = vpop.permute.xlu1 %753  ;;  %1338 = vrot.lane.b32.xlu2 %v7836_v33, %s7566_s22 }
  0xc1   : > { %1346 = vrot.lane.b32.xlu0 %v7830_v29, %s7566_s22  ;;  %v771_v51 = vsel %vm767_vm2, %v752_v39, %v754_v43  ;;  %v697_v39 = vunpack.c.l.b16 %v682_v37  ;;  %s7583_s22 = smov 62  }
  0xc2   : > { %v7919_v46 = vpop.permute.xlu2 %1018 }
  0xc3   : > { %v762_v44 = vpop.permute.xlu0 %761 }
  0xc4   : > { %v774_v45 = vsel %vm767_vm2, %v760_v41, %v762_v44 }
  0xc5   : > { %v795_v47 = vsel %vm793_vm0, %v774_v45, 0 }
  0xc6   : > { %808 = vmatpush.bf16.msra.mxu0 %v795_v47  ;;  %1513 = vrot.lane.b32.xlu1 %v7818_v24, %s7567_s25  ;;  %v700_v47 = vpack.c.b16 %v697_v39, %v697_v39 }
  0xc8   : > { %v756_v50 = vpop.permute.xlu1 %755  ;;  %1503 = vrot.lane.b32.xlu2 %v7797_v12, %s7567_s25 }
  0xc9   : > { %1511 = vrot.lane.b32.xlu0 %v7801_v15, %s7567_s25  ;;  %v772_v60 = vsel %vm767_vm2, %v754_v43, %v756_v50 }
  0xca   : > { %809 = vmatpush.bf16.msra.mxu0 %v771_v51  ;;  %v7932_v55 = vpop.permute.xlu2 %1012 }
  0xcb   : > { %v764_v53 = vpop.permute.xlu0 %763 }
  0xcc   : > { %v775_v54 = vsel %vm767_vm2, %v762_v44, %v764_v53 }
  0xcd   : > { %v798_v57 = vsel %vm793_vm0, %v775_v54, 0  ;;  %v8015_v54 = vld [vmem:[#allocation5 + $0x28] sm:$0xff] }
  0xce   : > { %810 = vmatpush.bf16.msra.mxu0 %v768_v56  ;;  %831 = vmatpush.bf16.msra.mxu1 %v798_v57 }
  0xcf   : > { %1495 = vrot.lane.b32.xlu1 %v7804_v17, %s7567_s25 }
  0xd0   : > { %v758_v59 = vpop.permute.xlu1 %757  ;;  %1497 = vrot.lane.b32.xlu2 %v7820_v25, %s7567_s25 }
  0xd1   : > { %1505 = vrot.lane.b32.xlu0 %v7814_v21, %s7567_s25  ;;  %6583 = vmatmul.msk.bf16.vlgmr.msra.gmra.mxu0 %vm783_vm1, %v7236_v58  ;;  %v773_v4 = vsel %vm767_vm2, %v756_v50, %v758_v59 }
  0xd2   : > { %832 = vmatpush.bf16.msra.mxu1 %v772_v60  ;;  %v7949_v0 = vpop.permute.xlu2 %1022  ;;  %950 = vmatpush.bf16.msrb.mxu0 %v917_v62 }
  0xd3   : > { %v766_v61 = vpop.permute.xlu0 %765 }
  0xd4   : > { %v776_v63 = vsel %vm767_vm2, %v764_v53, %v766_v61 }
  0xd5   : > { %v801_v2 = vsel %vm793_vm0, %v776_v63, 0 }
  0xd6   : > { %833 = vmatpush.bf16.msra.mxu1 %v769_v1  ;;  %854 = vmatpush.bf16.msra.mxu2 %v801_v2 }
  0xd7   : > { %1507 = vrot.lane.b32.xlu1 %v7830_v29, %s7567_s25  ;;  %951 = vmatpush.bf16.msrb.mxu0 %v7797_v12 }
  0xd8   : > { %v1029_v6 = vpop.permute.xlu1 %1028  ;;  %1509 = vrot.lane.b32.xlu2 %v7785_v5, %s7567_s25 }
  0xd9   : > { %1515 = vrot.lane.b32.xlu0 %v7834_v32, %s7567_s25  ;;  %6586 = vmatmul.msk.bf16.vlgmr.msra.gmra.mxu1 %vm783_vm1, %v7236_v58 }
  0xda   : > { %855 = vmatpush.bf16.msra.mxu2 %v773_v4  ;;  %v7966_v13 = vpop.permute.xlu2 %1016  ;;  %973 = vmatpush.bf16.msrb.mxu1 %v920_v18  ;;  %v8045_v4 = vld [vmem:[#allocation5 + $0x30] sm:$0xff] }
  0xdb   : > { %v1027_v9 = vpop.permute.xlu0 %1026  ;;  %952 = vmatpush.bf16.msrb.mxu0 %v7804_v17 }
  0xdc   : > { %v1041_v30 = vsel %vm1034_vm3, %v1027_v9, %v1029_v6 }
  0xdd   : > { %v1060_v35 = vsel %vm793_vm0, %v1041_v30, 0 }
  0xde   : > { %856 = vmatpush.bf16.msra.mxu2 %v770_v11  ;;  %974 = vmatpush.bf16.msrb.mxu1 %v6607_v23  ;;  %v996_v11 = vld [vmem:[#allocation5 + $0x38] sm:$0xf] }
  0xdf   : > { %1670 = vrot.lane.b32.xlu1 %v7785_v5, %s7568_s23 }
  0xe0   : > { %v1011_v22 = vpop.permute.xlu1 %1010  ;;  %1672 = vrot.lane.b32.xlu2 %v7801_v15, %s7568_s23 }
  0xe1   : > { %1499 = vrot.lane.b32.xlu0 %v7836_v33, %s7567_s25  ;;  %6584 = vmatmul.msk.bf16.gmra.mxu0 %vm783_vm1, %v7237_v16  ;;  %v1035_v45 = vsel %vm1034_vm3, %v1011_v22, %v7932_v55 }
  0xe2   : > { %6589 = vmatmul.msk.bf16.vlgmr.msra.gmra.mxu2 %vm783_vm1, %v7236_v58  ;;  %v7983_v31 = vpop.permute.xlu2 %1179  ;;  %975 = vmatpush.bf16.msrb.mxu1 %v6603_v34 }
  0xe3   : > { %v1021_v26 = vpop.permute.xlu0 %1020  ;;  %1073 = vmatpush.bf16.msrb.mxu2 %v1060_v35 }
  0xe4   : > { %v1038_v41 = vsel %vm1034_vm3, %v7919_v46, %v1021_v26  ;;  %v1039_v46 = vsel %vm1034_vm3, %v1021_v26, %v7949_v0 }
  0xe7   : > { %1662 = vrot.lane.b32.xlu1 %v7781_v3, %s7568_s23  ;;  %1074 = vmatpush.bf16.msrb.mxu2 %v1038_v41 }
  0xe8   : > { %v1033_v38 = vpop.permute.xlu1 %1032  ;;  %1664 = vrot.lane.b32.xlu2 %v7797_v12, %s7568_s23 }
  0xe9   : > { %1501 = vrot.lane.b32.xlu0 %v7781_v3, %s7567_s25  ;;  %6587 = vmatmul.msk.bf16.gmra.mxu1 %vm783_vm1, %v7237_v16 }
  0xea   : > { %v7996_v44 = vpop.permute.xlu2 %1173 }
  0xeb   : > { %v1031_v42 = vpop.permute.xlu0 %1030  ;;  %1075 = vmatpush.bf16.msrb.mxu2 %v1035_v45 }
  0xec   : > { %v1042_v43 = vsel %vm1034_vm3, %v1029_v6, %v1031_v42  ;;  %v1043_v60 = vsel %vm1034_vm3, %v1031_v42, %v1033_v38 }
  0xed   : > { %v1063_v48 = vsel %vm793_vm0, %v1042_v43, 0  ;;  %v1066_v62 = vsel %vm793_vm0, %v1043_v60, 0 }
  0xee   : > { %1096 = vmatpush.bf16.msrb.mxu3 %v1063_v48  ;;  %1119 = vmatpush.bf16.msra.mxu0 %v1066_v62 }
  0xef   : > { %1654 = vrot.lane.b32.xlu1 %v7791_v10, %s7568_s23 }
  0xf0   : > { %v1015_v49 = vpop.permute.xlu1 %1014  ;;  %1656 = vrot.lane.b32.xlu2 %v7804_v17, %s7568_s23 }
  0xf1   : > { %1493 = vrot.lane.b32.xlu0 %v7791_v10, %s7567_s25  ;;  %6585 = vmatmul.msk.bf16.gmra.mxu0 %vm783_vm1, %v700_v47  ;;  %v1036_v51 = vsel %vm1034_vm3, %v7932_v55, %v1015_v49 }
  0xf2   : > { %6590 = vmatmul.msk.bf16.gmra.mxu2 %vm783_vm1, %v7237_v16  ;;  %1097 = vmatpush.bf16.msrb.mxu3 %v1039_v46  ;;  %v8013_v53 = vpop.permute.xlu2 %1175  ;;  %v7244_v46 = vld [vmem:[#allocation5 + $0x3c] sm:$0xff] }
  0xf3   : > { %v1025_v50 = vpop.permute.xlu0 %1024  ;;  %v1197_v37 = vsel %vm1195_vm4, %v7996_v44, %v8013_v53 }
  0xf4   : > { %v1040_v2 = vsel %vm1034_vm3, %v7949_v0, %v1025_v50  ;;  %v1037_v0 = vsel %vm1034_vm3, %v1015_v49, %v7966_v13  ;;  %v1006_v13 = vunpack.c.l.b16 %v996_v11  ;;  %vm3179_vm3 = vcmask 916480  }
  0xf5   : > { %1120 = vmatpush.bf16.msra.mxu0 %v1040_v2 }
  0xf6   : > { %1098 = vmatpush.bf16.msrb.mxu3 %v1036_v51  ;;  %v8079_v28 = vpack.c.b16 %v1006_v13, %v1006_v13 }
  0xf7   : > { %1676 = vrot.lane.b32.xlu1 %v7834_v32, %s7568_s23 }
  0xf8   : > { %v1190_v56 = vpop.permute.xlu1 %1189  ;;  %1666 = vrot.lane.b32.xlu2 %v7814_v21, %s7568_s23 }
  0xf9   : > { %6588 = vmatmul.msk.bf16.gmra.mxu1 %vm783_vm1, %v700_v47  ;;  %6628 = vmatmul.msk.bf16.vlgmr.msrb.gmra.mxu3 %vm783_vm1, %v8015_v54 }
  0xfa   : > { %1674 = vrot.lane.b32.xlu0 %v7818_v24, %s7568_s23  ;;  %v8027_v58 = vpop.permute.xlu2 %1340  ;;  %1121 = vmatpush.bf16.msra.mxu0 %v1037_v0 }
  0xfb   : > { %v1188_v55 = vpop.permute.xlu0 %1187 }
  0xfc   : > { %v1202_v57 = vsel %vm1195_vm4, %v1188_v55, %v1190_v56 }
  0xfd   : > { %v1221_v59 = vsel %vm793_vm0, %v1202_v57, 0 }
  0xfe   : > { %1234 = vmatpush.bf16.msra.mxu1 %v1221_v59 }
  0xff   : > { %1658 = vrot.lane.b32.xlu1 %v7820_v25, %s7568_s23 }
 0x100   : > { %v1172_v61 = vpop.permute.xlu1 %1171  ;;  %1660 = vrot.lane.b32.xlu2 %v7836_v33, %s7568_s23 }
 0x101   : > { %6611 = vmatmul.msk.bf16.vlgmr.msrb.gmra.mxu0 %vm783_vm1, %v7888_v36  ;;  %v1196_v26 = vsel %vm1195_vm4, %v1172_v61, %v7996_v44 }
 0x102   : > { %6591 = vmatmul.msk.bf16.gmra.mxu2 %vm783_vm1, %v700_v47  ;;  %1668 = vrot.lane.b32.xlu0 %v7830_v29, %s7568_s23  ;;  %v8041_v1 = vpop.permute.xlu2 %1334  ;;  %v931_v47 = vpop.f32.mrf.mxu3 }
 0x103   : > { %v1182_v63 = vpop.permute.xlu0 %1181 }
 0x104   : > { %v1199_v18 = vsel %vm1195_vm4, %v7983_v31, %v1182_v63 }
 0x105   : > { %1235 = vmatpush.bf16.msra.mxu1 %v1199_v18 }
 0x107   : > { %1833 = vrot.lane.b32.xlu1 %v7801_v15, %s7569_s14 }
 0x108   : > { %v1184_v6 = vpop.permute.xlu1 %1183  ;;  %1823 = vrot.lane.b32.xlu2 %v7781_v3, %s7569_s14 }
 0x109   : > { %6614 = vmatmul.msk.bf16.vlgmr.msrb.gmra.mxu1 %vm783_vm1, %v7888_v36  ;;  %6629 = vmatmul.msk.bf16.gmra.mxu3 %vm783_vm1, %v8045_v4  ;;  %v1200_v34 = vsel %vm1195_vm4, %v1182_v63, %v1184_v6 }
 0x10a   : > { %1831 = vrot.lane.b32.xlu0 %v7785_v5, %s7569_s14  ;;  %v1194_v8 = vpop.permute.xlu2 %1193  ;;  %1236 = vmatpush.bf16.msra.mxu1 %v1196_v26 }
 0x10b   : > { %v1192_v7 = vpop.permute.xlu0 %1191 }
 0x10c   : > { %v1204_v9 = vsel %vm1195_vm4, %v1192_v7, %v1194_v8  ;;  %v1203_v14 = vsel %vm1195_vm4, %v1190_v56, %v1192_v7  ;;  %v7245_v7 = vld [vmem:[#allocation5 + $0x44] sm:$0xff] }
 0x10d   : > { %v1227_v36 = vsel %vm793_vm0, %v1204_v9, 0  ;;  %v1224_v20 = vsel %vm793_vm0, %v1203_v14, 0 }
 0x10e   : > { %1280 = vmatpush.bf16.msra.mxu3 %v1227_v36  ;;  %1257 = vmatpush.bf16.msra.mxu2 %v1224_v20  ;;  %v1157_v36 = vld [vmem:[#allocation5 + $0x4c] sm:$0xf] }
 0x10f   : > { %1815 = vrot.lane.b32.xlu1 %v7791_v10, %s7569_s14 }
 0x110   : > { %v1351_v16 = vpop.permute.xlu1 %1350  ;;  %1817 = vrot.lane.b32.xlu2 %v7804_v17, %s7569_s14 }
 0x111   : > { %6612 = vmatmul.msk.bf16.gmra.mxu0 %vm783_vm1, %v7906_v40 }
 0x112   : > { %6625 = vmatmul.msk.bf16.vlgmr.msrb.gmra.mxu2 %vm783_vm1, %v8015_v54  ;;  %1825 = vrot.lane.b32.xlu0 %v7797_v12, %s7569_s14  ;;  %v1186_v23 = vpop.permute.xlu2 %1185 }
 0x113   : > { %v1349_v19 = vpop.permute.xlu0 %1348  ;;  %v1201_v30 = vsel %vm1195_vm4, %v1184_v6, %v1186_v23  ;;  %1258 = vmatpush.bf16.msra.mxu2 %v1200_v34 }
 0x114   : > { %v1363_v22 = vsel %vm1356_vm5, %v1349_v19, %v1351_v16  ;;  %1281 = vmatpush.bf16.msra.mxu3 %v1201_v30 }
 0x115   : > { %v1382_v27 = vsel %vm793_vm0, %v1363_v22, 0 }
 0x116   : > { %1395 = vmatpush.bf16.msrb.mxu0 %v1382_v27 }
 0x117   : > { %1827 = vrot.lane.b32.xlu1 %v7814_v21, %s7569_s14  ;;  %1259 = vmatpush.bf16.msra.mxu2 %v1197_v37 }
 0x118   : > { %v8084_v31 = vpop.permute.xlu1 %1332  ;;  %1819 = vrot.lane.b32.xlu2 %v7820_v25, %s7569_s14 }
 0x119   : > { %6615 = vmatmul.msk.bf16.gmra.mxu1 %vm783_vm1, %v7906_v40  ;;  %6630 = vmatmul.msk.bf16.gmra.mxu3 %vm783_vm1, %v8079_v28  ;;  %v1357_v63 = vsel %vm1356_vm5, %v8084_v31, %v8041_v1 }
 0x11a   : > { %1835 = vrot.lane.b32.xlu0 %v7818_v24, %s7569_s14  ;;  %v8108_v38 = vpop.permute.xlu2 %1338 }
 0x11b   : > { %v1343_v35 = vpop.permute.xlu0 %1342 }
 0x11f   : > { %1994 = vrot.lane.b32.xlu1 %v7801_v15, %s7570_s18 }
 0x120   : > { %v8100_v40 = vpop.permute.xlu1 %1344  ;;  %1984 = vrot.lane.b32.xlu2 %v7781_v3, %s7570_s18 }
 0x121   : > { %6613 = vmatmul.msk.bf16.gmra.mxu0 %vm783_vm1, %v7927_v52  ;;  %v1361_v57 = vsel %vm1356_vm5, %v1343_v35, %v8100_v40 }
 0x122   : > { %6626 = vmatmul.msk.bf16.gmra.mxu2 %vm783_vm1, %v8045_v4  ;;  %1992 = vrot.lane.b32.xlu0 %v7785_v5, %s7570_s18  ;;  %v8119_v43 = vpop.permute.xlu2 %1503 }
 0x123   : > { %v1353_v39 = vpop.permute.xlu0 %1352 }
 0x124   : > { %v1364_v50 = vsel %vm1356_vm5, %v1351_v16, %v1353_v39  ;;  %v1167_v16 = vunpack.c.l.b16 %v1157_v36 }
 0x125   : > { %v1385_v56 = vsel %vm793_vm0, %v1364_v50, 0 }
 0x126   : > { %1418 = vmatpush.bf16.msrb.mxu1 %v1385_v56  ;;  %v1170_v23 = vpack.c.b16 %v1167_v16, %v1167_v16 }
 0x127   : > { %1976 = vrot.lane.b32.xlu1 %v7791_v10, %s7570_s18 }
 0x128   : > { %v1355_v41 = vpop.permute.xlu1 %1354  ;;  %1978 = vrot.lane.b32.xlu2 %v7804_v17, %s7570_s18 }
 0x129   : > { %6616 = vmatmul.msk.bf16.gmra.mxu1 %vm783_vm1, %v7927_v52  ;;  %v1365_v42 = vsel %vm1356_vm5, %v1353_v39, %v1355_v41 }
 0x12a   : > { %1986 = vrot.lane.b32.xlu0 %v7797_v12, %s7570_s18  ;;  %v1388_v44 = vsel %vm793_vm0, %v1365_v42, 0  ;;  %v8136_v49 = vpop.permute.xlu2 %1497  ;;  %1419 = vmatpush.bf16.msrb.mxu1 %v1361_v57 }
 0x12b   : > { %v8122_v45 = vpop.permute.xlu0 %1336  ;;  %1441 = vmatpush.bf16.msrb.mxu2 %v1388_v44 }
 0x12c   : > { %v1358_v2 = vsel %vm1356_vm5, %v8041_v1, %v8122_v45  ;;  %v1359_v13 = vsel %vm1356_vm5, %v8122_v45, %v8108_v38  ;;  %v7246_v38 = vld [vmem:[#allocation5 + $0x50] sm:$0xff] }
 0x12e   : > { %1420 = vmatpush.bf16.msrb.mxu1 %v1358_v2  ;;  %v7247_v2 = vld [vmem:[#allocation5 + $0x58] sm:$0xff] }
 0x12f   : > { %1988 = vrot.lane.b32.xlu1 %v7814_v21, %s7570_s18 }
 0x130   : > { %v1178_v52 = vpop.permute.xlu1 %1177  ;;  %1837 = vrot.lane.b32.xlu2 %v7834_v32, %s7569_s14 }
 0x131   : > { %6631 = vmatmul.msk.bf16.vlgmr.msra.gmra.mxu0 %vm783_vm1, %v8015_v54  ;;  %v1198_v48 = vsel %vm1195_vm4, %v8013_v53, %v1178_v52  ;;  %v8142_v54 = vpop.f32.mrf.mxu3  ;;  %v1360_v53 = vsel %vm1356_vm5, %v8027_v58, %v1343_v35  ;;  %vm3340_vm4 = vcmask 900096  }
 0x132   : > { %6627 = vmatmul.msk.bf16.gmra.mxu2 %vm783_vm1, %v8079_v28  ;;  %1996 = vrot.lane.b32.xlu0 %v7818_v24, %s7570_s18  ;;  %v1510_v59 = vpop.permute.xlu2 %1509 }
 0x133   : > { %v1347_v51 = vpop.permute.xlu0 %1346  ;;  %1282 = vmatpush.bf16.msra.mxu3 %v1198_v48  ;;  %1396 = vmatpush.bf16.msrb.mxu0 %v1360_v53  ;;  %v8260_v53 = vld [vmem:[#allocation5 + $0x64] sm:$0xff] }
 0x134   : > { %v1362_v9 = vsel %vm1356_vm5, %v8100_v40, %v1347_v51  ;;  %vm3501_vm5 = vcmask 883712  }
 0x135   : > { %1442 = vmatpush.bf16.msrb.mxu2 %v1362_v9 }
 0x136   : > { %6648 = vmatmul.msk.bf16.vlgmr.msra.gmra.mxu3 %vm783_vm1, %v7244_v46 }
 0x137   : > { %1998 = vrot.lane.b32.xlu1 %v7834_v32, %s7570_s18  ;;  %1397 = vmatpush.bf16.msrb.mxu0 %v1357_v63 }
 0x138   : > { %v8150_v55 = vpop.permute.xlu1 %1513  ;;  %1829 = vrot.lane.b32.xlu2 %v7830_v29, %s7569_s14 }
 0x139   : > { %6642 = vmatmul.msk.bf16.vlgmr.msra.gmra.mxu1 %vm783_vm1, %v7244_v46  ;;  %v936_v62 = vpop.f32.mrf.mxu3  ;;  %1443 = vmatpush.bf16.msrb.mxu2 %v1359_v13 }
 0x13a   : > { %1980 = vrot.lane.b32.xlu0 %v7820_v25, %s7570_s18  ;;  %v8182_v8 = vpop.permute.xlu2 %1672 }
 0x13b   : > { %v1512_v58 = vpop.permute.xlu0 %1511 }
 0x13c   : > { %v1524_v60 = vsel %vm1517_vm6, %v1510_v59, %v1512_v58  ;;  %v1525_v37 = vsel %vm1517_vm6, %v1512_v58, %v8150_v55 }
 0x13d   : > { %v1543_v61 = vsel %vm793_vm0, %v1524_v60, 0 }
 0x13e   : > { %1556 = vmatpush.bf16.msrb.mxu3 %v1543_v61 }
 0x13f   : > { %1821 = vrot.lane.b32.xlu1 %v7836_v33, %s7569_s14  ;;  %s7584_s14 = smov 60  }
 0x140   : > { %1982 = vrot.lane.b32.xlu2 %v7836_v33, %s7570_s18 }
 0x141   : > { %6632 = vmatmul.msk.bf16.gmra.mxu0 %vm783_vm1, %v8045_v4  ;;  %v8170_v6 = vpop.permute.xlu1 %1495  ;;  %v8180_v1 = vpop.f32.mrf.mxu3 }
 0x142   : > { %6645 = vmatmul.msk.bf16.vlgmr.msra.gmra.mxu2 %vm783_vm1, %v7244_v46  ;;  %1990 = vrot.lane.b32.xlu0 %v7830_v29, %s7570_s18  ;;  %v8202_v20 = vpop.permute.xlu2 %1664  ;;  %v1519_v60 = vsel %vm1517_vm6, %v8170_v6, %v8136_v49  ;;  %s7585_s18 = smov 58  }
 0x143   : > { %v8175_v0 = vpop.permute.xlu0 %1505 }
 0x144   : > { %v1522_v48 = vsel %vm1517_vm6, %v8119_v43, %v8175_v0 }
 0x146   : > { %6649 = vmatmul.msk.bf16.gmra.mxu3 %vm783_vm1, %v7245_v7 }
 0x147   : > { %2157 = vrot.lane.b32.xlu1 %v7818_v24, %s7571_s30 }
 0x148   : > { %2147 = vrot.lane.b32.xlu2 %v7797_v12, %s7571_s30 }
 0x149   : > { %6643 = vmatmul.msk.bf16.gmra.mxu1 %vm783_vm1, %v7245_v7  ;;  %v8187_v4 = vpop.permute.xlu1 %1507  ;;  %v8200_v19 = vpop.f32.mrf.mxu3 }
 0x14a   : > { %2155 = vrot.lane.b32.xlu0 %v7801_v15, %s7571_s30  ;;  %v8220_v31 = vpop.permute.xlu2 %1656  ;;  %v1523_v59 = vsel %vm1517_vm6, %v8175_v0, %v8187_v4 }
 0x14b   : > { %v1516_v11 = vpop.permute.xlu0 %1515 }
 0x14c   : > { %v1526_v42 = vsel %vm1517_vm6, %v8150_v55, %v1516_v11 }
 0x14d   : > { %v1549_v46 = vsel %vm793_vm0, %v1526_v42, 0 }
 0x14e   : > { %v812_v14 = vpop.f32.mrf.mxu0  ;;  %1602 = vmatpush.bf16.msra.mxu1 %v1549_v46 }
 0x14f   : > { %v8198_v18 = vadd.f32 %v931_v47, %v812_v14  ;;  %2139 = vrot.lane.b32.xlu1 %v7804_v17, %s7571_s30  ;;  %v1546_v47 = vsel %vm793_vm0, %v1525_v37, 0 }
 0x150   : > { %2141 = vrot.lane.b32.xlu2 %v7820_v25, %s7571_s30  ;;  %1579 = vmatpush.bf16.msra.mxu0 %v1546_v47 }
 0x151   : > { %6633 = vmatmul.msk.bf16.gmra.mxu0 %vm783_vm1, %v8079_v28  ;;  %v8208_v22 = vpop.permute.xlu1 %1670  ;;  %v943_v28 = vpop.f32.mrf.mxu3 }
 0x152   : > { %6646 = vmatmul.msk.bf16.gmra.mxu2 %vm783_vm1, %v7245_v7  ;;  %2149 = vrot.lane.b32.xlu0 %v7814_v21, %s7571_s30  ;;  %v8241_v45 = vpop.permute.xlu2 %1666  ;;  %v1685_v13 = vsel %vm1678_vm7, %v8208_v22, %v8182_v8 }
 0x153   : > { %v1500_v26 = vpop.permute.xlu0 %1499  ;;  %1603 = vmatpush.bf16.msra.mxu1 %v1523_v59  ;;  %v1683_v16 = vsel %vm1678_vm7, %v8202_v20, %v8241_v45 }
 0x154   : > { %1580 = vmatpush.bf16.msra.mxu0 %v1522_v48  ;;  %v1520_v61 = vsel %vm1517_vm6, %v8136_v49, %v1500_v26 }
 0x156   : > { %v8215_v27 = vpop.f32.mrf.mxu0  ;;  %v8217_v30 = vpop.f32.mrf.mxu1  ;;  %6650 = vmatmul.msk.bf16.gmra.mxu3 %vm783_vm1, %v1170_v23 }
 0x157   : > { %2151 = vrot.lane.b32.xlu1 %v7830_v29, %s7571_s30  ;;  %1604 = vmatpush.bf16.msra.mxu1 %v1520_v61 }
 0x158   : > { %2153 = vrot.lane.b32.xlu2 %v7785_v5, %s7571_s30  ;;  %1581 = vmatpush.bf16.msra.mxu0 %v1519_v60 }
 0x159   : > { %6644 = vmatmul.msk.bf16.gmra.mxu1 %vm783_vm1, %v1170_v23  ;;  %v8225_v34 = vpop.permute.xlu1 %1662 }
 0x15a   : > { %2159 = vrot.lane.b32.xlu0 %v7834_v32, %s7571_s30  ;;  %v1682_v42 = vsel %vm1678_vm7, %v8225_v34, %v8202_v20 }
 0x15b   : > { %v1502_v35 = vpop.permute.xlu0 %1501 }
 0x15c   : > { %v1521_v40 = vsel %vm1517_vm6, %v1502_v35, %v8119_v43  ;;  %v8268_v43 = vpop.permute.xlu2 %1660 }
 0x15d   : > { %1557 = vmatpush.bf16.msrb.mxu3 %v1521_v40  ;;  %v1318_v40 = vld [vmem:[#allocation5 + $0x60] sm:$0xf] }
 0x15e   : > { %v817_v39 = vpop.f32.mrf.mxu0  ;;  %v8235_v41 = vpop.f32.mrf.mxu1 }
 0x15f   : > { %v8239_v44 = vadd.f32 %v936_v62, %v817_v39  ;;  %2314 = vrot.lane.b32.xlu1 %v7785_v5, %s7572_s3 }
 0x160   : > { %2316 = vrot.lane.b32.xlu2 %v7801_v15, %s7572_s3 }
 0x161   : > { %6659 = vmatmul.msk.bf16.vlgmr.msrb.gmra.mxu0 %vm783_vm1, %v7246_v38  ;;  %v8247_v52 = vpop.permute.xlu1 %1654 }
 0x162   : > { %6647 = vmatmul.msk.bf16.gmra.mxu2 %vm783_vm1, %v1170_v23  ;;  %2143 = vrot.lane.b32.xlu0 %v7836_v33, %s7571_s30  ;;  %v1679_v20 = vsel %vm1678_vm7, %v8247_v52, %v8220_v31 }
 0x163   : > { %v1494_v50 = vpop.permute.xlu0 %1493 }
 0x164   : > { %v1518_v51 = vsel %vm1517_vm6, %v1494_v50, %v8170_v6  ;;  %v8299_v36 = vpop.permute.xlu2 %1823 }
 0x165   : > { %v8262_v56 = vpop.f32.mrf.mxu2  ;;  %1558 = vmatpush.bf16.msrb.mxu3 %v1518_v51  ;;  %v1479_v51 = vld [vmem:[#allocation5 + $0x74] sm:$0xf] }
 0x166   : > { %v8264_v55 = vpop.f32.mrf.mxu0  ;;  %v8266_v57 = vpop.f32.mrf.mxu1  ;;  %v1489_v61 = vunpack.c.l.b16 %v1479_v51 }
 0x167   : > { %2306 = vrot.lane.b32.xlu1 %v7781_v3, %s7572_s3 }
 0x168   : > { %6676 = vmatmul.msk.bf16.vlgmr.msrb.gmra.mxu3 %vm783_vm1, %v8260_v53  ;;  %2308 = vrot.lane.b32.xlu2 %v7797_v12, %s7572_s3 }
 0x169   : > { %6662 = vmatmul.msk.bf16.vlgmr.msrb.gmra.mxu1 %vm783_vm1, %v7246_v38  ;;  %v1677_v58 = vpop.permute.xlu1 %1676 }
 0x16a   : > { %2145 = vrot.lane.b32.xlu0 %v7781_v3, %s7571_s30 }
 0x16c   : > { %v1675_v62 = vpop.permute.xlu0 %1674  ;;  %v8329_v22 = vpop.permute.xlu2 %1817 }
 0x16d   : > { %v8287_v63 = vpop.f32.mrf.mxu2  ;;  %v1686_v7 = vsel %vm1678_vm7, %v8182_v8, %v1675_v62  ;;  %v1687_v6 = vsel %vm1678_vm7, %v1675_v62, %v1677_v58  ;;  %v1704_v8 = vsel %vm793_vm0, %v1685_v13, 0 }
 0x16e   : > { %v822_v0 = vpop.f32.mrf.mxu0  ;;  %v8292_v49 = vpop.f32.mrf.mxu1  ;;  %v1710_v4 = vsel %vm793_vm0, %v1687_v6, 0  ;;  %v1707_v9 = vsel %vm793_vm0, %v1686_v7, 0  ;;  %1717 = vmatpush.bf16.msra.mxu2 %v1704_v8 }
 0x16f   : > { %v8297_v11 = vadd.f32 %v8200_v19, %v822_v0  ;;  %1740 = vmatpush.bf16.msra.mxu3 %v1707_v9  ;;  %2298 = vrot.lane.b32.xlu1 %v7791_v10, %s7572_s3  ;;  %v8317_v19 = vld [vmem:[#allocation5 + $0x6c] sm:$0xff] }
 0x170   : > { %1763 = vmatpush.bf16.msrb.mxu0 %v1710_v4  ;;  %2300 = vrot.lane.b32.xlu2 %v7804_v17, %s7572_s3 }
 0x171   : > { %6660 = vmatmul.msk.bf16.gmra.mxu0 %vm783_vm1, %v7247_v2  ;;  %v8304_v14 = vpop.permute.xlu1 %1658 }
 0x172   : > { %6665 = vmatmul.msk.bf16.vlgmr.msrb.gmra.mxu2 %vm783_vm1, %v7246_v38  ;;  %2137 = vrot.lane.b32.xlu0 %v7791_v10, %s7571_s30  ;;  %v1680_v28 = vsel %vm1678_vm7, %v8220_v31, %v8304_v14  ;;  %v1328_v38 = vunpack.c.l.b16 %v1318_v40  ;;  %v8367_v31 = vpack.c.b16 %v1489_v61, %v1489_v61  ;;  %s7586_s30 = smov 56  }
 0x173   : > { %1741 = vmatpush.bf16.msra.mxu3 %v1683_v16  ;;  %1718 = vmatpush.bf16.msra.mxu2 %v1682_v42 }
 0x174   : > { %v8319_v23 = vpop.permute.xlu0 %1668  ;;  %v1331_v50 = vpack.c.b16 %v1328_v38, %v1328_v38  ;;  %v8353_v60 = vpop.permute.xlu2 %1819 }
 0x175   : > { %v8321_v26 = vpop.f32.mrf.mxu2 }
 0x176   : > { %v824_v35 = vpop.f32.mrf.mxu0  ;;  %v8326_v37 = vpop.f32.mrf.mxu1 }
 0x177   : > { %1742 = vmatpush.bf16.msra.mxu3 %v1680_v28  ;;  %2320 = vrot.lane.b32.xlu1 %v7834_v32, %s7572_s3 }
 0x178   : > { %6677 = vmatmul.msk.bf16.gmra.mxu3 %vm783_vm1, %v8317_v19  ;;  %2310 = vrot.lane.b32.xlu2 %v7814_v21, %s7572_s3 }
 0x179   : > { %6663 = vmatmul.msk.bf16.gmra.mxu1 %vm783_vm1, %v7247_v2  ;;  %v8336_v39 = vpop.permute.xlu1 %1833  ;;  %1719 = vmatpush.bf16.msra.mxu2 %v1679_v20 }
 0x17a   : > { %2318 = vrot.lane.b32.xlu0 %v7818_v24, %s7572_s3 }
 0x17c   : > { %v1100_v47 = vpop.f32.mrf.mxu3  ;;  %v8345_v48 = vpop.permute.xlu0 %1831 }
 0x17d   : > { %v8347_v46 = vpop.f32.mrf.mxu2 }
 0x17e   : > { %v847_v59 = vpop.f32.mrf.mxu1  ;;  %v954_v58 = vpop.f32.mrf.mxu0 }
 0x17f   : > { %v955_v34 = vadd.f32 %v954_v58, %v8217_v30  ;;  %2302 = vrot.lane.b32.xlu1 %v7820_v25, %s7572_s3 }
 0x180   : > { %2304 = vrot.lane.b32.xlu2 %v7836_v33, %s7572_s3 }
 0x181   : > { %v8357_v62 = vadd.f32 %v1100_v47, %v955_v34  ;;  %6661 = vmatmul.msk.bf16.gmra.mxu0 %vm783_vm1, %v1331_v50  ;;  %v8360_v7 = vpop.permute.xlu1 %1815 }
 0x182   : > { %6666 = vmatmul.msk.bf16.gmra.mxu2 %vm783_vm1, %v7247_v2  ;;  %2312 = vrot.lane.b32.xlu0 %v7830_v29, %s7572_s3  ;;  %v8377_v2 = vpop.permute.xlu2 %1984 }
 0x184   : > { %v1102_v30 = vpop.f32.mrf.mxu3  ;;  %v8369_v52 = vpop.permute.xlu0 %1825 }
 0x185   : > { %v8371_v6 = vpop.f32.mrf.mxu2 }
 0x186   : > { %v956_v0 = vpop.f32.mrf.mxu0  ;;  %v977_v4 = vpop.f32.mrf.mxu1 }
 0x187   : > { %v957_v9 = vadd.f32 %v956_v0, %v8235_v41  ;;  %v8375_v16 = vadd.f32 %v977_v4, %v8262_v56  ;;  %2477 = vrot.lane.b32.xlu1 %v7801_v15, %s7573_s26 }
 0x188   : > { %6678 = vmatmul.msk.bf16.gmra.mxu3 %vm783_vm1, %v8367_v31  ;;  %2467 = vrot.lane.b32.xlu2 %v7781_v3, %s7573_s26 }
 0x189   : > { %v8383_v13 = vadd.f32 %v1102_v30, %v957_v9  ;;  %6664 = vmatmul.msk.bf16.gmra.mxu1 %vm783_vm1, %v1331_v50  ;;  %v8386_v28 = vpop.permute.xlu1 %1827 }
 0x18a   : > { %2475 = vrot.lane.b32.xlu0 %v7785_v5, %s7573_s26  ;;  %v8396_v47 = vpop.permute.xlu2 %1978 }
 0x18c   : > { %v1105_v41 = vpop.f32.mrf.mxu3  ;;  %v1836_v56 = vpop.permute.xlu0 %1835 }
 0x18d   : > { %v870_v35 = vpop.f32.mrf.mxu2 }
 0x18e   : > { %v959_v40 = vpop.f32.mrf.mxu0  ;;  %v979_v8 = vpop.f32.mrf.mxu1 }
 0x18f   : > { %v960_v38 = vadd.f32 %v959_v40, %v8266_v57  ;;  %v8394_v42 = vadd.f32 %v979_v8, %v8287_v63  ;;  %2459 = vrot.lane.b32.xlu1 %v7791_v10, %s7573_s26  ;;  %v8411_v63 = vld [vmem:[#allocation5 + $0x78] sm:$0xff]  ;;  %v1681_v8 = vsel %vm1678_vm7, %v8304_v14, %v8268_v43 }
 0x190   : > { %2461 = vrot.lane.b32.xlu2 %v7804_v17, %s7573_s26 }
 0x191   : > { %v8400_v51 = vadd.f32 %v1105_v41, %v960_v38  ;;  %6679 = vmatmul.msk.bf16.vlgmr.msra.gmra.mxu0 %vm783_vm1, %v8260_v53  ;;  %v8404_v59 = vpop.permute.xlu1 %1994 }
 0x192   : > { %6667 = vmatmul.msk.bf16.gmra.mxu2 %vm783_vm1, %v1331_v50  ;;  %2469 = vrot.lane.b32.xlu0 %v7797_v12, %s7573_s26  ;;  %v1684_v50 = vsel %vm1678_vm7, %v8241_v45, %v8319_v23  ;;  %v1838_v9 = vpop.permute.xlu2 %1837  ;;  %v1846_v23 = vsel %vm1839_vm8, %v8345_v48, %v8336_v39 }
 0x193   : > { %1764 = vmatpush.bf16.msrb.mxu0 %v1684_v50  ;;  %v1848_v41 = vsel %vm1839_vm8, %v1836_v56, %v1838_v9  ;;  %v1865_v48 = vsel %vm793_vm0, %v1846_v23, 0  ;;  %v8477_v50 = vld [vmem:[#allocation5 + $0x80] sm:$0xff] }
 0x194   : > { %v1107_v57 = vpop.f32.mrf.mxu3  ;;  %v8413_v58 = vpop.permute.xlu0 %1992  ;;  %1878 = vmatpush.bf16.msrb.mxu1 %v1865_v48 }
 0x195   : > { %v1077_v20 = vpop.f32.mrf.mxu2 }
 0x196   : > { %v8416_v34 = vadd.f32 %v1077_v20, %v8198_v18  ;;  %v961_v61 = vpop.f32.mrf.mxu0  ;;  %v982_v30 = vpop.f32.mrf.mxu1 }
 0x197   : > { %v962_v0 = vadd.f32 %v961_v61, %v8292_v49  ;;  %v8423_v4 = vadd.f32 %v982_v30, %v8321_v26  ;;  %2471 = vrot.lane.b32.xlu1 %v7814_v21, %s7573_s26  ;;  %v1871_v49 = vsel %vm793_vm0, %v1848_v41, 0  ;;  %v934_v26 = vadd.f32 %v8142_v54, %v8215_v27  ;;  %1765 = vmatpush.bf16.msrb.mxu0 %v1681_v8  ;;  %v1640_v8 = vld [vmem:[#allocation5 + $0x88] sm:$0xf] }
 0x198   : > { %6696 = vmatmul.msk.bf16.vlgmr.msra.gmra.mxu3 %vm783_vm1, %v8411_v63  ;;  %2463 = vrot.lane.b32.xlu2 %v7820_v25, %s7573_s26 }
 0x199   : > { %v8430_v18 = vadd.f32 %v1107_v57, %v962_v0  ;;  %6682 = vmatmul.msk.bf16.vlgmr.msra.gmra.mxu1 %vm783_vm1, %v8260_v53  ;;  %v8434_v45 = vpop.permute.xlu1 %1976  ;;  %1924 = vmatpush.bf16.msrb.mxu3 %v1871_v49 }
 0x19a   : > { %2479 = vrot.lane.b32.xlu0 %v7818_v24, %s7573_s26  ;;  %v1830_v54 = vpop.permute.xlu2 %1829 }
 0x19b   : > { %v1845_v14 = vsel %vm1839_vm8, %v8386_v28, %v1830_v54 }
 0x19c   : > { %v1110_v35 = vpop.f32.mrf.mxu3  ;;  %v8446_v53 = vpop.permute.xlu0 %1986 }
 0x19d   : > { %v1079_v40 = vpop.f32.mrf.mxu2  ;;  %1925 = vmatpush.bf16.msrb.mxu3 %v1845_v14 }
 0x19e   : > { %v8451_v38 = vadd.f32 %v1079_v40, %v934_v26  ;;  %v964_v57 = vpop.f32.mrf.mxu0  ;;  %v984_v20 = vpop.f32.mrf.mxu1 }
 0x19f   : > { %v965_v61 = vadd.f32 %v964_v57, %v8326_v37  ;;  %v8456_v30 = vadd.f32 %v984_v20, %v8347_v46  ;;  %2638 = vrot.lane.b32.xlu1 %v7801_v15, %s7574_s21  ;;  %v1843_v37 = vsel %vm1839_vm8, %v8299_v36, %v8369_v52  ;;  %v1847_v46 = vsel %vm1839_vm8, %v8336_v39, %v1836_v56 }
 0x1a0   : > { %1879 = vmatpush.bf16.msrb.mxu1 %v1843_v37  ;;  %2628 = vrot.lane.b32.xlu2 %v7781_v3, %s7574_s21  ;;  %v1840_v36 = vsel %vm1839_vm8, %v8360_v7, %v8329_v22  ;;  %v1868_v39 = vsel %vm793_vm0, %v1847_v46, 0 }
 0x1a1   : > { %v8460_v27 = vadd.f32 %v1110_v35, %v965_v61  ;;  %6680 = vmatmul.msk.bf16.gmra.mxu0 %vm783_vm1, %v8317_v19  ;;  %v8464_v43 = vpop.permute.xlu1 %1988  ;;  %1901 = vmatpush.bf16.msrb.mxu2 %v1868_v39  ;;  %v939_v35 = vadd.f32 %v8180_v1, %v8264_v55  ;;  %v1650_v1 = vunpack.c.l.b16 %v1640_v8 }
 0x1a2   : > { %6693 = vmatmul.msk.bf16.vlgmr.msra.gmra.mxu2 %vm783_vm1, %v8411_v63  ;;  %2636 = vrot.lane.b32.xlu0 %v7785_v5, %s7574_s21 }
 0x1a4   : > { %v1112_v0 = vpop.f32.mrf.mxu3  ;;  %v8479_v9 = vpop.permute.xlu0 %1996  ;;  %1880 = vmatpush.bf16.msrb.mxu1 %v1840_v36 }
 0x1a5   : > { %v1082_v41 = vpop.f32.mrf.mxu2 }
 0x1a6   : > { %v8484_v49 = vadd.f32 %v1082_v41, %v8239_v44  ;;  %v966_v23 = vpop.f32.mrf.mxu0  ;;  %v987_v26 = vpop.f32.mrf.mxu1 }
 0x1a7   : > { %v8491_v56 = vadd.f32 %v987_v26, %v8371_v6  ;;  %2620 = vrot.lane.b32.xlu1 %v7791_v10, %s7574_s21  ;;  %v1844_v6 = vsel %vm1839_vm8, %v8369_v52, %v8386_v28  ;;  %v1841_v52 = vsel %vm1839_vm8, %v8329_v22, %v8353_v60  ;;  %v8529_v22 = vpop.permute.xlu2 %1982 }
 0x1a8   : > { %6697 = vmatmul.msk.bf16.gmra.mxu3 %vm783_vm1, %v8477_v50  ;;  %1902 = vmatpush.bf16.msrb.mxu2 %v1844_v6 }
 0x1a9   : > { %6683 = vmatmul.msk.bf16.gmra.mxu1 %vm783_vm1, %v8317_v19  ;;  %v1999_v44 = vpop.permute.xlu1 %1998  ;;  %2622 = vrot.lane.b32.xlu2 %v7804_v17, %s7574_s21 }
 0x1aa   : > { %v2009_v7 = vsel %vm2000_vm9, %v8479_v9, %v1999_v44  ;;  %2630 = vrot.lane.b32.xlu0 %v7797_v12, %s7574_s21 }
 0x1ab   : > { %v2032_v57 = vsel %vm793_vm0, %v2009_v7, 0 }
 0x1ac   : > { %v8508_v40 = vpop.permute.xlu0 %1980  ;;  %1903 = vmatpush.bf16.msrb.mxu2 %v1841_v52 }
 0x1ad   : > { %v1084_v19 = vpop.f32.mrf.mxu2 }
 0x1ae   : > { %v8513_v20 = vadd.f32 %v1084_v19, %v939_v35  ;;  %v989_v48 = vpop.f32.mrf.mxu1  ;;  %v1123_v61 = vpop.f32.mrf.mxu0 }
 0x1af   : > { %v1139_v28 = vadd.f32 %v1123_v61, %v8375_v16  ;;  %2632 = vrot.lane.b32.xlu1 %v7814_v21, %s7574_s21  ;;  %v8531_v16 = vpack.c.b16 %v1650_v1, %v1650_v1 }
 0x1b0   : > { %2085 = vmatpush.bf16.msra.mxu2 %v2032_v57  ;;  %v2008_v57 = vsel %vm2000_vm9, %v8404_v59, %v8479_v9 }
 0x1b1   : > { %6681 = vmatmul.msk.bf16.gmra.mxu0 %vm783_vm1, %v8367_v31  ;;  %v1822_v55 = vpop.permute.xlu1 %1821  ;;  %2481 = vrot.lane.b32.xlu2 %v7834_v32, %s7573_s26 }
 0x1b2   : > { %6694 = vmatmul.msk.bf16.gmra.mxu2 %vm783_vm1, %v8477_v50  ;;  %v1842_v54 = vsel %vm1839_vm8, %v8353_v60, %v1822_v55  ;;  %2640 = vrot.lane.b32.xlu0 %v7818_v24, %s7574_s21  ;;  %v2004_v55 = vsel %vm2000_vm9, %v8377_v2, %v8446_v53  ;;  %v2005_v2 = vsel %vm2000_vm9, %v8446_v53, %v8464_v43  ;;  %vm3662_vm8 = vcmask 867328  }
 0x1b3   : > { %1926 = vmatpush.bf16.msrb.mxu3 %v1842_v54  ;;  %v2029_v54 = vsel %vm793_vm0, %v2008_v57, 0 }
 0x1b4   : > { %v8533_v14 = vpop.permute.xlu0 %1990  ;;  %2062 = vmatpush.bf16.msra.mxu1 %v2029_v54 }
 0x1b5   : > { %v1087_v37 = vpop.f32.mrf.mxu2 }
 0x1b6   : > { %v8538_v46 = vadd.f32 %v1087_v37, %v8297_v11  ;;  %v1125_v0 = vpop.f32.mrf.mxu0  ;;  %v1238_v41 = vpop.f32.mrf.mxu1 }
 0x1b7   : > { %v1142_v60 = vadd.f32 %v1125_v0, %v8394_v42  ;;  %v8542_v23 = vadd.f32 %v1238_v41, %v8416_v34  ;;  %2642 = vrot.lane.b32.xlu1 %v7834_v32, %s7574_s21  ;;  %v8554_v11 = vpop.permute.xlu2 %2147 }
 0x1b8   : > { %6698 = vmatmul.msk.bf16.gmra.mxu3 %vm783_vm1, %v8531_v16  ;;  %2063 = vmatpush.bf16.msra.mxu1 %v2005_v2 }
 0x1b9   : > { %v1284_v26 = vpop.f32.mrf.mxu3  ;;  %6684 = vmatmul.msk.bf16.gmra.mxu1 %vm783_vm1, %v8367_v31  ;;  %v8556_v42 = vpop.permute.xlu1 %2157  ;;  %2473 = vrot.lane.b32.xlu2 %v7830_v29, %s7573_s26  ;;  %v2007_v31 = vsel %vm2000_vm9, %v8413_v58, %v8404_v59 }
 0x1ba   : > { %v8550_v36 = vadd.f32 %v1284_v26, %v1139_v28  ;;  %2624 = vrot.lane.b32.xlu0 %v7820_v25, %s7574_s21 }
 0x1bc   : > { %v8558_v34 = vpop.permute.xlu0 %2155 }
 0x1bd   : > { %v1089_v39 = vpop.f32.mrf.mxu2 }
 0x1be   : > { %v1128_v44 = vpop.f32.mrf.mxu0  ;;  %v1240_v7 = vpop.f32.mrf.mxu1 }
 0x1bf   : > { %v1145_v6 = vadd.f32 %v1128_v44, %v8423_v4  ;;  %v8567_v35 = vadd.f32 %v1240_v7, %v8451_v38  ;;  %2465 = vrot.lane.b32.xlu1 %v7836_v33, %s7573_s26  ;;  %v8579_v58 = vpop.permute.xlu2 %2141  ;;  %v2026_v4 = vsel %vm793_vm0, %v2007_v31, 0  ;;  %v2001_v7 = vsel %vm2000_vm9, %v8434_v45, %v8396_v47  ;;  %v7253_v45 = vld [vmem:[#allocation5 + $0x94] sm:$0xff]  ;;  %s11292_s26 = sld [smem:[#allocation19_spill]] }
 0x1c0   : > { %2039 = vmatpush.bf16.msra.mxu0 %v2026_v4  ;;  %v2002_v31 = vsel %vm2000_vm9, %v8396_v47, %v8508_v40 }
 0x1c1   : > { %v1286_v19 = vpop.f32.mrf.mxu3  ;;  %6699 = vmatmul.msk.bf16.vlgmr.msrb.gmra.mxu0 %vm783_vm1, %v8411_v63  ;;  %v8582_v38 = vpop.permute.xlu1 %2139  ;;  %v7252_v63 = vld [vmem:[#allocation5 + $0x8c] sm:$0xff]  ;;  %2626 = vrot.lane.b32.xlu2 %v7836_v33, %s7574_s21 }
 0x1c2   : > { %v8573_v8 = vadd.f32 %v1286_v19, %v1142_v60  ;;  %6695 = vmatmul.msk.bf16.gmra.mxu2 %vm783_vm1, %v8531_v16  ;;  %2634 = vrot.lane.b32.xlu0 %v7830_v29, %s7574_s21 }
 0x1c3   : > { %2064 = vmatpush.bf16.msra.mxu1 %v2002_v31 }
 0x1c4   : > { %v8587_v48 = vpop.permute.xlu0 %2149  ;;  %2040 = vmatpush.bf16.msra.mxu0 %v2004_v55 }
 0x1c5   : > { %v1261_v61 = vpop.f32.mrf.mxu2 }
 0x1c6   : > { %v8592_v52 = vadd.f32 %v1261_v61, %v8357_v62  ;;  %v1130_v28 = vpop.f32.mrf.mxu0  ;;  %v1243_v1 = vpop.f32.mrf.mxu1 }
 0x1c7   : > { %v1148_v59 = vadd.f32 %v1130_v28, %v8456_v30  ;;  %v8600_v9 = vadd.f32 %v1243_v1, %v8484_v49  ;;  %2801 = vrot.lane.b32.xlu1 %v7818_v24, %s7575_s11  ;;  %v2154_v49 = vpop.permute.xlu2 %2153 }
 0x1c8   : > { %6716 = vmatmul.msk.bf16.vlgmr.msrb.gmra.mxu3 %vm783_vm1, %v7252_v63  ;;  %v2168_v0 = vsel %vm2161_vm10, %v2154_v49, %v8558_v34  ;;  %2041 = vmatpush.bf16.msra.mxu0 %v2001_v7 }
 0x1c9   : > { %v1289_v62 = vpop.f32.mrf.mxu3  ;;  %6710 = vmatmul.msk.bf16.vlgmr.msrb.gmra.mxu1 %vm783_vm1, %v7252_v63  ;;  %v8613_v37 = vpop.permute.xlu1 %2151  ;;  %v2187_v60 = vsel %vm793_vm0, %v2168_v0, 0  ;;  %2791 = vrot.lane.b32.xlu2 %v7797_v12, %s7575_s11  ;;  %v2003_v0 = vsel %vm2000_vm9, %v8508_v40, %v8529_v22 }
 0x1ca   : > { %v8609_v30 = vadd.f32 %v1289_v62, %v1145_v6  ;;  %2799 = vrot.lane.b32.xlu0 %v7801_v15, %s7575_s11  ;;  %2200 = vmatpush.bf16.msra.mxu3 %v2187_v60  ;;  %v1801_v62 = vld [vmem:[#allocation5 + $0x9c] sm:$0xf] }
 0x1cc   : > { %v8617_v41 = vpop.permute.xlu0 %2159 }
 0x1cd   : > { %v1263_v53 = vpop.f32.mrf.mxu2 }
 0x1ce   : > { %v8623_v26 = vadd.f32 %v1263_v53, %v8383_v13  ;;  %v1133_v39 = vpop.f32.mrf.mxu0  ;;  %v1245_v44 = vpop.f32.mrf.mxu1 }
 0x1cf   : > { %v1151_v6 = vadd.f32 %v1133_v39, %v8491_v56  ;;  %v8633_v19 = vadd.f32 %v1245_v44, %v8513_v20  ;;  %2783 = vrot.lane.b32.xlu1 %v7804_v17, %s7575_s11  ;;  %v1811_v39 = vunpack.c.l.b16 %v1801_v62  ;;  %v2170_v62 = vsel %vm2161_vm10, %v8556_v42, %v8617_v41 }
 0x1d1   : > { %v1291_v13 = vpop.f32.mrf.mxu3  ;;  %6700 = vmatmul.msk.bf16.gmra.mxu0 %vm783_vm1, %v8477_v50  ;;  %v8644_v47 = vpop.permute.xlu1 %2314  ;;  %2785 = vrot.lane.b32.xlu2 %v7820_v25, %s7575_s11  ;;  %v1814_v22 = vpack.c.b16 %v1811_v39, %v1811_v39 }
 0x1d2   : > { %v8639_v4 = vadd.f32 %v1291_v13, %v1148_v59  ;;  %6713 = vmatmul.msk.bf16.vlgmr.msrb.gmra.mxu2 %vm783_vm1, %v7252_v63  ;;  %2793 = vrot.lane.b32.xlu0 %v7814_v21, %s7575_s11  ;;  %v8656_v63 = vpop.permute.xlu2 %2316 }
 0x1d4   : > { %v8646_v56 = vpop.permute.xlu0 %2143 }
 0x1d5   : > { %v1266_v20 = vpop.f32.mrf.mxu2 }
 0x1d6   : > { %v8651_v57 = vadd.f32 %v1266_v20, %v8400_v51  ;;  %v1135_v50 = vpop.f32.mrf.mxu0  ;;  %v1248_v61 = vpop.f32.mrf.mxu1  ;;  %v2006_v51 = vsel %vm2000_vm9, %v8464_v43, %v8533_v14  ;;  %vm3823_vm9 = vcmask 850944  }
 0x1d7   : > { %v8654_v28 = vadd.f32 %v1248_v61, %v8538_v46  ;;  %2795 = vrot.lane.b32.xlu1 %v7830_v29, %s7575_s11  ;;  %2086 = vmatpush.bf16.msra.mxu2 %v2006_v51  ;;  %v8719_v61 = vld [vmem:[#allocation5 + $0xa0] sm:$0xff] }
 0x1d8   : > { %6717 = vmatmul.msk.bf16.gmra.mxu3 %vm783_vm1, %v7253_v45 }
 0x1d9   : > { %v1294_v1 = vpop.f32.mrf.mxu3  ;;  %6711 = vmatmul.msk.bf16.gmra.mxu1 %vm783_vm1, %v7253_v45  ;;  %v8669_v46 = vpop.permute.xlu1 %2306  ;;  %2797 = vrot.lane.b32.xlu2 %v7785_v5, %s7575_s11 }
 0x1da   : > { %v8665_v55 = vadd.f32 %v1294_v1, %v1151_v6  ;;  %2803 = vrot.lane.b32.xlu0 %v7834_v32, %s7575_s11  ;;  %v8682_v53 = vpop.permute.xlu2 %2308 }
 0x1db   : > { %2087 = vmatpush.bf16.msra.mxu2 %v2003_v0 }
 0x1dc   : > { %v2146_v54 = vpop.permute.xlu0 %2145 }
 0x1dd   : > { %v1268_v59 = vpop.f32.mrf.mxu2  ;;  %v2165_v2 = vsel %vm2161_vm10, %v2146_v54, %v8554_v11 }
 0x1de   : > { %v8676_v49 = vadd.f32 %v1268_v59, %v8430_v18  ;;  %v1250_v43 = vpop.f32.mrf.mxu1  ;;  %v1399_v14 = vpop.f32.mrf.mxu0  ;;  %2201 = vmatpush.bf16.msra.mxu3 %v2165_v2  ;;  %v8746_v2 = vld [vmem:[#allocation5 + $0xb4] sm:$0xff] }
 0x1df   : > { %v1459_v60 = vadd.f32 %v1399_v14, %v8542_v23  ;;  %2958 = vrot.lane.b32.xlu1 %v7785_v5, %s7576_s2 }
 0x1e1   : > { %6701 = vmatmul.msk.bf16.gmra.mxu0 %vm783_vm1, %v8531_v16  ;;  %v1296_v18 = vpop.f32.mrf.mxu3  ;;  %v8691_v40 = vpop.permute.xlu1 %2298  ;;  %2960 = vrot.lane.b32.xlu2 %v7801_v15, %s7576_s2 }
 0x1e2   : > { %6714 = vmatmul.msk.bf16.gmra.mxu2 %vm783_vm1, %v7253_v45  ;;  %2787 = vrot.lane.b32.xlu0 %v7836_v33, %s7575_s11  ;;  %v8704_v45 = vpop.permute.xlu2 %2300 }
 0x1e4   : > { %v2138_v23 = vpop.permute.xlu0 %2137 }
 0x1e5   : > { %v1271_v44 = vpop.f32.mrf.mxu2  ;;  %v2162_v5 = vsel %vm2161_vm10, %v2138_v23, %v8582_v38  ;;  %v2167_v23 = vsel %vm2161_vm10, %v8587_v48, %v8613_v37  ;;  %v2163_v37 = vsel %vm2161_vm10, %v8582_v38, %v8579_v58 }
 0x1e6   : > { %v8698_v7 = vadd.f32 %v1271_v44, %v8460_v27  ;;  %v1401_v16 = vpop.f32.mrf.mxu0  ;;  %v1422_v31 = vpop.f32.mrf.mxu1  ;;  %2202 = vmatpush.bf16.msra.mxu3 %v2162_v5 }
 0x1e7   : > { %v1462_v6 = vadd.f32 %v1401_v16, %v8567_v35  ;;  %v8702_v13 = vadd.f32 %v1422_v31, %v8592_v52  ;;  %2950 = vrot.lane.b32.xlu1 %v7781_v3, %s7576_s2  ;;  %v2169_v35 = vsel %vm2161_vm10, %v8558_v34, %v8556_v42  ;;  %v2193_v42 = vsel %vm793_vm0, %v2170_v62, 0  ;;  %v7255_v16 = vld [vmem:[#allocation5 + $0xa8] sm:$0xff] }
 0x1e8   : > { %6718 = vmatmul.msk.bf16.gmra.mxu3 %vm783_vm1, %v1814_v22  ;;  %v2190_v34 = vsel %vm793_vm0, %v2169_v35, 0  ;;  %2246 = vmatpush.bf16.msrb.mxu1 %v2193_v42  ;;  %v8817_v35 = vld [vmem:[#allocation5 + $0xbc] sm:$0xff] }
 0x1e9   : > { %6712 = vmatmul.msk.bf16.gmra.mxu1 %vm783_vm1, %v1814_v22  ;;  %v2321_v15 = vpop.permute.xlu1 %2320  ;;  %2952 = vrot.lane.b32.xlu2 %v7797_v12, %s7576_s2 }
 0x1ea   : > { %2789 = vrot.lane.b32.xlu0 %v7781_v3, %s7575_s11  ;;  %v8725_v59 = vpop.permute.xlu2 %2310  ;;  %2223 = vmatpush.bf16.msrb.mxu0 %v2190_v34 }
 0x1eb   : > { %v1560_v27 = vpop.f32.mrf.mxu3 }
 0x1ec   : > { %v8715_v52 = vadd.f32 %v1560_v27, %v1459_v60  ;;  %v2319_v20 = vpop.permute.xlu0 %2318  ;;  %2247 = vmatpush.bf16.msrb.mxu1 %v2167_v23  ;;  %v2327_v27 = vsel %vm2322_vm11, %v8682_v53, %v8725_v59 }
 0x1ed   : > { %v1273_v50 = vpop.f32.mrf.mxu2  ;;  %v2331_v18 = vsel %vm2322_vm11, %v2319_v20, %v2321_v15 }
 0x1ee   : > { %v1404_v1 = vpop.f32.mrf.mxu0  ;;  %v1424_v51 = vpop.f32.mrf.mxu1 }
 0x1ef   : > { %v1465_v54 = vadd.f32 %v1404_v1, %v8600_v9  ;;  %v8723_v3 = vadd.f32 %v1424_v51, %v8623_v26  ;;  %2942 = vrot.lane.b32.xlu1 %v7791_v10, %s7576_s2  ;;  %v2166_v26 = vsel %vm2161_vm10, %v8554_v11, %v8587_v48 }
 0x1f0   : > { %2224 = vmatpush.bf16.msrb.mxu0 %v2166_v26 }
 0x1f1   : > { %6727 = vmatmul.msk.bf16.vlgmr.msra.gmra.mxu0 %vm783_vm1, %v8719_v61  ;;  %v8738_v12 = vpop.permute.xlu1 %2302  ;;  %2944 = vrot.lane.b32.xlu2 %v7804_v17, %s7576_s2  ;;  %v2330_v17 = vsel %vm2322_vm11, %v8656_v63, %v2319_v20 }
 0x1f2   : > { %6715 = vmatmul.msk.bf16.gmra.mxu2 %vm783_vm1, %v1814_v22  ;;  %2781 = vrot.lane.b32.xlu0 %v7791_v10, %s7575_s11  ;;  %v8760_v22 = vpop.permute.xlu2 %2304  ;;  %v2351_v31 = vsel %vm793_vm0, %v2330_v17, 0  ;;  %v2324_v50 = vsel %vm2322_vm11, %v8704_v45, %v8738_v12 }
 0x1f3   : > { %v1562_v9 = vpop.f32.mrf.mxu3  ;;  %2384 = vmatpush.bf16.msrb.mxu3 %v2351_v31 }
 0x1f4   : > { %v8744_v41 = vadd.f32 %v1562_v9, %v1462_v6  ;;  %v8748_v43 = vpop.permute.xlu0 %2312  ;;  %2225 = vmatpush.bf16.msrb.mxu0 %v2163_v37 }
 0x1f5   : > { %v1445_v14 = vpop.f32.mrf.mxu2 }
 0x1f6   : > { %v8753_v10 = vadd.f32 %v1445_v14, %v8550_v36  ;;  %v1406_v0 = vpop.f32.mrf.mxu0  ;;  %v1427_v60 = vpop.f32.mrf.mxu1  ;;  %v2354_v36 = vsel %vm793_vm0, %v2331_v18, 0  ;;  %v2123_v14 = vld [vmem:[#allocation5 + $0xc4] sm:$0xf] }
 0x1f7   : > { %v1468_v11 = vadd.f32 %v1406_v0, %v8633_v19  ;;  %v8757_v39 = vadd.f32 %v1427_v60, %v8651_v57  ;;  %2964 = vrot.lane.b32.xlu1 %v7834_v32, %s7576_s2  ;;  %v2164_v57 = vsel %vm2161_vm10, %v8579_v58, %v8646_v56  ;;  %2385 = vmatpush.bf16.msrb.mxu3 %v2327_v27  ;;  %v2133_v23 = vunpack.c.l.b16 %v2123_v14 }
 0x1f8   : > { %6744 = vmatmul.msk.bf16.vlgmr.msra.gmra.mxu3 %vm783_vm1, %v8746_v2  ;;  %2248 = vmatpush.bf16.msrb.mxu1 %v2164_v57  ;;  %v3098_v57 = vld [vmem:[%s7768_s20 + $0x54] sm:$0xff]  ;;  %vm3984_vm10 = vcmask 523264  }
 0x1f9   : > { %6730 = vmatmul.msk.bf16.vlgmr.msra.gmra.mxu1 %vm783_vm1, %v8719_v61  ;;  %v8774_v19 = vpop.permute.xlu1 %2477  ;;  %2407 = vmatpush.bf16.msra.mxu0 %v2354_v36  ;;  %v8860_v36 = vpack.c.b16 %v2133_v23, %v2133_v23  ;;  %v3140_v31 = vunpack.c.h.b16 %v3098_v57 }
 0x1fa   : > { %2962 = vrot.lane.b32.xlu0 %v7818_v24, %s7576_s2  ;;  %2954 = vrot.lane.b32.xlu2 %v7814_v21, %s7576_s2  ;;  %v8798_v15 = vpop.permute.xlu2 %2467 }
 0x1fb   : > { %v1565_v48 = vpop.f32.mrf.mxu3  ;;  %2386 = vmatpush.bf16.msrb.mxu3 %v2324_v50  ;;  %v8878_v27 = vpack.c.b16 %v3140_v31, %v3140_v31 }
 0x1fc   : > { %v8784_v32 = vadd.f32 %v1565_v48, %v1465_v54  ;;  %v8786_v44 = vpop.permute.xlu0 %2475 }
 0x1fd   : > { %v1447_v5 = vpop.f32.mrf.mxu2 }
 0x1fe   : > { %v8792_v24 = vadd.f32 %v1447_v5, %v8573_v8  ;;  %v1409_v38 = vpop.f32.mrf.mxu0  ;;  %v1429_v6 = vpop.f32.mrf.mxu1  ;;  %v2329_v8 = vsel %vm2322_vm11, %v8644_v47, %v8656_v63  ;;  %v3139_v5 = vunpack.c.l.b16 %v3098_v57  ;;  %v2328_v57 = vsel %vm2322_vm11, %v8725_v59, %v8748_v43 }
 0x1ff   : > { %v1471_v58 = vadd.f32 %v1409_v38, %v8654_v28  ;;  %v8796_v56 = vadd.f32 %v1429_v6, %v8676_v49  ;;  %2946 = vrot.lane.b32.xlu1 %v7820_v25, %s7576_s2  ;;  %v2348_v1 = vsel %vm793_vm0, %v2329_v8, 0  ;;  %2408 = vmatpush.bf16.msra.mxu0 %v2328_v57  ;;  %v7276_v57 = vld [vmem:[%s7768_s20 + $0x3c] sm:$0xf0] }
 0x200   : > { %2361 = vmatpush.bf16.msrb.mxu2 %v2348_v1  ;;  %v7274_v1 = vld [vmem:[%s7768_s20 + $0x30] sm:$0xf] }
 0x201   : > { %6728 = vmatmul.msk.bf16.gmra.mxu0 %vm783_vm1, %v7255_v16  ;;  %v8808_v21 = vpop.permute.xlu1 %2459 }
 0x202   : > { %6733 = vmatmul.msk.bf16.vlgmr.msra.gmra.mxu2 %vm783_vm1, %v8719_v61  ;;  %2956 = vrot.lane.b32.xlu0 %v7830_v29, %s7576_s2  ;;  %v1962_v29 = vld [vmem:[#allocation5 + $0xb0] sm:$0xf]  ;;  %v8833_v54 = vpop.permute.xlu2 %2461 }
 0x203   : > { %v1567_v28 = vpop.f32.mrf.mxu3  ;;  %2948 = vrot.lane.b32.xlu2 %v7836_v33, %s7576_s2  ;;  %v1972_v33 = vunpack.c.l.b16 %v1962_v29  ;;  %s11300_s2 = sld [smem:[#allocation25_spill]] }
 0x204   : > { %v8815_v49 = vadd.f32 %v1567_v28, %v1468_v11  ;;  %v8819_v20 = vpop.permute.xlu0 %2469 }
 0x205   : > { %v1450_v25 = vpop.f32.mrf.mxu2  ;;  %v1975_v42 = vpack.c.b16 %v1972_v33, %v1972_v33  ;;  %v6866_v33 = vld [vmem:[%s7768_s20 + $0x40] sm:$0xf0] }
 0x206   : > { %v8827_v47 = vadd.f32 %v1450_v25, %v8609_v30  ;;  %v1411_v63 = vpop.f32.mrf.mxu0  ;;  %v1432_v61 = vpop.f32.mrf.mxu1  ;;  %v2326_v30 = vsel %vm2322_vm11, %v8669_v46, %v8682_v53  ;;  %v2323_v46 = vsel %vm2322_vm11, %v8691_v40, %v8704_v45 }
 0x207   : > { %v8831_v51 = vadd.f32 %v1432_v61, %v8698_v7  ;;  %2362 = vmatpush.bf16.msrb.mxu2 %v2326_v30  ;;  %3173 = vrot.lane.b32.xlu1 %v8878_v27, %s7577_s29  ;;  %v6848_v30 = vld [vmem:[%s7768_s20 + $0x4] sm:$0xf] }
 0x208   : > { %6745 = vmatmul.msk.bf16.gmra.mxu3 %vm783_vm1, %v8817_v35 }
 0x209   : > { %6731 = vmatmul.msk.bf16.gmra.mxu1 %vm783_vm1, %v7255_v16  ;;  %v8841_v34 = vpop.permute.xlu1 %2471 }
 0x20a   : > { %v8854_v18 = vpop.permute.xlu2 %2463 }
 0x20b   : > { %v1570_v62 = vpop.f32.mrf.mxu3  ;;  %2363 = vmatpush.bf16.msrb.mxu2 %v2323_v46 }
 0x20c   : > { %v8843_v9 = vadd.f32 %v1570_v62, %v1471_v58  ;;  %v8845_v7 = vpop.permute.xlu0 %2479  ;;  %v8876_v58 = vpack.c.b16 %v3139_v5, %v3139_v5  ;;  %v8900_v62 = vor.u32 %v7274_v1, %v6866_v33  ;;  %v2325_v33 = vsel %vm2322_vm11, %v8738_v12, %v8760_v22 }
 0x20d   : > { %v1452_v26 = vpop.f32.mrf.mxu2  ;;  %2409 = vmatpush.bf16.msra.mxu0 %v2325_v33  ;;  %v6850_v33 = vld [vmem:[%s7768_s20 + $0x18] sm:$0xf0] }
 0x20e   : > { %v8848_v0 = vadd.f32 %v1452_v26, %v8639_v4  ;;  %v1434_v60 = vpop.f32.mrf.mxu1  ;;  %v1583_v11 = vpop.f32.mrf.mxu0  ;;  %3171 = vrot.lane.b32.xlu0 %v8876_v58, %s7577_s29  ;;  %v7272_v26 = vld [vmem:[%s7768_s20 + $0x14] sm:$0xf0] }
 0x20f   : > { %v1621_v53 = vadd.f32 %v1583_v11, %v8702_v13  ;;  %v8905_v14 = vor.u32 %v7272_v26, %v6848_v30  ;;  %v8916_v11 = vld [vmem:[#allocation5 + $0xc8] sm:$0xff] }
 0x211   : > { %6729 = vmatmul.msk.bf16.gmra.mxu0 %vm783_vm1, %v1975_v42  ;;  %v8858_v17 = vpop.permute.xlu1 %2638  ;;  %3155 = vrot.lane.b32.xlu1 %v8905_v14, %s7577_s29 }
 0x212   : > { %6734 = vmatmul.msk.bf16.gmra.mxu2 %vm783_vm1, %v7255_v16  ;;  %v8872_v6 = vpop.permute.xlu2 %2628 }
 0x213   : > { %v1572_v4 = vpop.f32.mrf.mxu3 }
 0x214   : > { %v8862_v48 = vpop.permute.xlu0 %2636 }
 0x215   : > { %v1455_v37 = vpop.f32.mrf.mxu2 }
 0x216   : > { %v8866_v40 = vadd.f32 %v1455_v37, %v8665_v55  ;;  %v1585_v13 = vpop.f32.mrf.mxu0  ;;  %v1606_v45 = vpop.f32.mrf.mxu1  ;;  %3165 = vrot.lane.b32.xlu0 %v8900_v62, %s7577_s29 }
 0x217   : > { %v1624_v38 = vadd.f32 %v1585_v13, %v8723_v3  ;;  %v8870_v16 = vadd.f32 %v1606_v45, %v8753_v10 }
 0x218   : > { %6746 = vmatmul.msk.bf16.gmra.mxu3 %vm783_vm1, %v8860_v36 }
 0x219   : > { %6732 = vmatmul.msk.bf16.gmra.mxu1 %vm783_vm1, %v1975_v42  ;;  %v8885_v55 = vpop.permute.xlu1 %2620 }
 0x21a   : > { %v8895_v29 = vpop.permute.xlu2 %2622 }
 0x21b   : > { %v1744_v3 = vpop.f32.mrf.mxu3 }
 0x21c   : > { %v8887_v10 = vadd.f32 %v1744_v3, %v1621_v53  ;;  %v8889_v8 = vpop.permute.xlu0 %2630  ;;  %v7277_v3 = vld [vmem:[%s7768_s20 + $0x44] sm:$0xf0] }
 0x21d   : > { %v1457_v28 = vpop.f32.mrf.mxu2 }
 0x21e   : > { %v1588_v25 = vpop.f32.mrf.mxu0  ;;  %v1608_v50 = vpop.f32.mrf.mxu1 }
 0x21f   : > { %v1627_v63 = vadd.f32 %v1588_v25, %v8757_v39  ;;  %v8893_v61 = vadd.f32 %v1608_v50, %v8792_v24 }
 0x221   : > { %6747 = vmatmul.msk.bf16.vlgmr.msrb.gmra.mxu0 %vm783_vm1, %v8746_v2  ;;  %v8910_v39 = vpop.permute.xlu1 %2632 }
 0x222   : > { %6735 = vmatmul.msk.bf16.gmra.mxu2 %vm783_vm1, %v1975_v42  ;;  %v8921_v42 = vld [vmem:[%s7768_s20 + $0x5c] sm:$0xff]  ;;  %v2482_v31 = vpop.permute.xlu2 %2481 }
 0x223   : > { %v1746_v24 = vpop.f32.mrf.mxu3  ;;  %v3141_v13 = vunpack.c.l.b16 %v8921_v42 }
 0x224   : > { %v8914_v60 = vadd.f32 %v1746_v24, %v1624_v38  ;;  %v8918_v46 = vpop.permute.xlu0 %2640  ;;  %v6872_v38 = vld [vmem:[%s7768_s20 + $0x34] sm:$0xf] }
 0x225   : > { %v1721_v53 = vpop.f32.mrf.mxu2  ;;  %v8940_v28 = vpack.c.b16 %v3141_v13, %v3141_v13  ;;  %v8942_v59 = vor.u32 %v7277_v3, %v6872_v38 }
 0x226   : > { %v8924_v23 = vadd.f32 %v1721_v53, %v8715_v52  ;;  %v1590_v4 = vpop.f32.mrf.mxu0  ;;  %v1611_v37 = vpop.f32.mrf.mxu1  ;;  %v2492_v52 = vsel %vm2483_vm12, %v8845_v7, %v2482_v31  ;;  %v8989_v31 = vld [vmem:[#allocation5 + $0xd0] sm:$0xff] }
 0x227   : > { %v1630_v45 = vadd.f32 %v1590_v4, %v8796_v56  ;;  %v8932_v5 = vadd.f32 %v1611_v37, %v8827_v47  ;;  %v2515_v43 = vsel %vm793_vm0, %v2492_v52, 0  ;;  %3175 = vrot.lane.b32.xlu0 %v8940_v28, %s7577_s29  ;;  %v2490_v47 = vsel %vm2483_vm12, %v8786_v44, %v8774_v19  ;;  %3167 = vrot.lane.b32.xlu1 %v8942_v59, %s7577_s29  ;;  %v6864_v37 = vld [vmem:[%s7768_s20 + $0x2c] sm:$0xf] }
 0x228   : > { %6764 = vmatmul.msk.bf16.vlgmr.msrb.gmra.mxu3 %vm783_vm1, %v8916_v11  ;;  %v2509_v44 = vsel %vm793_vm0, %v2490_v47, 0 }
 0x229   : > { %6750 = vmatmul.msk.bf16.vlgmr.msrb.gmra.mxu1 %vm783_vm1, %v8746_v2  ;;  %v2643_v56 = vpop.permute.xlu1 %2642  ;;  %2568 = vmatpush.bf16.msra.mxu3 %v2515_v43 }
 0x22a   : > { %2522 = vmatpush.bf16.msra.mxu1 %v2509_v44  ;;  %v2474_v4 = vpop.permute.xlu2 %2473 }
 0x22b   : > { %v1749_v25 = vpop.f32.mrf.mxu3  ;;  %v2489_v12 = vsel %vm2483_vm12, %v8841_v34, %v2474_v4 }
 0x22c   : > { %v8954_v50 = vadd.f32 %v1749_v25, %v1627_v63  ;;  %v8956_v1 = vpop.permute.xlu0 %2624 }
 0x22d   : > { %v1723_v2 = vpop.f32.mrf.mxu2  ;;  %2569 = vmatpush.bf16.msra.mxu3 %v2489_v12 }
 0x22e   : > { %v8962_v30 = vadd.f32 %v1723_v2, %v8744_v41  ;;  %v1593_v26 = vpop.f32.mrf.mxu0  ;;  %v1613_v24 = vpop.f32.mrf.mxu1  ;;  %v2487_v41 = vsel %vm2483_vm12, %v8798_v15, %v8819_v20  ;;  %v8993_v15 = vor.u32 %v7276_v57, %v6864_v37  ;;  %v7270_v2 = vld [vmem:[%s7768_s20 + $0x8] sm:$0xf] }
 0x22f   : > { %v1633_v53 = vadd.f32 %v1593_v26, %v8831_v51  ;;  %v8967_v63 = vadd.f32 %v1613_v24, %v8848_v0  ;;  %3332 = vrot.lane.b32.xlu0 %v8876_v58, %s7578_s24  ;;  %v2491_v51 = vsel %vm2483_vm12, %v8774_v19, %v8845_v7  ;;  %3334 = vrot.lane.b32.xlu1 %v8878_v27, %s7578_s24 }
 0x230   : > { %2523 = vmatpush.bf16.msra.mxu1 %v2487_v41  ;;  %3163 = vrot.lane.b32.xlu2 %v8993_v15, %s7577_s29  ;;  %v2512_v47 = vsel %vm793_vm0, %v2491_v51, 0  ;;  %v9028_v24 = vor.u32 %v7270_v2, %v6850_v33  ;;  %v2651_v33 = vsel %vm2644_vm13, %v8862_v48, %v8858_v17 }
 0x231   : > { %6748 = vmatmul.msk.bf16.gmra.mxu0 %vm783_vm1, %v8817_v35  ;;  %v2466_v22 = vpop.permute.xlu1 %2465  ;;  %2545 = vmatpush.bf16.msra.mxu2 %v2512_v47 }
 0x232   : > { %6761 = vmatmul.msk.bf16.vlgmr.msrb.gmra.mxu2 %vm783_vm1, %v8916_v11  ;;  %v2486_v19 = vsel %vm2483_vm12, %v8854_v18, %v2466_v22 }
 0x233   : > { %v1751_v0 = vpop.f32.mrf.mxu3  ;;  %2570 = vmatpush.bf16.msra.mxu3 %v2486_v19 }
 0x234   : > { %v8987_v13 = vadd.f32 %v1751_v0, %v1630_v45  ;;  %v8991_v38 = vpop.permute.xlu0 %2634  ;;  %v2484_v45 = vsel %vm2483_vm12, %v8808_v21, %v8833_v54  ;;  %v2653_v21 = vsel %vm2644_vm13, %v8918_v46, %v2643_v56 }
 0x235   : > { %v1726_v3 = vpop.f32.mrf.mxu2  ;;  %2524 = vmatpush.bf16.msra.mxu1 %v2484_v45  ;;  %v2676_v56 = vsel %vm793_vm0, %v2653_v21, 0 }
 0x236   : > { %v8998_v7 = vadd.f32 %v1726_v3, %v8784_v32  ;;  %v1595_v52 = vpop.f32.mrf.mxu0  ;;  %v1616_v43 = vpop.f32.mrf.mxu1  ;;  %v2488_v32 = vsel %vm2483_vm12, %v8819_v20, %v8841_v34  ;;  %v2284_v34 = vld [vmem:[#allocation5 + $0xd8] sm:$0xf] }
 0x237   : > { %v9007_v25 = vadd.f32 %v1616_v43, %v8866_v40  ;;  %3326 = vrot.lane.b32.xlu0 %v8900_v62, %s7578_s24  ;;  %3316 = vrot.lane.b32.xlu1 %v8905_v14, %s7578_s24  ;;  %v2294_v22 = vunpack.c.l.b16 %v2284_v34  ;;  %v3142_v43 = vunpack.c.h.b16 %v8921_v42 }
 0x238   : > { %6765 = vmatmul.msk.bf16.gmra.mxu3 %vm783_vm1, %v8989_v31  ;;  %2546 = vmatpush.bf16.msra.mxu2 %v2488_v32 }
 0x239   : > { %6751 = vmatmul.msk.bf16.gmra.mxu1 %vm783_vm1, %v8817_v35  ;;  %3157 = vrot.lane.b32.xlu2 %v9028_v24, %s7577_s29  ;;  %v9070_v32 = vpack.c.b16 %v3142_v43, %v3142_v43 }
 0x23b   : > { %v1754_v40 = vpop.f32.mrf.mxu3 }
 0x23c   : > { %v9024_v26 = vadd.f32 %v1754_v40, %v1633_v53  ;;  %v9026_v35 = vpop.permute.xlu0 %2799  ;;  %v2485_v53 = vsel %vm2483_vm12, %v8833_v54, %v8854_v18  ;;  %v6856_v54 = vld [vmem:[%s7768_s20 + $0xc] sm:$0xf]  ;;  %v7273_v18 = vld [vmem:[%s7768_s20 + $0x1c] sm:$0xf0]  ;;  %vm4145_vm12 = vcmask 506880  }
 0x23d   : > { %v1728_v20 = vpop.f32.mrf.mxu2  ;;  %2547 = vmatpush.bf16.msra.mxu2 %v2485_v53  ;;  %v9056_v37 = vor.u32 %v7273_v18, %v6856_v54  ;;  %v7260_v18 = vld [vmem:[#allocation5 + $0xdc] sm:$0xff] }
 0x23e   : > { %v9032_v44 = vadd.f32 %v1728_v20, %v8815_v49  ;;  %v1618_v4 = vpop.f32.mrf.mxu1  ;;  %v1767_v12 = vpop.f32.mrf.mxu0 }
 0x23f   : > { %v1783_v41 = vadd.f32 %v1767_v12, %v8870_v16  ;;  %3336 = vrot.lane.b32.xlu0 %v8940_v28, %s7578_s24  ;;  %v9046_v49 = vpop.permute.xlu2 %2626  ;;  %3328 = vrot.lane.b32.xlu1 %v8942_v59, %s7578_s24  ;;  %v9052_v16 = vpack.c.b16 %v2294_v22, %v2294_v22  ;;  %v6874_v4 = vld [vmem:[%s7768_s20 + $0x48] sm:$0xf0]  ;;  %v7271_v12 = vld [vmem:[%s7768_s20 + $0x10] sm:$0xf] }
 0x241   : > { %2729 = vmatpush.bf16.msrb.mxu2 %v2676_v56  ;;  %6749 = vmatmul.msk.bf16.gmra.mxu0 %vm783_vm1, %v8860_v36  ;;  %v7275_v56 = vld [vmem:[%s7768_s20 + $0x38] sm:$0xf] }
 0x242   : > { %6762 = vmatmul.msk.bf16.gmra.mxu2 %vm783_vm1, %v8989_v31  ;;  %3159 = vrot.lane.b32.xlu2 %v9056_v37, %s7577_s29  ;;  %v9098_v53 = vor.u32 %v7275_v56, %v6874_v4 }
 0x243   : > { %v1756_v51 = vpop.f32.mrf.mxu3 }
 0x244   : > { %v9054_v0 = vpop.permute.xlu0 %2793  ;;  %v2652_v51 = vsel %vm2644_vm13, %v8858_v17, %v8918_v46  ;;  %v2648_v17 = vsel %vm2644_vm13, %v8872_v6, %v8889_v8 }
 0x245   : > { %v1731_v57 = vpop.f32.mrf.mxu2  ;;  %v2673_v46 = vsel %vm793_vm0, %v2652_v51, 0 }
 0x246   : > { %v9059_v3 = vadd.f32 %v1731_v57, %v8843_v9  ;;  %v1769_v19 = vpop.f32.mrf.mxu0  ;;  %v1882_v52 = vpop.f32.mrf.mxu1  ;;  %2706 = vmatpush.bf16.msrb.mxu1 %v2673_v46 }
 0x247   : > { %v1786_v45 = vadd.f32 %v1769_v19, %v8893_v61  ;;  %v9066_v47 = vadd.f32 %v1882_v52, %v8924_v23  ;;  %v9074_v9 = vpop.permute.xlu1 %2801  ;;  %3320 = vrot.lane.b32.xlu0 %v9056_v37, %s7578_s24  ;;  %v9078_v61 = vpop.permute.xlu2 %2791  ;;  %3338 = vrot.lane.b32.xlu1 %v9070_v32, %s7578_s24 }
 0x248   : > { %6766 = vmatmul.msk.bf16.gmra.mxu3 %vm783_vm1, %v9052_v16 }
 0x249   : > { %6752 = vmatmul.msk.bf16.gmra.mxu1 %vm783_vm1, %v8860_v36 }
 0x24a   : > { %3324 = vrot.lane.b32.xlu2 %v8993_v15, %s7578_s24 }
 0x24b   : > { %v1928_v42 = vpop.f32.mrf.mxu3 }
 0x24c   : > { %v9082_v23 = vadd.f32 %v1928_v42, %v1783_v41  ;;  %v9084_v21 = vpop.permute.xlu0 %2803  ;;  %v6858_v41 = vld [vmem:[%s7768_s20 + $0x20] sm:$0xf0]  ;;  %s7580_s20 = smov 106  }
 0x24d   : > { %v1733_v40 = vpop.f32.mrf.mxu2  ;;  %v9103_v22 = vor.u32 %v7271_v12, %v6858_v41 }
 0x24e   : > { %v1772_v36 = vpop.f32.mrf.mxu0  ;;  %v1884_v2 = vpop.f32.mrf.mxu1 }
 0x24f   : > { %v1789_v20 = vadd.f32 %v1772_v36, %v8932_v5  ;;  %v9093_v34 = vadd.f32 %v1884_v2, %v8962_v30  ;;  %3330 = vrot.lane.b32.xlu0 %v9098_v53, %s7578_s24  ;;  %v9109_v48 = vpop.permute.xlu2 %2785  ;;  %v2670_v5 = vsel %vm793_vm0, %v2651_v33, 0  ;;  %v9112_v30 = vpop.permute.xlu1 %2783  ;;  %3161 = vrot.lane.b32.xlu1 %v9103_v22, %s7577_s29 }
 0x250   : > { %2683 = vmatpush.bf16.msrb.mxu0 %v2670_v5  ;;  %v2645_v5 = vsel %vm2644_vm13, %v8885_v55, %v8895_v29 }
 0x251   : > { %6767 = vmatmul.msk.bf16.vlgmr.msra.gmra.mxu0 %vm783_vm1, %v8916_v11 }
 0x252   : > { %6763 = vmatmul.msk.bf16.gmra.mxu2 %vm783_vm1, %v9052_v16  ;;  %3318 = vrot.lane.b32.xlu2 %v9028_v24, %s7578_s24 }
 0x253   : > { %v1930_v54 = vpop.f32.mrf.mxu3 }
 0x254   : > { %v9119_v11 = vadd.f32 %v1930_v54, %v1786_v45  ;;  %v9121_v57 = vpop.permute.xlu0 %2787  ;;  %2684 = vmatpush.bf16.msrb.mxu0 %v2648_v17 }
 0x255   : > { %v1905_v19 = vpop.f32.mrf.mxu2 }
 0x256   : > { %v9124_v52 = vadd.f32 %v1905_v19, %v8887_v10  ;;  %v1774_v43 = vpop.f32.mrf.mxu0  ;;  %v1887_v42 = vpop.f32.mrf.mxu1  ;;  %v2649_v10 = vsel %vm2644_vm13, %v8889_v8, %v8910_v39 }
 0x257   : > { %v1792_v45 = vadd.f32 %v1774_v43, %v8967_v63  ;;  %v9134_v40 = vadd.f32 %v1887_v42, %v8998_v7  ;;  %3495 = vrot.lane.b32.xlu0 %v8878_v27, %s7579_s27  ;;  %v2798_v6 = vpop.permute.xlu2 %2797  ;;  %v9143_v63 = vpop.permute.xlu1 %2795  ;;  %2707 = vmatpush.bf16.msrb.mxu1 %v2649_v10 }
 0x258   : > { %6784 = vmatmul.msk.bf16.vlgmr.msra.gmra.mxu3 %vm783_vm1, %v7260_v18  ;;  %v2812_v36 = vsel %vm2805_vm14, %v2798_v6, %v9026_v35  ;;  %3497 = vrot.lane.b32.xlu1 %v8940_v28, %s7579_s27 }
 0x259   : > { %6778 = vmatmul.msk.bf16.vlgmr.msra.gmra.mxu1 %vm783_vm1, %v7260_v18  ;;  %v2831_v33 = vsel %vm793_vm0, %v2812_v36, 0  ;;  %2685 = vmatpush.bf16.msrb.mxu0 %v2645_v5  ;;  %v2445_v36 = vld [vmem:[#allocation5 + $0xec] sm:$0xf] }
 0x25a   : > { %2844 = vmatpush.bf16.msrb.mxu3 %v2831_v33  ;;  %3177 = vrot.lane.b32.xlu2 %v9070_v32, %s7577_s29 }
 0x25b   : > { %v1933_v7 = vpop.f32.mrf.mxu3 }
 0x25c   : > { %v9149_v2 = vadd.f32 %v1933_v7, %v1789_v20  ;;  %v2790_v8 = vpop.permute.xlu0 %2789  ;;  %v2646_v20 = vsel %vm2644_vm13, %v8895_v29, %v8956_v1 }
 0x25d   : > { %v1907_v56 = vpop.f32.mrf.mxu2  ;;  %2708 = vmatpush.bf16.msrb.mxu1 %v2646_v20 }
 0x25e   : > { %v9153_v4 = vadd.f32 %v1907_v56, %v8914_v60  ;;  %v1777_v12 = vpop.f32.mrf.mxu0  ;;  %v1889_v41 = vpop.f32.mrf.mxu1  ;;  %v2809_v60 = vsel %vm2805_vm14, %v2790_v8, %v9078_v61 }
 0x25f   : > { %v1795_v51 = vadd.f32 %v1777_v12, %v9007_v25  ;;  %v9165_v54 = vadd.f32 %v1889_v41, %v9032_v44  ;;  %3489 = vrot.lane.b32.xlu0 %v8942_v59, %s7579_s27  ;;  %v9174_v55 = vpop.permute.xlu1 %2958  ;;  %2845 = vmatpush.bf16.msrb.mxu3 %v2809_v60  ;;  %v7261_v44 = vld [vmem:[#allocation5 + $0xe4] sm:$0xff]  ;;  %v2455_v41 = vunpack.c.l.b16 %v2445_v36 }
 0x260   : > { %3479 = vrot.lane.b32.xlu1 %v9028_v24, %s7579_s27 }
 0x261   : > { %6768 = vmatmul.msk.bf16.gmra.mxu0 %vm783_vm1, %v8989_v31 }
 0x262   : > { %6781 = vmatmul.msk.bf16.vlgmr.msra.gmra.mxu2 %vm783_vm1, %v7260_v18  ;;  %3169 = vrot.lane.b32.xlu2 %v9098_v53, %s7577_s29 }
 0x263   : > { %v1935_v29 = vpop.f32.mrf.mxu3 }
 0x264   : > { %v9178_v25 = vadd.f32 %v1935_v29, %v1792_v45  ;;  %v2782_v19 = vpop.permute.xlu0 %2781  ;;  %v9190_v45 = vpop.permute.xlu2 %2960 }
 0x265   : > { %v1910_v31 = vpop.f32.mrf.mxu2  ;;  %v2806_v43 = vsel %vm2805_vm14, %v2782_v19, %v9112_v30 }
 0x266   : > { %v9183_v18 = vadd.f32 %v1910_v31, %v8954_v50  ;;  %v1779_v42 = vpop.f32.mrf.mxu0  ;;  %v1892_v17 = vpop.f32.mrf.mxu1  ;;  %2846 = vmatpush.bf16.msrb.mxu3 %v2806_v43  ;;  %v2650_v50 = vsel %vm2644_vm13, %v8910_v39, %v8991_v38  ;;  %v2647_v39 = vsel %vm2644_vm13, %v8956_v1, %v9046_v49  ;;  %v2458_v49 = vpack.c.b16 %v2455_v41, %v2455_v41  ;;  %v9247_v43 = vld [vmem:[#allocation5 + $0xf0] sm:$0xff] }
 0x267   : > { %v9188_v46 = vadd.f32 %v1892_v17, %v9059_v3  ;;  %3499 = vrot.lane.b32.xlu0 %v9070_v32, %s7579_s27  ;;  %2730 = vmatpush.bf16.msrb.mxu2 %v2650_v50  ;;  %v9199_v10 = vpop.permute.xlu1 %2950  ;;  %vm4306_vm13 = vcmask 490496  }
 0x268   : > { %6785 = vmatmul.msk.bf16.gmra.mxu3 %vm783_vm1, %v7261_v44  ;;  %3491 = vrot.lane.b32.xlu1 %v9098_v53, %s7579_s27 }
 0x269   : > { %6779 = vmatmul.msk.bf16.gmra.mxu1 %vm783_vm1, %v7261_v44 }
 0x26a   : > { %3322 = vrot.lane.b32.xlu2 %v9103_v22, %s7578_s24 }
 0x26b   : > { %v1938_v6 = vpop.f32.mrf.mxu3  ;;  %2731 = vmatpush.bf16.msrb.mxu2 %v2647_v39  ;;  %v9278_v39 = vld [vmem:[#allocation5 + $0x104] sm:$0xff] }
 0x26c   : > { %v9203_v3 = vadd.f32 %v1938_v6, %v1795_v51  ;;  %v9214_v12 = vpop.permute.xlu2 %2952 }
 0x26d   : > { %v1912_v7 = vpop.f32.mrf.mxu2 }
 0x26e   : > { %v9206_v33 = vadd.f32 %v1912_v7, %v8987_v13  ;;  %v1894_v8 = vpop.f32.mrf.mxu1  ;;  %v2043_v56 = vpop.f32.mrf.mxu0 }
 0x26f   : > { %v2103_v38 = vadd.f32 %v2043_v56, %v9066_v47  ;;  %3483 = vrot.lane.b32.xlu0 %v9103_v22, %s7579_s27  ;;  %v9221_v13 = vpop.permute.xlu1 %2942  ;;  %v2810_v56 = vsel %vm2805_vm14, %v9078_v61, %v9054_v0 }
 0x270   : > { %3654 = vrot.lane.b32.xlu1 %v8876_v58, %s7580_s20 }
 0x271   : > { %6769 = vmatmul.msk.bf16.gmra.mxu0 %vm783_vm1, %v9052_v16 }
 0x272   : > { %6782 = vmatmul.msk.bf16.gmra.mxu2 %vm783_vm1, %v7261_v44  ;;  %3487 = vrot.lane.b32.xlu2 %v8900_v62, %s7579_s27  ;;  %v2963_v44 = vpop.permute.xlu0 %2962 }
 0x273   : > { %v1940_v1 = vpop.f32.mrf.mxu3 }
 0x274   : > { %v9234_v29 = vpop.permute.xlu2 %2944 }
 0x275   : > { %v1915_v47 = vpop.f32.mrf.mxu2 }
 0x276   : > { %v9226_v5 = vadd.f32 %v1915_v47, %v9024_v26  ;;  %v2045_v20 = vpop.f32.mrf.mxu0  ;;  %v2066_v51 = vpop.f32.mrf.mxu1 }
 0x277   : > { %v2106_v16 = vadd.f32 %v2045_v20, %v9093_v34  ;;  %v9232_v60 = vadd.f32 %v2066_v51, %v9124_v52  ;;  %3485 = vrot.lane.b32.xlu0 %v8993_v15, %s7579_s27  ;;  %v2965_v26 = vpop.permute.xlu1 %2964  ;;  %v2813_v34 = vsel %vm2805_vm14, %v9026_v35, %v9074_v9  ;;  %v2814_v35 = vsel %vm2805_vm14, %v9074_v9, %v9084_v21 }
 0x278   : > { %6786 = vmatmul.msk.bf16.gmra.mxu3 %vm783_vm1, %v2458_v49  ;;  %3646 = vrot.lane.b32.xlu1 %v8993_v15, %s7580_s20  ;;  %v2834_v36 = vsel %vm793_vm0, %v2813_v34, 0  ;;  %v2837_v9 = vsel %vm793_vm0, %v2814_v35, 0  ;;  %v2975_v20 = vsel %vm2966_vm15, %v2963_v44, %v2965_v26  ;;  %v2973_v35 = vsel %vm2966_vm15, %v9174_v55, %v9190_v45 }
 0x279   : > { %6780 = vmatmul.msk.bf16.gmra.mxu1 %vm783_vm1, %v2458_v49  ;;  %2867 = vmatpush.bf16.msra.mxu0 %v2834_v36 }
 0x27a   : > { %3481 = vrot.lane.b32.xlu2 %v9056_v37, %s7579_s27  ;;  %2890 = vmatpush.bf16.msra.mxu1 %v2837_v9 }
 0x27b   : > { %v2204_v19 = vpop.f32.mrf.mxu3 }
 0x27c   : > { %v9245_v52 = vadd.f32 %v2204_v19, %v2103_v38  ;;  %v9255_v7 = vpop.permute.xlu2 %2954 }
 0x27d   : > { %v1917_v31 = vpop.f32.mrf.mxu2  ;;  %2868 = vmatpush.bf16.msra.mxu0 %v2810_v56 }
 0x27e   : > { %v2048_v42 = vpop.f32.mrf.mxu0  ;;  %v2068_v17 = vpop.f32.mrf.mxu1  ;;  %v7263_v31 = vld [vmem:[#allocation5 + $0xf8] sm:$0xff] }
 0x27f   : > { %v2109_v50 = vadd.f32 %v2048_v42, %v9134_v40  ;;  %v9253_v6 = vadd.f32 %v2068_v17, %v9153_v4  ;;  %3477 = vrot.lane.b32.xlu0 %v8905_v14, %s7579_s27  ;;  %v9266_v40 = vpop.permute.xlu0 %2956  ;;  %v9268_v4 = vpop.permute.xlu1 %2946 }
 0x280   : > { %3638 = vrot.lane.b32.xlu1 %v8905_v14, %s7580_s20  ;;  %v2968_v55 = vsel %vm2966_vm15, %v9234_v29, %v9268_v4 }
 0x281   : > { %6795 = vmatmul.msk.bf16.vlgmr.msrb.gmra.mxu0 %vm783_vm1, %v9247_v43 }
 0x282   : > { %6783 = vmatmul.msk.bf16.gmra.mxu2 %vm783_vm1, %v2458_v49  ;;  %3493 = vrot.lane.b32.xlu2 %v8876_v58, %s7579_s27  ;;  %s11301_s27 = sld [smem:[#allocation23_spill]] }
 0x283   : > { %v2206_v8 = vpop.f32.mrf.mxu3 }
 0x284   : > { %v9276_v21 = vadd.f32 %v2206_v8, %v2106_v16  ;;  %v9290_v51 = vpop.permute.xlu2 %2948  ;;  %v9345_v8 = vld [vmem:[#allocation5 + $0x10c] sm:$0xff] }
 0x285   : > { %v2089_v38 = vpop.f32.mrf.mxu2 }
 0x286   : > { %v9281_v41 = vadd.f32 %v2089_v38, %v9082_v23  ;;  %v2050_v1 = vpop.f32.mrf.mxu0  ;;  %v2071_v49 = vpop.f32.mrf.mxu1  ;;  %v2811_v23 = vsel %vm2805_vm14, %v9054_v0, %v9143_v63  ;;  %v2807_v0 = vsel %vm2805_vm14, %v9112_v30, %v9109_v48  ;;  %v2808_v63 = vsel %vm2805_vm14, %v9109_v48, %v9121_v57 }
 0x287   : > { %v2112_v61 = vadd.f32 %v2050_v1, %v9165_v54  ;;  %v9287_v47 = vadd.f32 %v2071_v49, %v9183_v18  ;;  %2891 = vmatpush.bf16.msra.mxu1 %v2811_v23  ;;  %v2974_v54 = vsel %vm2966_vm15, %v9190_v45, %v2963_v44  ;;  %v2998_v18 = vsel %vm793_vm0, %v2975_v20, 0  ;;  %3658 = vrot.lane.b32.xlu0 %v8940_v28, %s7580_s20  ;;  %v9314_v44 = vpop.permute.xlu0 %3171  ;;  %v9316_v19 = vpop.permute.xlu1 %3173  ;;  %v2606_v49 = vld [vmem:[#allocation5 + $0x100] sm:$0xf] }
 0x288   : > { %6812 = vmatmul.msk.bf16.vlgmr.msrb.gmra.mxu3 %vm783_vm1, %v9278_v39  ;;  %3660 = vrot.lane.b32.xlu1 %v9070_v32, %s7580_s20  ;;  %v2995_v42 = vsel %vm793_vm0, %v2974_v54, 0  ;;  %v2970_v54 = vsel %vm2966_vm15, %v9199_v10, %v9214_v12  ;;  %vm4467_vm14 = vcmask 474112  }
 0x289   : > { %6798 = vmatmul.msk.bf16.vlgmr.msrb.gmra.mxu1 %vm783_vm1, %v9247_v43  ;;  %2869 = vmatpush.bf16.msra.mxu0 %v2807_v0 }
 0x28a   : > { %3028 = vmatpush.bf16.msra.mxu3 %v2995_v42  ;;  %3656 = vrot.lane.b32.xlu2 %v8878_v27, %s7580_s20 }
 0x28b   : > { %v2209_v16 = vpop.f32.mrf.mxu3  ;;  %2892 = vmatpush.bf16.msra.mxu1 %v2808_v63 }
 0x28c   : > { %v9312_v26 = vadd.f32 %v2209_v16, %v2109_v50  ;;  %v9328_v36 = vpop.permute.xlu2 %3163 }
 0x28d   : > { %v2091_v34 = vpop.f32.mrf.mxu2  ;;  %3051 = vmatpush.bf16.msrb.mxu0 %v2998_v18 }
 0x28e   : > { %v9320_v30 = vadd.f32 %v2091_v34, %v9119_v11  ;;  %v2053_v48 = vpop.f32.mrf.mxu0  ;;  %v2073_v57 = vpop.f32.mrf.mxu1  ;;  %v2971_v11 = vsel %vm2966_vm15, %v9214_v12, %v9255_v7  ;;  %v2767_v34 = vld [vmem:[#allocation5 + $0x114] sm:$0xf] }
 0x28f   : > { %v2115_v17 = vadd.f32 %v2053_v48, %v9188_v46  ;;  %v9326_v50 = vadd.f32 %v2073_v57, %v9206_v33  ;;  %3029 = vmatpush.bf16.msra.mxu3 %v2971_v11  ;;  %3652 = vrot.lane.b32.xlu0 %v9098_v53, %s7580_s20  ;;  %v9347_v56 = vpop.permute.xlu0 %3165  ;;  %v2967_v57 = vsel %vm2966_vm15, %v9221_v13, %v9234_v29  ;;  %v2777_v11 = vunpack.c.l.b16 %v2767_v34 }
 0x290   : > { %3642 = vrot.lane.b32.xlu1 %v9056_v37, %s7580_s20 }
 0x291   : > { %6796 = vmatmul.msk.bf16.gmra.mxu0 %vm783_vm1, %v7263_v31 }
 0x292   : > { %6801 = vmatmul.msk.bf16.vlgmr.msrb.gmra.mxu2 %vm783_vm1, %v9247_v43  ;;  %v9349_v43 = vpop.permute.xlu1 %3155  ;;  %3648 = vrot.lane.b32.xlu2 %v8900_v62, %s7580_s20 }
 0x293   : > { %v2211_v46 = vpop.f32.mrf.mxu3  ;;  %3030 = vmatpush.bf16.msra.mxu3 %v2968_v55 }
 0x294   : > { %v9343_v33 = vadd.f32 %v2211_v46, %v2112_v61  ;;  %v2992_v61 = vsel %vm793_vm0, %v2973_v35, 0  ;;  %v9365_v23 = vpop.permute.xlu2 %3157  ;;  %v9396_v46 = vpack.c.b16 %v2777_v11, %v2777_v11 }
 0x295   : > { %v2094_v9 = vpop.f32.mrf.mxu2  ;;  %3005 = vmatpush.bf16.msra.mxu2 %v2992_v61 }
 0x296   : > { %v9355_v45 = vadd.f32 %v2094_v9, %v9149_v2  ;;  %v2055_v38 = vpop.f32.mrf.mxu0  ;;  %v2076_v1 = vpop.f32.mrf.mxu1  ;;  %v2616_v2 = vunpack.c.l.b16 %v2606_v49 }
 0x297   : > { %v9361_v20 = vadd.f32 %v2076_v1, %v9226_v5  ;;  %3815 = vrot.lane.b32.xlu0 %v8876_v58, %s7581_s17 }
 0x298   : > { %6813 = vmatmul.msk.bf16.gmra.mxu3 %vm783_vm1, %v9345_v8  ;;  %3817 = vrot.lane.b32.xlu1 %v8878_v27, %s7581_s17  ;;  %v2619_v63 = vpack.c.b16 %v2616_v2, %v2616_v2 }
 0x299   : > { %6799 = vmatmul.msk.bf16.gmra.mxu1 %vm783_vm1, %v7263_v31  ;;  %3006 = vmatpush.bf16.msra.mxu2 %v2970_v54  ;;  %v9375_v16 = vpop.permute.xlu0 %3175 }
 0x29a   : > { %v9379_v42 = vpop.permute.xlu1 %3167  ;;  %3640 = vrot.lane.b32.xlu2 %v9028_v24, %s7580_s20 }
 0x29b   : > { %v2214_v18 = vpop.f32.mrf.mxu3 }
 0x29c   : > { %v9373_v5 = vadd.f32 %v2214_v18, %v2115_v17  ;;  %v9390_v35 = vpop.permute.xlu2 %3159 }
 0x29d   : > { %v2096_v0 = vpop.f32.mrf.mxu2  ;;  %3007 = vmatpush.bf16.msra.mxu2 %v2967_v57 }
 0x29e   : > { %v9382_v10 = vadd.f32 %v2096_v0, %v9178_v25  ;;  %v2078_v12 = vpop.f32.mrf.mxu1  ;;  %v2227_v48 = vpop.f32.mrf.mxu0 }
 0x29f   : > { %v2265_v17 = vadd.f32 %v2227_v48, %v9232_v60  ;;  %3809 = vrot.lane.b32.xlu0 %v8900_v62, %s7581_s17 }
 0x2a0   : > { %3799 = vrot.lane.b32.xlu1 %v8905_v14, %s7581_s17 }
 0x2a1   : > { %6797 = vmatmul.msk.bf16.gmra.mxu0 %vm783_vm1, %v2619_v63  ;;  %v9398_v13 = vpop.permute.xlu0 %3332 }
 0x2a2   : > { %6802 = vmatmul.msk.bf16.gmra.mxu2 %vm783_vm1, %v7263_v31  ;;  %v9402_v29 = vpop.permute.xlu1 %3334  ;;  %3650 = vrot.lane.b32.xlu2 %v8942_v59, %s7580_s20 }
 0x2a3   : > { %v2216_v25 = vpop.f32.mrf.mxu3 }
 0x2a4   : > { %v9415_v49 = vpop.permute.xlu2 %3324 }
 0x2a5   : > { %v2099_v60 = vpop.f32.mrf.mxu2 }
 0x2a6   : > { %v9405_v9 = vadd.f32 %v2099_v60, %v9203_v3  ;;  %v2229_v55 = vpop.f32.mrf.mxu0  ;;  %v2250_v38 = vpop.f32.mrf.mxu1 }
 0x2a7   : > { %v2268_v31 = vadd.f32 %v2229_v55, %v9253_v6  ;;  %v9411_v1 = vadd.f32 %v2250_v38, %v9281_v41  ;;  %3819 = vrot.lane.b32.xlu0 %v8940_v28, %s7581_s17  ;;  %v2972_v55 = vsel %vm2966_vm15, %v9255_v7, %v9266_v40  ;;  %v3186_v40 = vsel %vm3179_vm3, %v9314_v44, %v9316_v19 }
 0x2a8   : > { %6814 = vmatmul.msk.bf16.gmra.mxu3 %vm783_vm1, %v9396_v46  ;;  %3811 = vrot.lane.b32.xlu1 %v8942_v59, %s7581_s17 }
 0x2a9   : > { %6800 = vmatmul.msk.bf16.gmra.mxu1 %vm783_vm1, %v2619_v63  ;;  %v9422_v2 = vpop.permute.xlu0 %3326  ;;  %3052 = vmatpush.bf16.msrb.mxu0 %v2972_v55 }
 0x2aa   : > { %v9426_v41 = vpop.permute.xlu1 %3316  ;;  %3644 = vrot.lane.b32.xlu2 %v9103_v22, %s7580_s20 }
 0x2ab   : > { %v2388_v61 = vpop.f32.mrf.mxu3 }
 0x2ac   : > { %v9420_v3 = vadd.f32 %v2388_v61, %v2265_v17  ;;  %v9434_v12 = vpop.permute.xlu2 %3318  ;;  %v9443_v17 = vld [vmem:[#allocation5 + $0x118] sm:$0xff] }
 0x2ad   : > { %v2101_v6 = vpop.f32.mrf.mxu2 }
 0x2ae   : > { %v2232_v54 = vpop.f32.mrf.mxu0  ;;  %v2252_v18 = vpop.f32.mrf.mxu1 }
 0x2af   : > { %v2271_v0 = vadd.f32 %v2232_v54, %v9287_v47  ;;  %v9432_v34 = vadd.f32 %v2252_v18, %v9320_v30  ;;  %3976 = vrot.lane.b32.xlu0 %v8876_v58, %s7582_s19  ;;  %v2969_v18 = vsel %vm2966_vm15, %v9268_v4, %v9290_v51  ;;  %v3187_v51 = vsel %vm3179_vm3, %v9316_v19, %v9375_v16 }
 0x2b0   : > { %3978 = vrot.lane.b32.xlu1 %v8878_v27, %s7582_s19  ;;  %3053 = vmatpush.bf16.msrb.mxu0 %v2969_v18  ;;  %vm4628_vm15 = vcmask 457728  }
 0x2b1   : > { %6815 = vmatmul.msk.bf16.vlgmr.msra.gmra.mxu0 %vm783_vm1, %v9278_v39  ;;  %v9445_v47 = vpop.permute.xlu0 %3336 }
 0x2b2   : > { %6803 = vmatmul.msk.bf16.gmra.mxu2 %vm783_vm1, %v2619_v63  ;;  %v9449_v11 = vpop.permute.xlu1 %3328  ;;  %3807 = vrot.lane.b32.xlu2 %v8993_v15, %s7581_s17 }
 0x2b3   : > { %v2390_v48 = vpop.f32.mrf.mxu3 }
 0x2b4   : > { %v9441_v57 = vadd.f32 %v2390_v48, %v2268_v31 }
 0x2b5   : > { %v2365_v30 = vpop.f32.mrf.mxu2 }
 0x2b6   : > { %v9452_v63 = vadd.f32 %v2365_v30, %v9245_v52  ;;  %v2234_v25 = vpop.f32.mrf.mxu0  ;;  %v2255_v60 = vpop.f32.mrf.mxu1 }
 0x2b7   : > { %v2274_v38 = vadd.f32 %v2234_v25, %v9326_v50  ;;  %v9461_v31 = vadd.f32 %v2255_v60, %v9355_v45  ;;  %v3178_v52 = vpop.permute.xlu2 %3177  ;;  %3970 = vrot.lane.b32.xlu0 %v8900_v62, %s7582_s19 }
 0x2b8   : > { %6832 = vmatmul.msk.bf16.vlgmr.msra.gmra.mxu3 %vm783_vm1, %v9443_v17  ;;  %v3188_v61 = vsel %vm3179_vm3, %v9375_v16, %v3178_v52  ;;  %3960 = vrot.lane.b32.xlu1 %v8905_v14, %s7582_s19  ;;  %v9510_v52 = vld [vmem:[#allocation5 + $0x120] sm:$0xff] }
 0x2b9   : > { %6818 = vmatmul.msk.bf16.vlgmr.msra.gmra.mxu1 %vm783_vm1, %v9278_v39  ;;  %v3211_v7 = vsel %vm793_vm0, %v3188_v61, 0  ;;  %v9477_v6 = vpop.permute.xlu0 %3320 }
 0x2ba   : > { %3264 = vmatpush.bf16.msrb.mxu3 %v3211_v7  ;;  %v3339_v54 = vpop.permute.xlu1 %3338  ;;  %3801 = vrot.lane.b32.xlu2 %v9028_v24, %s7581_s17 }
 0x2bb   : > { %v2393_v50 = vpop.f32.mrf.mxu3 }
 0x2bc   : > { %v9475_v45 = vadd.f32 %v2393_v50, %v2271_v0  ;;  %v3205_v0 = vsel %vm793_vm0, %v3186_v40, 0 }
 0x2bd   : > { %v2367_v39 = vpop.f32.mrf.mxu2  ;;  %3218 = vmatpush.bf16.msrb.mxu1 %v3205_v0  ;;  %v2928_v0 = vld [vmem:[#allocation5 + $0x128] sm:$0xf] }
 0x2be   : > { %v9485_v44 = vadd.f32 %v2367_v39, %v9276_v21  ;;  %v2237_v48 = vpop.f32.mrf.mxu0  ;;  %v2257_v30 = vpop.f32.mrf.mxu1  ;;  %v3183_v21 = vsel %vm3179_vm3, %v9328_v36, %v9347_v56  ;;  %v3208_v39 = vsel %vm793_vm0, %v3187_v51, 0 }
 0x2bf   : > { %v2277_v25 = vadd.f32 %v2237_v48, %v9361_v20  ;;  %v9492_v60 = vadd.f32 %v2257_v30, %v9382_v10  ;;  %v3170_v55 = vpop.permute.xlu2 %3169  ;;  %3980 = vrot.lane.b32.xlu0 %v8940_v28, %s7582_s19  ;;  %3241 = vmatpush.bf16.msrb.mxu2 %v3208_v39  ;;  %v3349_v48 = vsel %vm3340_vm4, %v9445_v47, %v3339_v54 }
 0x2c0   : > { %v3185_v4 = vsel %vm3179_vm3, %v9379_v42, %v3170_v55  ;;  %3972 = vrot.lane.b32.xlu1 %v8942_v59, %s7582_s19  ;;  %v3372_v54 = vsel %vm793_vm0, %v3349_v48, 0 }
 0x2c1   : > { %6816 = vmatmul.msk.bf16.gmra.mxu0 %vm783_vm1, %v9345_v8  ;;  %3265 = vmatpush.bf16.msrb.mxu3 %v3185_v4  ;;  %v9512_v61 = vpop.permute.xlu0 %3330 }
 0x2c2   : > { %6829 = vmatmul.msk.bf16.vlgmr.msra.gmra.mxu2 %vm783_vm1, %v9443_v17  ;;  %3219 = vmatpush.bf16.msrb.mxu1 %v3183_v21  ;;  %v3162_v36 = vpop.permute.xlu1 %3161  ;;  %v2938_v21 = vunpack.c.l.b16 %v2928_v0 }
 0x2c3   : > { %v2395_v20 = vpop.f32.mrf.mxu3  ;;  %v3182_v50 = vsel %vm3179_vm3, %v9390_v35, %v3162_v36  ;;  %3803 = vrot.lane.b32.xlu2 %v9056_v37, %s7581_s17 }
 0x2c4   : > { %v9508_v10 = vadd.f32 %v2395_v20, %v2274_v38  ;;  %v3180_v38 = vsel %vm3179_vm3, %v9349_v43, %v9365_v23 }
 0x2c5   : > { %v2370_v7 = vpop.f32.mrf.mxu2  ;;  %3266 = vmatpush.bf16.msrb.mxu3 %v3182_v50 }
 0x2c6   : > { %v9517_v40 = vadd.f32 %v2370_v7, %v9312_v26  ;;  %v2239_v19 = vpop.f32.mrf.mxu0  ;;  %v2260_v16 = vpop.f32.mrf.mxu1  ;;  %3220 = vmatpush.bf16.msrb.mxu1 %v3180_v38  ;;  %v3184_v26 = vsel %vm3179_vm3, %v9347_v56, %v9379_v42 }
 0x2c7   : > { %v9528_v18 = vadd.f32 %v2260_v16, %v9405_v9  ;;  %3964 = vrot.lane.b32.xlu0 %v9056_v37, %s7582_s19  ;;  %3242 = vmatpush.bf16.msrb.mxu2 %v3184_v26 }
 0x2c8   : > { %6833 = vmatmul.msk.bf16.gmra.mxu3 %vm783_vm1, %v9510_v52  ;;  %3982 = vrot.lane.b32.xlu1 %v9070_v32, %s7582_s19 }
 0x2c9   : > { %6819 = vmatmul.msk.bf16.gmra.mxu1 %vm783_vm1, %v9345_v8  ;;  %v9543_v30 = vpop.permute.xlu0 %3495 }
 0x2ca   : > { %v9584_v50 = vpop.permute.xlu1 %3497 }
 0x2cb   : > { %v2398_v43 = vpop.f32.mrf.mxu3  ;;  %3968 = vrot.lane.b32.xlu2 %v8993_v15, %s7582_s19 }
 0x2cc   : > { %v9541_v9 = vadd.f32 %v2398_v43, %v2277_v25  ;;  %v3181_v25 = vsel %vm3179_vm3, %v9365_v23, %v9390_v35  ;;  %v9565_v23 = vpack.c.b16 %v2938_v21, %v2938_v21  ;;  %vm4948_vm3 = vcmask 1042432  }
 0x2cd   : > { %v2372_v8 = vpop.f32.mrf.mxu2  ;;  %3243 = vmatpush.bf16.msrb.mxu2 %v3181_v25 }
 0x2ce   : > { %v9548_v56 = vadd.f32 %v2372_v8, %v9343_v33  ;;  %v2262_v42 = vpop.f32.mrf.mxu1  ;;  %v2411_v55 = vpop.f32.mrf.mxu0 }
 0x2cf   : > { %v2427_v4 = vadd.f32 %v2411_v55, %v9411_v1  ;;  %v9561_v33 = vpop.permute.xlu2 %3322  ;;  %3974 = vrot.lane.b32.xlu0 %v9098_v53, %s7582_s19 }
 0x2d0   : > { %3805 = vrot.lane.b32.xlu1 %v9103_v22, %s7581_s17 }
 0x2d1   : > { %6817 = vmatmul.msk.bf16.gmra.mxu0 %vm783_vm1, %v9396_v46  ;;  %3425 = vmatpush.bf16.msra.mxu2 %v3372_v54  ;;  %v9567_v35 = vpop.permute.xlu0 %3489 }
 0x2d2   : > { %6830 = vmatmul.msk.bf16.gmra.mxu2 %vm783_vm1, %v9510_v52  ;;  %v9612_v55 = vpop.permute.xlu1 %3479 }
 0x2d3   : > { %v2400_v51 = vpop.f32.mrf.mxu3  ;;  %3962 = vrot.lane.b32.xlu2 %v9028_v24, %s7582_s19 }
 0x2d5   : > { %v2375_v1 = vpop.f32.mrf.mxu2 }
 0x2d6   : > { %v9572_v20 = vadd.f32 %v2375_v1, %v9373_v5  ;;  %v2413_v7 = vpop.f32.mrf.mxu0  ;;  %v2526_v36 = vpop.f32.mrf.mxu1 }
 0x2d7   : > { %v2430_v19 = vadd.f32 %v2413_v7, %v9432_v34  ;;  %v9578_v16 = vadd.f32 %v2526_v36, %v9452_v63  ;;  %v9586_v5 = vpop.permute.xlu2 %3487  ;;  %4139 = vrot.lane.b32.xlu0 %v8878_v27, %s7583_s22 }
 0x2d8   : > { %6834 = vmatmul.msk.bf16.gmra.mxu3 %vm783_vm1, %v9565_v23  ;;  %4141 = vrot.lane.b32.xlu1 %v8940_v28, %s7583_s22 }
 0x2d9   : > { %6820 = vmatmul.msk.bf16.gmra.mxu1 %vm783_vm1, %v9396_v46  ;;  %v9592_v34 = vpop.permute.xlu0 %3499  ;;  %v3347_v46 = vsel %vm3340_vm4, %v9398_v13, %v9402_v29  ;;  %v3348_v13 = vsel %vm3340_vm4, %v9402_v29, %v9445_v47  ;;  %v3344_v29 = vsel %vm3340_vm4, %v9415_v49, %v9422_v2  ;;  %v3345_v49 = vsel %vm3340_vm4, %v9422_v2, %v9449_v11 }
 0x2da   : > { %v3366_v42 = vsel %vm793_vm0, %v3347_v46, 0  ;;  %v3369_v47 = vsel %vm793_vm0, %v3348_v13, 0  ;;  %v9643_v36 = vpop.permute.xlu1 %3491 }
 0x2db   : > { %v2572_v38 = vpop.f32.mrf.mxu3  ;;  %3821 = vrot.lane.b32.xlu2 %v9070_v32, %s7581_s17  ;;  %3379 = vmatpush.bf16.msra.mxu0 %v3366_v42  ;;  %v3341_v42 = vsel %vm3340_vm4, %v9426_v41, %v9434_v12 }
 0x2dc   : > { %v9590_v39 = vadd.f32 %v2572_v38, %v2427_v4  ;;  %3402 = vmatpush.bf16.msra.mxu1 %v3369_v47 }
 0x2dd   : > { %v2377_v63 = vpop.f32.mrf.mxu2 }
 0x2de   : > { %v2416_v26 = vpop.f32.mrf.mxu0  ;;  %v2528_v43 = vpop.f32.mrf.mxu1 }
 0x2df   : > { %v2433_v48 = vadd.f32 %v2416_v26, %v9461_v31  ;;  %v9603_v8 = vadd.f32 %v2528_v43, %v9485_v44  ;;  %v9609_v0 = vpop.permute.xlu2 %3481  ;;  %4133 = vrot.lane.b32.xlu0 %v8942_v59, %s7583_s22  ;;  %3380 = vmatpush.bf16.msra.mxu0 %v3344_v29 }
 0x2e0   : > { %4123 = vrot.lane.b32.xlu1 %v9028_v24, %s7583_s22  ;;  %3403 = vmatpush.bf16.msra.mxu1 %v3345_v49 }
 0x2e1   : > { %6835 = vmatmul.msk.bf16.vlgmr.msrb.gmra.mxu0 %vm783_vm1, %v9443_v17  ;;  %v7268_v17 = vld [vmem:[#allocation5 + $0x12c] sm:$0xff]  ;;  %v9621_v54 = vpop.permute.xlu0 %3483 }
 0x2e2   : > { %6831 = vmatmul.msk.bf16.gmra.mxu2 %vm783_vm1, %v9565_v23 }
 0x2e3   : > { %v2574_v31 = vpop.f32.mrf.mxu3  ;;  %3813 = vrot.lane.b32.xlu2 %v9098_v53, %s7581_s17  ;;  %3381 = vmatpush.bf16.msra.mxu0 %v3341_v42 }
 0x2e4   : > { %v9619_v44 = vadd.f32 %v2574_v31, %v2430_v19 }
 0x2e5   : > { %v2549_v25 = vpop.f32.mrf.mxu2 }
 0x2e6   : > { %v9626_v4 = vadd.f32 %v2549_v25, %v9420_v3  ;;  %v2418_v21 = vpop.f32.mrf.mxu0  ;;  %v2531_v51 = vpop.f32.mrf.mxu1 }
 0x2e7   : > { %v2436_v1 = vadd.f32 %v2418_v21, %v9492_v60  ;;  %v9636_v7 = vadd.f32 %v2531_v51, %v9517_v40  ;;  %v3494_v3 = vpop.permute.xlu2 %3493  ;;  %4143 = vrot.lane.b32.xlu0 %v9070_v32, %s7583_s22 }
 0x2e8   : > { %6884 = vmatmul.msk.bf16.vlgmr.msrb.gmra.mxu3 %vm783_vm1, %v7268_v17  ;;  %v3508_v60 = vsel %vm3501_vm5, %v3494_v3, %v9543_v30  ;;  %4135 = vrot.lane.b32.xlu1 %v9098_v53, %s7583_s22 }
 0x2e9   : > { %6878 = vmatmul.msk.bf16.vlgmr.msrb.gmra.mxu1 %vm783_vm1, %v7268_v17  ;;  %v3527_v38 = vsel %vm793_vm0, %v3508_v60, 0  ;;  %v3486_v63 = vpop.permute.xlu0 %3485  ;;  %v3089_v60 = vld [vmem:[#allocation5 + $0x13c] sm:$0xf] }
 0x2ea   : > { %3540 = vmatpush.bf16.msra.mxu3 %v3527_v38  ;;  %v3505_v41 = vsel %vm3501_vm5, %v3486_v63, %v9586_v5 }
 0x2eb   : > { %v2577_v19 = vpop.f32.mrf.mxu3  ;;  %3966 = vrot.lane.b32.xlu2 %v9103_v22, %s7582_s19  ;;  %s11293_s19 = sld [smem:[#allocation20_spill]] }
 0x2ec   : > { %v9649_v40 = vadd.f32 %v2577_v19, %v2433_v48  ;;  %v3342_v48 = vsel %vm3340_vm4, %v9434_v12, %v9477_v6  ;;  %v9674_v12 = vpop.permute.xlu1 %3654 }
 0x2ed   : > { %v2551_v2 = vpop.f32.mrf.mxu2  ;;  %3404 = vmatpush.bf16.msra.mxu1 %v3342_v48 }
 0x2ee   : > { %v9655_v26 = vadd.f32 %v2551_v2, %v9441_v57  ;;  %v2421_v43 = vpop.f32.mrf.mxu0  ;;  %v2533_v46 = vpop.f32.mrf.mxu1  ;;  %3541 = vmatpush.bf16.msra.mxu3 %v3505_v41 }
 0x2ef   : > { %v2439_v13 = vadd.f32 %v2421_v43, %v9528_v18  ;;  %v9667_v31 = vadd.f32 %v2533_v46, %v9548_v56  ;;  %4127 = vrot.lane.b32.xlu0 %v9103_v22, %s7583_s22  ;;  %v7269_v56 = vld [vmem:[#allocation5 + $0x134] sm:$0xff]  ;;  %v3109_v46 = vunpack.c.l.b16 %v3089_v60  ;;  %v3510_v60 = vsel %vm3501_vm5, %v9584_v50, %v9592_v34 }
 0x2f0   : > { %4298 = vrot.lane.b32.xlu1 %v8876_v58, %s7584_s14  ;;  %v9778_v34 = vld [vmem:[#allocation5 + $0x154] sm:$0xff] }
 0x2f1   : > { %6836 = vmatmul.msk.bf16.gmra.mxu0 %vm783_vm1, %v9510_v52  ;;  %v3478_v25 = vpop.permute.xlu0 %3477 }
 0x2f2   : > { %6881 = vmatmul.msk.bf16.vlgmr.msrb.gmra.mxu2 %vm783_vm1, %v7268_v17  ;;  %v3502_v21 = vsel %vm3501_vm5, %v3478_v25, %v9612_v55 }
 0x2f3   : > { %v2579_v57 = vpop.f32.mrf.mxu3  ;;  %3542 = vmatpush.bf16.msra.mxu3 %v3502_v21  ;;  %4131 = vrot.lane.b32.xlu2 %v8900_v62, %s7583_s22  ;;  %v9749_v21 = vld [vmem:[#allocation5 + $0x140] sm:$0xff] }
 0x2f4   : > { %v9678_v18 = vadd.f32 %v2579_v57, %v2436_v1  ;;  %v9692_v1 = vpop.permute.xlu2 %3656  ;;  %v9699_v49 = vpop.permute.xlu1 %3646 }
 0x2f5   : > { %v2554_v52 = vpop.f32.mrf.mxu2 }
 0x2f6   : > { %v9685_v17 = vadd.f32 %v2554_v52, %v9475_v45  ;;  %v2423_v51 = vpop.f32.mrf.mxu0  ;;  %v2536_v29 = vpop.f32.mrf.mxu1  ;;  %v3346_v45 = vsel %vm3340_vm4, %v9449_v11, %v9512_v61  ;;  %v3343_v11 = vsel %vm3340_vm4, %v9477_v6, %v9561_v33  ;;  %v3112_v6 = vpack.c.b16 %v3109_v46, %v3109_v46 }
 0x2f7   : > { %v9690_v47 = vadd.f32 %v2536_v29, %v9572_v20  ;;  %3426 = vmatpush.bf16.msra.mxu2 %v3346_v45  ;;  %4129 = vrot.lane.b32.xlu0 %v8993_v15, %s7583_s22  ;;  %v3509_v52 = vsel %vm3501_vm5, %v9543_v30, %v9584_v50  ;;  %vm652_vm4 = vcmask 199680  }
 0x2f8   : > { %6885 = vmatmul.msk.bf16.gmra.mxu3 %vm783_vm1, %v7269_v56  ;;  %4290 = vrot.lane.b32.xlu1 %v8993_v15, %s7584_s14  ;;  %v3530_v30 = vsel %vm793_vm0, %v3509_v52, 0 }
 0x2f9   : > { %6879 = vmatmul.msk.bf16.gmra.mxu1 %vm783_vm1, %v7269_v56  ;;  %3563 = vmatpush.bf16.msrb.mxu0 %v3530_v30 }
 0x2fb   : > { %v2582_v3 = vpop.f32.mrf.mxu3  ;;  %4125 = vrot.lane.b32.xlu2 %v9056_v37, %s7583_s22  ;;  %3427 = vmatpush.bf16.msra.mxu2 %v3343_v11  ;;  %v3533_v11 = vsel %vm793_vm0, %v3510_v60, 0 }
 0x2fc   : > { %v9703_v19 = vadd.f32 %v2582_v3, %v2439_v13  ;;  %v9716_v43 = vpop.permute.xlu2 %3648  ;;  %3586 = vmatpush.bf16.msrb.mxu1 %v3533_v11  ;;  %v9849_v11 = vld [vmem:[#allocation5 + $0x15c] sm:$0xff] }
 0x2fd   : > { %v2556_v20 = vpop.f32.mrf.mxu2 }
 0x2fe   : > { %v9708_v38 = vadd.f32 %v2556_v20, %v9508_v10  ;;  %v2538_v63 = vpop.f32.mrf.mxu1  ;;  %v2687_v2 = vpop.f32.mrf.mxu0 }
 0x2ff   : > { %v2747_v61 = vadd.f32 %v2687_v2, %v9578_v16  ;;  %v9721_v10 = vpop.permute.xlu1 %3638  ;;  %4121 = vrot.lane.b32.xlu0 %v8905_v14, %s7583_s22  ;;  %v3506_v2 = vsel %vm3501_vm5, %v9586_v5, %v9567_v35 }
 0x300   : > { %4282 = vrot.lane.b32.xlu1 %v8905_v14, %s7584_s14  ;;  %3564 = vmatpush.bf16.msrb.mxu0 %v3506_v2 }
 0x301   : > { %6837 = vmatmul.msk.bf16.gmra.mxu0 %vm783_vm1, %v9565_v23 }
 0x302   : > { %6882 = vmatmul.msk.bf16.gmra.mxu2 %vm783_vm1, %v7269_v56  ;;  %v3659_v56 = vpop.permute.xlu0 %3658 }
 0x303   : > { %v2584_v42 = vpop.f32.mrf.mxu3  ;;  %4137 = vrot.lane.b32.xlu2 %v8876_v58, %s7583_s22  ;;  %s7588_s22 = smov 25  }
 0x304   : > { %v9736_v57 = vpop.permute.xlu2 %3640 }
 0x305   : > { %v2559_v33 = vpop.f32.mrf.mxu2 }
 0x306   : > { %v9728_v16 = vadd.f32 %v2559_v33, %v9541_v9  ;;  %v2689_v48 = vpop.f32.mrf.mxu0  ;;  %v2710_v13 = vpop.f32.mrf.mxu1 }
 0x307   : > { %v2750_v23 = vadd.f32 %v2689_v48, %v9603_v8  ;;  %v9734_v41 = vadd.f32 %v2710_v13, %v9626_v4  ;;  %v3661_v25 = vpop.permute.xlu1 %3660  ;;  %4302 = vrot.lane.b32.xlu0 %v8940_v28, %s7584_s14 }
 0x308   : > { %6886 = vmatmul.msk.bf16.gmra.mxu3 %vm783_vm1, %v3112_v6  ;;  %4304 = vrot.lane.b32.xlu1 %v9070_v32, %s7584_s14  ;;  %v3671_v48 = vsel %vm3662_vm8, %v3659_v56, %v3661_v25 }
 0x309   : > { %6880 = vmatmul.msk.bf16.gmra.mxu1 %vm783_vm1, %v3112_v6 }
 0x30a   : > { %v9766_v63 = vpop.permute.xlu0 %3652 }
 0x30b   : > { %v2848_v9 = vpop.f32.mrf.mxu3  ;;  %4300 = vrot.lane.b32.xlu2 %v8878_v27, %s7584_s14 }
 0x30c   : > { %v9745_v8 = vadd.f32 %v2848_v9, %v2747_v61  ;;  %v9757_v20 = vpop.permute.xlu2 %3650 }
 0x30d   : > { %v2561_v4 = vpop.f32.mrf.mxu2 }
 0x30e   : > { %v2692_v51 = vpop.f32.mrf.mxu0  ;;  %v2712_v29 = vpop.f32.mrf.mxu1  ;;  %v7279_v4 = vld [vmem:[#allocation5 + $0x148] sm:$0xff] }
 0x30f   : > { %v2753_v45 = vadd.f32 %v2692_v51, %v9636_v7  ;;  %v9755_v3 = vadd.f32 %v2712_v29, %v9655_v26  ;;  %v9768_v7 = vpop.permute.xlu1 %3642  ;;  %4296 = vrot.lane.b32.xlu0 %v9098_v53, %s7584_s14 }
 0x310   : > { %4286 = vrot.lane.b32.xlu1 %v9056_v37, %s7584_s14 }
 0x311   : > { %6895 = vmatmul.msk.bf16.vlgmr.msra.gmra.mxu0 %vm783_vm1, %v9749_v21 }
 0x312   : > { %6883 = vmatmul.msk.bf16.gmra.mxu2 %vm783_vm1, %v3112_v6 }
 0x313   : > { %v2850_v26 = vpop.f32.mrf.mxu3  ;;  %4292 = vrot.lane.b32.xlu2 %v8900_v62, %s7584_s14 }
 0x314   : > { %v9776_v50 = vadd.f32 %v2850_v26, %v2750_v23  ;;  %v9792_v13 = vpop.permute.xlu2 %3644  ;;  %v9804_v23 = vpop.permute.xlu0 %3815 }
 0x315   : > { %v2733_v61 = vpop.f32.mrf.mxu2 }
 0x316   : > { %v9783_v46 = vadd.f32 %v2733_v61, %v9590_v39  ;;  %v2694_v42 = vpop.f32.mrf.mxu0  ;;  %v2715_v5 = vpop.f32.mrf.mxu1  ;;  %v3507_v39 = vsel %vm3501_vm5, %v9567_v35, %v9643_v36  ;;  %v3503_v35 = vsel %vm3501_vm5, %v9612_v55, %v9609_v0  ;;  %v3504_v36 = vsel %vm3501_vm5, %v9609_v0, %v9621_v54 }
 0x317   : > { %v2756_v6 = vadd.f32 %v2694_v42, %v9667_v31  ;;  %v9789_v33 = vadd.f32 %v2715_v5, %v9685_v17  ;;  %3587 = vmatpush.bf16.msrb.mxu1 %v3507_v39  ;;  %v3670_v31 = vsel %vm3662_vm8, %v9692_v1, %v3659_v56  ;;  %v3694_v17 = vsel %vm793_vm0, %v3671_v48, 0  ;;  %v9806_v25 = vpop.permute.xlu1 %3817  ;;  %4459 = vrot.lane.b32.xlu0 %v8876_v58, %s7585_s18  ;;  %v3302_v5 = vld [vmem:[#allocation5 + $0x150] sm:$0xf] }
 0x318   : > { %6912 = vmatmul.msk.bf16.vlgmr.msra.gmra.mxu3 %vm783_vm1, %v9778_v34  ;;  %3565 = vmatpush.bf16.msrb.mxu0 %v3503_v35  ;;  %v3691_v51 = vsel %vm793_vm0, %v3670_v31, 0  ;;  %v3666_v31 = vsel %vm3662_vm8, %v9699_v49, %v9716_v43  ;;  %vm657_vm5 = vcmask 453832  }
 0x319   : > { %6898 = vmatmul.msk.bf16.vlgmr.msra.gmra.mxu1 %vm783_vm1, %v9749_v21  ;;  %4461 = vrot.lane.b32.xlu1 %v8878_v27, %s7585_s18 }
 0x31a   : > { %3724 = vmatpush.bf16.msrb.mxu3 %v3691_v51  ;;  %v3463_v51 = vld [vmem:[#allocation5 + $0x164] sm:$0xf] }
 0x31b   : > { %v2853_v9 = vpop.f32.mrf.mxu3  ;;  %3588 = vmatpush.bf16.msrb.mxu1 %v3504_v36  ;;  %4284 = vrot.lane.b32.xlu2 %v9028_v24, %s7584_s14 }
 0x31c   : > { %v9816_v56 = vadd.f32 %v2853_v9, %v2753_v45  ;;  %3747 = vmatpush.bf16.msra.mxu0 %v3694_v17  ;;  %v9830_v30 = vpop.permute.xlu2 %3807  ;;  %v9838_v60 = vpop.permute.xlu0 %3809 }
 0x31d   : > { %v2735_v52 = vpop.f32.mrf.mxu2 }
 0x31e   : > { %v9822_v55 = vadd.f32 %v2735_v52, %v9619_v44  ;;  %v2697_v0 = vpop.f32.mrf.mxu0  ;;  %v2717_v54 = vpop.f32.mrf.mxu1  ;;  %v3667_v44 = vsel %vm3662_vm8, %v9716_v43, %v9757_v20 }
 0x31f   : > { %v2759_v29 = vadd.f32 %v2697_v0, %v9690_v47  ;;  %v9828_v45 = vadd.f32 %v2717_v54, %v9708_v38  ;;  %3725 = vmatpush.bf16.msrb.mxu3 %v3667_v44  ;;  %v9840_v26 = vpop.permute.xlu1 %3799  ;;  %v3669_v47 = vsel %vm3662_vm8, %v9674_v12, %v9692_v1  ;;  %4453 = vrot.lane.b32.xlu0 %v8900_v62, %s7585_s18 }
 0x320   : > { %v3663_v54 = vsel %vm3662_vm8, %v9721_v10, %v9736_v57 }
 0x321   : > { %6896 = vmatmul.msk.bf16.gmra.mxu0 %vm783_vm1, %v7279_v4  ;;  %4443 = vrot.lane.b32.xlu1 %v8905_v14, %s7585_s18 }
 0x322   : > { %6901 = vmatmul.msk.bf16.vlgmr.msra.gmra.mxu2 %vm783_vm1, %v9749_v21  ;;  %v3664_v21 = vsel %vm3662_vm8, %v9736_v57, %v9768_v7 }
 0x323   : > { %v2855_v38 = vpop.f32.mrf.mxu3  ;;  %3726 = vmatpush.bf16.msrb.mxu3 %v3664_v21  ;;  %4294 = vrot.lane.b32.xlu2 %v8942_v59, %s7584_s14 }
 0x324   : > { %v9847_v2 = vadd.f32 %v2855_v38, %v2756_v6  ;;  %v3688_v6 = vsel %vm793_vm0, %v3669_v47, 0  ;;  %v9865_v39 = vpop.permute.xlu2 %3801  ;;  %v9873_v17 = vpop.permute.xlu0 %3819  ;;  %v3473_v47 = vunpack.c.l.b16 %v3463_v51 }
 0x325   : > { %v2738_v61 = vpop.f32.mrf.mxu2  ;;  %3701 = vmatpush.bf16.msrb.mxu2 %v3688_v6 }
 0x326   : > { %v9857_v42 = vadd.f32 %v2738_v61, %v9649_v40  ;;  %v2699_v12 = vpop.f32.mrf.mxu0  ;;  %v2720_v1 = vpop.f32.mrf.mxu1  ;;  %v3312_v40 = vunpack.c.l.b16 %v3302_v5  ;;  %v9902_v10 = vpack.c.b16 %v3473_v47, %v3473_v47 }
 0x327   : > { %v9863_v48 = vadd.f32 %v2720_v1, %v9728_v16  ;;  %v9875_v9 = vpop.permute.xlu1 %3811  ;;  %4463 = vrot.lane.b32.xlu0 %v8940_v28, %s7585_s18 }
 0x328   : > { %6913 = vmatmul.msk.bf16.gmra.mxu3 %vm783_vm1, %v9849_v11  ;;  %v3315_v52 = vpack.c.b16 %v3312_v40, %v3312_v40 }
 0x329   : > { %6899 = vmatmul.msk.bf16.gmra.mxu1 %vm783_vm1, %v7279_v4  ;;  %3702 = vmatpush.bf16.msrb.mxu2 %v3666_v31 }
 0x32a   : > { %4455 = vrot.lane.b32.xlu1 %v8942_v59, %s7585_s18 }
 0x32b   : > { %v2858_v35 = vpop.f32.mrf.mxu3  ;;  %4288 = vrot.lane.b32.xlu2 %v9103_v22, %s7584_s14  ;;  %s7589_s14 = smov 127  }
 0x32c   : > { %v9879_v16 = vadd.f32 %v2858_v35, %v2759_v29  ;;  %v9892_v44 = vpop.permute.xlu2 %3803 }
 0x32d   : > { %v2740_v36 = vpop.f32.mrf.mxu2  ;;  %3703 = vmatpush.bf16.msrb.mxu2 %v3663_v54 }
 0x32e   : > { %v9884_v0 = vadd.f32 %v2740_v36, %v9678_v18  ;;  %v2722_v49 = vpop.f32.mrf.mxu1  ;;  %v2871_v43 = vpop.f32.mrf.mxu0 }
 0x32f   : > { %v2909_v29 = vadd.f32 %v2871_v43, %v9734_v41  ;;  %v9896_v18 = vpop.permute.xlu0 %3976  ;;  %v9898_v38 = vpop.permute.xlu1 %3978  ;;  %4620 = vrot.lane.b32.xlu0 %v8876_v58, %s7586_s30 }
 0x331   : > { %6897 = vmatmul.msk.bf16.gmra.mxu0 %vm783_vm1, %v3315_v52 }
 0x332   : > { %6902 = vmatmul.msk.bf16.gmra.mxu2 %vm783_vm1, %v7279_v4  ;;  %4622 = vrot.lane.b32.xlu1 %v8878_v27, %s7586_s30 }
 0x333   : > { %v2860_v61 = vpop.f32.mrf.mxu3  ;;  %4451 = vrot.lane.b32.xlu2 %v8993_v15, %s7585_s18 }
 0x334   : > { %v9915_v58 = vpop.permute.xlu2 %3968 }
 0x335   : > { %v2743_v41 = vpop.f32.mrf.mxu2 }
 0x336   : > { %v9907_v57 = vadd.f32 %v2743_v41, %v9703_v19  ;;  %v2873_v21 = vpop.f32.mrf.mxu0  ;;  %v2894_v4 = vpop.f32.mrf.mxu1 }
 0x337   : > { %v2912_v12 = vadd.f32 %v2873_v21, %v9755_v3  ;;  %v9913_v1 = vadd.f32 %v2894_v4, %v9783_v46  ;;  %v9920_v27 = vpop.permute.xlu0 %3970  ;;  %v9922_v19 = vpop.permute.xlu1 %3960  ;;  %4614 = vrot.lane.b32.xlu0 %v8900_v62, %s7586_s30 }
 0x338   : > { %6914 = vmatmul.msk.bf16.gmra.mxu3 %vm783_vm1, %v9902_v10 }
 0x339   : > { %6900 = vmatmul.msk.bf16.gmra.mxu1 %vm783_vm1, %v3315_v52 }
 0x33a   : > { %4604 = vrot.lane.b32.xlu1 %v8905_v14, %s7586_s30 }
 0x33b   : > { %v3032_v5 = vpop.f32.mrf.mxu3  ;;  %4445 = vrot.lane.b32.xlu2 %v9028_v24, %s7585_s18 }
 0x33c   : > { %v9926_v6 = vadd.f32 %v3032_v5, %v2909_v29  ;;  %v9936_v36 = vpop.permute.xlu2 %3962  ;;  %v3668_v29 = vsel %vm3662_vm8, %v9757_v20, %v9766_v63 }
 0x33d   : > { %v2745_v3 = vpop.f32.mrf.mxu2  ;;  %3748 = vmatpush.bf16.msra.mxu0 %v3668_v29 }
 0x33e   : > { %v2876_v46 = vpop.f32.mrf.mxu0  ;;  %v2896_v40 = vpop.f32.mrf.mxu1 }
 0x33f   : > { %v2915_v31 = vadd.f32 %v2876_v46, %v9789_v33  ;;  %v9934_v35 = vadd.f32 %v2896_v40, %v9822_v55  ;;  %v9941_v62 = vpop.permute.xlu0 %3980  ;;  %v9943_v14 = vpop.permute.xlu1 %3972  ;;  %4624 = vrot.lane.b32.xlu0 %v8940_v28, %s7586_s30  ;;  %v9949_v33 = vld [vmem:[#allocation5 + $0x168] sm:$0xff] }
 0x341   : > { %6915 = vmatmul.msk.bf16.vlgmr.msrb.gmra.mxu0 %vm783_vm1, %v9778_v34 }
 0x342   : > { %6903 = vmatmul.msk.bf16.gmra.mxu2 %vm783_vm1, %v3315_v52  ;;  %4616 = vrot.lane.b32.xlu1 %v8942_v59, %s7586_s30 }
 0x343   : > { %v3034_v51 = vpop.f32.mrf.mxu3  ;;  %4447 = vrot.lane.b32.xlu2 %v9056_v37, %s7585_s18 }
 0x344   : > { %v9947_v49 = vadd.f32 %v3034_v51, %v2912_v12  ;;  %v3822_v61 = vpop.permute.xlu2 %3821 }
 0x345   : > { %v3009_v55 = vpop.f32.mrf.mxu2  ;;  %v3832_v59 = vsel %vm3823_vm9, %v9873_v17, %v3822_v61 }
 0x346   : > { %v9954_v43 = vadd.f32 %v3009_v55, %v9745_v8  ;;  %v2878_v52 = vpop.f32.mrf.mxu0  ;;  %v2899_v54 = vpop.f32.mrf.mxu1  ;;  %v3855_v8 = vsel %vm793_vm0, %v3832_v59, 0  ;;  %v3624_v59 = vld [vmem:[#allocation5 + $0x178] sm:$0xf] }
 0x347   : > { %v2918_v28 = vadd.f32 %v2878_v52, %v9828_v45  ;;  %v9963_v47 = vadd.f32 %v2899_v54, %v9857_v42  ;;  %v9972_v20 = vpop.permute.xlu0 %3964  ;;  %v3983_v63 = vpop.permute.xlu1 %3982  ;;  %3908 = vmatpush.bf16.msra.mxu3 %v3855_v8  ;;  %v3830_v45 = vsel %vm3823_vm9, %v9804_v23, %v9806_v25  ;;  %4608 = vrot.lane.b32.xlu0 %v9056_v37, %s7586_s30 }
 0x348   : > { %6932 = vmatmul.msk.bf16.vlgmr.msrb.gmra.mxu3 %vm783_vm1, %v9949_v33  ;;  %v3849_v23 = vsel %vm793_vm0, %v3830_v45, 0  ;;  %v3824_v52 = vsel %vm3823_vm9, %v9840_v26, %v9865_v39  ;;  %v3993_v26 = vsel %vm3984_vm10, %v9941_v62, %v3983_v63  ;;  %v3634_v63 = vunpack.c.l.b16 %v3624_v59 }
 0x349   : > { %6918 = vmatmul.msk.bf16.vlgmr.msrb.gmra.mxu1 %vm783_vm1, %v9778_v34  ;;  %v3665_v34 = vsel %vm3662_vm8, %v9768_v7, %v9792_v13  ;;  %v4016_v8 = vsel %vm793_vm0, %v3993_v26, 0  ;;  %vm5181_vm8 = vcmask 1043656  }
 0x34a   : > { %4626 = vrot.lane.b32.xlu1 %v9070_v32, %s7586_s30  ;;  %3749 = vmatpush.bf16.msra.mxu0 %v3665_v34 }
 0x34b   : > { %v3037_v42 = vpop.f32.mrf.mxu3  ;;  %4612 = vrot.lane.b32.xlu2 %v8993_v15, %s7586_s30  ;;  %3862 = vmatpush.bf16.msra.mxu1 %v3849_v23  ;;  %v3827_v15 = vsel %vm3823_vm9, %v9830_v30, %v9838_v60 }
 0x34c   : > { %v9979_v41 = vadd.f32 %v3037_v42, %v2915_v31  ;;  %v3814_v7 = vpop.permute.xlu2 %3813  ;;  %v10014_v31 = vld [vmem:[#allocation5 + $0x170] sm:$0xff] }
 0x34d   : > { %v3011_v21 = vpop.f32.mrf.mxu2 }
 0x34e   : > { %v9987_v4 = vadd.f32 %v3011_v21, %v9776_v50  ;;  %v2881_v12 = vpop.f32.mrf.mxu0  ;;  %v2901_v5 = vpop.f32.mrf.mxu1  ;;  %v3829_v50 = vsel %vm3823_vm9, %v9875_v9, %v3814_v7 }
 0x34f   : > { %v2921_v37 = vadd.f32 %v2881_v12, %v9863_v48  ;;  %v9994_v3 = vadd.f32 %v2901_v5, %v9884_v0  ;;  %3909 = vmatpush.bf16.msra.mxu3 %v3829_v50  ;;  %v10005_v13 = vpop.permute.xlu0 %3974  ;;  %v3806_v48 = vpop.permute.xlu1 %3805  ;;  %v3831_v0 = vsel %vm3823_vm9, %v9806_v25, %v9873_v17  ;;  %3863 = vmatpush.bf16.msra.mxu1 %v3827_v15 }
 0x350   : > { %4618 = vrot.lane.b32.xlu0 %v9098_v53, %s7586_s30  ;;  %v3826_v30 = vsel %vm3823_vm9, %v9892_v44, %v3806_v48  ;;  %v3852_v54 = vsel %vm793_vm0, %v3831_v0, 0 }
 0x351   : > { %6916 = vmatmul.msk.bf16.gmra.mxu0 %vm783_vm1, %v9849_v11  ;;  %3885 = vmatpush.bf16.msra.mxu2 %v3852_v54 }
 0x352   : > { %6929 = vmatmul.msk.bf16.vlgmr.msrb.gmra.mxu2 %vm783_vm1, %v9949_v33  ;;  %4449 = vrot.lane.b32.xlu1 %v9103_v22, %s7585_s18 }
 0x353   : > { %v3039_v46 = vpop.f32.mrf.mxu3  ;;  %3910 = vmatpush.bf16.msra.mxu3 %v3826_v30  ;;  %4606 = vrot.lane.b32.xlu2 %v9028_v24, %s7586_s30 }
 0x354   : > { %v10012_v40 = vadd.f32 %v3039_v46, %v2918_v28  ;;  %3864 = vmatpush.bf16.msra.mxu1 %v3824_v52 }
 0x355   : > { %v3014_v51 = vpop.f32.mrf.mxu2 }
 0x356   : > { %v10021_v55 = vadd.f32 %v3014_v51, %v9816_v56  ;;  %v2883_v25 = vpop.f32.mrf.mxu0  ;;  %v2904_v17 = vpop.f32.mrf.mxu1  ;;  %v3828_v56 = vsel %vm3823_vm9, %v9838_v60, %v9875_v9  ;;  %v3825_v60 = vsel %vm3823_vm9, %v9865_v39, %v9892_v44  ;;  %v10063_v39 = vpack.c.b16 %v3634_v63, %v3634_v63 }
 0x357   : > { %v10030_v29 = vadd.f32 %v2904_v17, %v9907_v57  ;;  %v10041_v24 = vpop.permute.xlu0 %4139  ;;  %3886 = vmatpush.bf16.msra.mxu2 %v3828_v56  ;;  %v3988_v56 = vsel %vm3984_vm10, %v9915_v58, %v9920_v27  ;;  %v3986_v63 = vsel %vm3984_vm10, %v9936_v36, %v9972_v20 }
 0x358   : > { %6933 = vmatmul.msk.bf16.gmra.mxu3 %vm783_vm1, %v10014_v31 }
 0x359   : > { %6919 = vmatmul.msk.bf16.gmra.mxu1 %vm783_vm1, %v9849_v11 }
 0x35b   : > { %v3042_v57 = vpop.f32.mrf.mxu3  ;;  %4465 = vrot.lane.b32.xlu2 %v9070_v32, %s7585_s18  ;;  %3887 = vmatpush.bf16.msra.mxu2 %v3825_v60 }
 0x35c   : > { %v10043_v28 = vadd.f32 %v3042_v57, %v2921_v37  ;;  %v10078_v37 = vpop.permute.xlu1 %4141 }
 0x35d   : > { %v3016_v61 = vpop.f32.mrf.mxu2 }
 0x35e   : > { %v10047_v45 = vadd.f32 %v3016_v61, %v9847_v2  ;;  %v2906_v11 = vpop.f32.mrf.mxu1  ;;  %v3055_v42 = vpop.f32.mrf.mxu0 }
 0x35f   : > { %v3071_v9 = vadd.f32 %v3055_v42, %v9913_v1  ;;  %4069 = vmatpush.bf16.msrb.mxu2 %v4016_v8  ;;  %v10059_v2 = vpop.permute.xlu2 %3966  ;;  %v10061_v21 = vpop.permute.xlu0 %4133 }
 0x361   : > { %6917 = vmatmul.msk.bf16.gmra.mxu0 %vm783_vm1, %v9902_v10 }
 0x362   : > { %6930 = vmatmul.msk.bf16.gmra.mxu2 %vm783_vm1, %v10014_v31 }
 0x363   : > { %v3044_v34 = vpop.f32.mrf.mxu3  ;;  %4457 = vrot.lane.b32.xlu2 %v9098_v53, %s7585_s18  ;;  %s7329_s18 = smul.u32 24, %s11309_s0 }
 0x365   : > { %v3019_v44 = vpop.f32.mrf.mxu2  ;;  %s645_s21 = scalar_lea.vmem %s11292_s26, %s7329_s18  ;;  %s11299_s26 = sld [smem:[#allocation24_spill]] }
 0x366   : > { %v10066_v32 = vadd.f32 %v3019_v44, %v9879_v16  ;;  %v3057_v1 = vpop.f32.mrf.mxu0  ;;  %v3222_v12 = vpop.f32.mrf.mxu1 }
 0x367   : > { %v3074_v5 = vadd.f32 %v3057_v1, %v9934_v35  ;;  %v10072_v23 = vadd.f32 %v3222_v12, %v9954_v43  ;;  %v10080_v16 = vpop.permute.xlu2 %4131  ;;  %v10082_v7 = vpop.permute.xlu0 %4143  ;;  %v3991_v43 = vsel %vm3984_vm10, %v9896_v18, %v9898_v38  ;;  %v3992_v18 = vsel %vm3984_vm10, %v9898_v38, %v9941_v62 }
 0x368   : > { %6934 = vmatmul.msk.bf16.gmra.mxu3 %vm783_vm1, %v10063_v39  ;;  %v4010_v51 = vsel %vm793_vm0, %v3991_v43, 0  ;;  %v4013_v26 = vsel %vm793_vm0, %v3992_v18, 0  ;;  %v3990_v43 = vsel %vm3984_vm10, %v9943_v14, %v10005_v13 }
 0x369   : > { %6920 = vmatmul.msk.bf16.gmra.mxu1 %vm783_vm1, %v9902_v10  ;;  %4023 = vmatpush.bf16.msrb.mxu0 %v4010_v51 }
 0x36a   : > { %4046 = vmatpush.bf16.msrb.mxu1 %v4013_v26  ;;  %4070 = vmatpush.bf16.msrb.mxu2 %v3990_v43 }
 0x36b   : > { %v3268_v50 = vpop.f32.mrf.mxu3  ;;  %4610 = vrot.lane.b32.xlu2 %v9103_v22, %s7586_s30  ;;  %s7590_s30 = smov 103  }
 0x36c   : > { %v10084_v15 = vadd.f32 %v3268_v50, %v3071_v9  ;;  %v3985_v9 = vsel %vm3984_vm10, %v9922_v19, %v9936_v36 }
 0x36d   : > { %v3021_v53 = vpop.f32.mrf.mxu2  ;;  %4024 = vmatpush.bf16.msrb.mxu0 %v3988_v56 }
 0x36e   : > { %v3060_v35 = vpop.f32.mrf.mxu0  ;;  %v3224_v48 = vpop.f32.mrf.mxu1 }
 0x36f   : > { %v3077_v10 = vadd.f32 %v3060_v35, %v9963_v47  ;;  %v10093_v0 = vadd.f32 %v3224_v48, %v9987_v4  ;;  %v10099_v46 = vpop.permute.xlu2 %4125  ;;  %v10102_v22 = vpop.permute.xlu0 %4127 }
 0x370   : > { %v10107_v4 = vpop.permute.xlu1 %4123 }
 0x371   : > { %6935 = vmatmul.msk.bf16.vlgmr.msra.gmra.mxu0 %vm783_vm1, %v9949_v33  ;;  %v7284_v33 = vld [vmem:[#allocation5 + $0x17c] sm:$0xff] }
 0x372   : > { %6931 = vmatmul.msk.bf16.gmra.mxu2 %vm783_vm1, %v10063_v39  ;;  %4025 = vmatpush.bf16.msrb.mxu0 %v3985_v9 }
 0x373   : > { %v3270_v47 = vpop.f32.mrf.mxu3 }
 0x374   : > { %v10109_v30 = vadd.f32 %v3270_v47, %v3074_v5  ;;  %v3785_v47 = vld [vmem:[#allocation5 + $0x18c] sm:$0xf] }
 0x375   : > { %v3245_v25 = vpop.f32.mrf.mxu2  ;;  %v3795_v26 = vunpack.c.l.b16 %v3785_v47 }
 0x376   : > { %v10112_v17 = vadd.f32 %v3245_v25, %v9926_v6  ;;  %v3062_v52 = vpop.f32.mrf.mxu0  ;;  %v3227_v54 = vpop.f32.mrf.mxu1  ;;  %v3989_v6 = vsel %vm3984_vm10, %v9920_v27, %v9943_v14  ;;  %v3987_v14 = vsel %vm3984_vm10, %v9972_v20, %v10059_v2  ;;  %vm5182_vm10 = vcmask 1047556  }
 0x377   : > { %v3080_v38 = vadd.f32 %v3062_v52, %v9994_v3  ;;  %v10120_v62 = vadd.f32 %v3227_v54, %v10021_v55  ;;  %v4138_v57 = vpop.permute.xlu2 %4137  ;;  %v4130_v58 = vpop.permute.xlu0 %4129  ;;  %4047 = vmatpush.bf16.msrb.mxu1 %v3989_v6  ;;  %4071 = vmatpush.bf16.msrb.mxu2 %v3987_v14  ;;  %v3798_v6 = vpack.c.b16 %v3795_v26, %v3795_v26 }
 0x378   : > { %6952 = vmatmul.msk.bf16.vlgmr.msra.gmra.mxu3 %vm783_vm1, %v7284_v33  ;;  %v4152_v3 = vsel %vm4145_vm12, %v4138_v57, %v10041_v24  ;;  %v10129_v55 = vpop.permute.xlu1 %4135 }
 0x379   : > { %6946 = vmatmul.msk.bf16.vlgmr.msra.gmra.mxu1 %vm783_vm1, %v7284_v33  ;;  %v4171_v8 = vsel %vm793_vm0, %v4152_v3, 0  ;;  %v4151_v43 = vsel %vm4145_vm12, %v10061_v21, %v10129_v55  ;;  %v4148_v55 = vsel %vm4145_vm12, %v10099_v46, %v10102_v22 }
 0x37a   : > { %4184 = vmatpush.bf16.msrb.mxu3 %v4171_v8 }
 0x37b   : > { %v3273_v61 = vpop.f32.mrf.mxu3  ;;  %4048 = vmatpush.bf16.msrb.mxu1 %v3986_v63 }
 0x37c   : > { %v10131_v59 = vadd.f32 %v3273_v61, %v3077_v10 }
 0x37d   : > { %v3247_v11 = vpop.f32.mrf.mxu2 }
 0x37e   : > { %v10135_v42 = vadd.f32 %v3247_v11, %v9947_v49  ;;  %v3065_v60 = vpop.f32.mrf.mxu0  ;;  %v3229_v27 = vpop.f32.mrf.mxu1  ;;  %v4149_v49 = vsel %vm4145_vm12, %v4130_v58, %v10080_v16 }
 0x37f   : > { %v3083_v34 = vadd.f32 %v3065_v60, %v10030_v29  ;;  %v10145_v44 = vadd.f32 %v3229_v27, %v10047_v45  ;;  %4185 = vmatpush.bf16.msrb.mxu3 %v4149_v49  ;;  %v4122_v19 = vpop.permute.xlu0 %4121  ;;  %v7285_v29 = vld [vmem:[#allocation5 + $0x184] sm:$0xff]  ;;  %v10162_v48 = vpop.permute.xlu2 %4300  ;;  %v7286_v27 = vld [vmem:[#allocation5 + $0x190] sm:$0xff] }
 0x380   : > { %v4299_v12 = vpop.permute.xlu1 %4298  ;;  %v4146_v45 = vsel %vm4145_vm12, %v4122_v19, %v10107_v4  ;;  %v4154_v19 = vsel %vm4145_vm12, %v10078_v37, %v10082_v7 }
 0x381   : > { %6936 = vmatmul.msk.bf16.gmra.mxu0 %vm783_vm1, %v10014_v31 }
 0x382   : > { %6949 = vmatmul.msk.bf16.vlgmr.msra.gmra.mxu2 %vm783_vm1, %v7284_v33 }
 0x383   : > { %v3275_v1 = vpop.f32.mrf.mxu3  ;;  %4186 = vmatpush.bf16.msrb.mxu3 %v4146_v45 }
 0x384   : > { %v10152_v36 = vadd.f32 %v3275_v1, %v3080_v38 }
 0x385   : > { %v3250_v5 = vpop.f32.mrf.mxu2 }
 0x386   : > { %v10157_v50 = vadd.f32 %v3250_v5, %v9979_v41  ;;  %v3067_v31 = vpop.f32.mrf.mxu0  ;;  %v3232_v53 = vpop.f32.mrf.mxu1  ;;  %v4313_v41 = vsel %vm4306_vm13, %v4299_v12, %v10162_v48 }
 0x387   : > { %v10160_v35 = vadd.f32 %v3232_v53, %v10066_v32  ;;  %v4332_v33 = vsel %vm793_vm0, %v4313_v41, 0  ;;  %v10183_v56 = vpop.permute.xlu2 %4292 }
 0x388   : > { %6953 = vmatmul.msk.bf16.gmra.mxu3 %vm783_vm1, %v7285_v29  ;;  %v10171_v51 = vpop.permute.xlu1 %4290  ;;  %4345 = vmatpush.bf16.msra.mxu2 %v4332_v33 }
 0x389   : > { %6947 = vmatmul.msk.bf16.gmra.mxu1 %vm783_vm1, %v7285_v29 }
 0x38b   : > { %v3278_v10 = vpop.f32.mrf.mxu3 }
 0x38c   : > { %v10173_v32 = vadd.f32 %v3278_v10, %v3083_v34 }
 0x38d   : > { %v3252_v18 = vpop.f32.mrf.mxu2 }
 0x38e   : > { %v10177_v25 = vadd.f32 %v3252_v18, %v10012_v40  ;;  %v3234_v52 = vpop.f32.mrf.mxu1  ;;  %v3383_v54 = vpop.f32.mrf.mxu0 }
 0x38f   : > { %v3443_v13 = vadd.f32 %v3383_v54, %v10072_v23  ;;  %v10197_v3 = vpop.permute.xlu2 %4284  ;;  %v7287_v52 = vld [vmem:[#allocation5 + $0x198] sm:$0xff] }
 0x390   : > { %v10188_v38 = vpop.permute.xlu1 %4282 }
 0x391   : > { %6937 = vmatmul.msk.bf16.gmra.mxu0 %vm783_vm1, %v10063_v39 }
 0x392   : > { %6950 = vmatmul.msk.bf16.gmra.mxu2 %vm783_vm1, %v7285_v29  ;;  %v10226_v29 = vld [vmem:[#allocation5 + $0x1a4] sm:$0xff] }
 0x393   : > { %v3280_v40 = vpop.f32.mrf.mxu3 }
 0x395   : > { %v3255_v57 = vpop.f32.mrf.mxu2 }
 0x396   : > { %v10191_v58 = vadd.f32 %v3255_v57, %v10043_v28  ;;  %v3385_v20 = vpop.f32.mrf.mxu0  ;;  %v3406_v2 = vpop.f32.mrf.mxu1  ;;  %v4153_v28 = vsel %vm4145_vm12, %v10041_v24, %v10078_v37 }
 0x397   : > { %v3446_v23 = vadd.f32 %v3385_v20, %v10093_v0  ;;  %v10195_v61 = vadd.f32 %v3406_v2, %v10112_v17  ;;  %v10210_v34 = vpop.permute.xlu2 %4294  ;;  %v4174_v49 = vsel %vm793_vm0, %v4153_v28, 0 }
 0x398   : > { %6954 = vmatmul.msk.bf16.gmra.mxu3 %vm783_vm1, %v3798_v6  ;;  %v4305_v8 = vpop.permute.xlu1 %4304  ;;  %4207 = vmatpush.bf16.msra.mxu0 %v4174_v49  ;;  %v4107_v49 = vld [vmem:[#allocation5 + $0x1b4] sm:$0xf] }
 0x399   : > { %6948 = vmatmul.msk.bf16.gmra.mxu1 %vm783_vm1, %v3798_v6 }
 0x39b   : > { %v3544_v39 = vpop.f32.mrf.mxu3 }
 0x39c   : > { %v10204_v11 = vadd.f32 %v3544_v39, %v3443_v13  ;;  %v3946_v39 = vld [vmem:[#allocation5 + $0x1a0] sm:$0xf] }
 0x39d   : > { %v3257_v60 = vpop.f32.mrf.mxu2 }
 0x39e   : > { %v3388_v0 = vpop.f32.mrf.mxu0  ;;  %v3408_v9 = vpop.f32.mrf.mxu1  ;;  %v3956_v60 = vunpack.c.l.b16 %v3946_v39 }
 0x39f   : > { %v3449_v17 = vadd.f32 %v3388_v0, %v10120_v62  ;;  %v10208_v63 = vadd.f32 %v3408_v9, %v10135_v42  ;;  %v4150_v62 = vsel %vm4145_vm12, %v10080_v16, %v10061_v21  ;;  %v4177_v42 = vsel %vm793_vm0, %v4154_v19, 0  ;;  %v10235_v16 = vpop.permute.xlu2 %4288 }
 0x3a0   : > { %v10218_v1 = vpop.permute.xlu1 %4286  ;;  %4208 = vmatpush.bf16.msra.mxu0 %v4150_v62  ;;  %4230 = vmatpush.bf16.msra.mxu1 %v4177_v42  ;;  %v4147_v21 = vsel %vm4145_vm12, %v10107_v4, %v10099_v46  ;;  %v4311_v46 = vsel %vm4306_vm13, %v10183_v56, %v10210_v34  ;;  %v4307_v42 = vsel %vm4306_vm13, %v10188_v38, %v10197_v3  ;;  %vm5159_vm12 = vcmask 203776  }
 0x3a1   : > { %6963 = vmatmul.msk.bf16.vlgmr.msrb.gmra.mxu0 %vm783_vm1, %v7286_v27  ;;  %v4308_v57 = vsel %vm4306_vm13, %v10197_v3, %v10218_v1 }
 0x3a2   : > { %6951 = vmatmul.msk.bf16.gmra.mxu2 %vm783_vm1, %v3798_v6 }
 0x3a3   : > { %v3546_v24 = vpop.f32.mrf.mxu3 }
 0x3a4   : > { %v10224_v12 = vadd.f32 %v3546_v24, %v3446_v23  ;;  %4231 = vmatpush.bf16.msra.mxu1 %v4151_v43  ;;  %4209 = vmatpush.bf16.msra.mxu0 %v4147_v21 }
 0x3a5   : > { %v3429_v37 = vpop.f32.mrf.mxu2 }
 0x3a6   : > { %v10229_v7 = vadd.f32 %v3429_v37, %v10084_v15  ;;  %v3390_v5 = vpop.f32.mrf.mxu0  ;;  %v3411_v45 = vpop.f32.mrf.mxu1  ;;  %v4117_v37 = vunpack.c.l.b16 %v4107_v49 }
 0x3a7   : > { %v3452_v31 = vadd.f32 %v3390_v5, %v10145_v44  ;;  %v10233_v53 = vadd.f32 %v3411_v45, %v10157_v50  ;;  %v4303_v15 = vpop.permute.xlu0 %4302  ;;  %v10265_v40 = vpop.permute.xlu2 %4451 }
 0x3a8   : > { %6980 = vmatmul.msk.bf16.vlgmr.msrb.gmra.mxu3 %vm783_vm1, %v10226_v29  ;;  %v4314_v41 = vsel %vm4306_vm13, %v10162_v48, %v4303_v15  ;;  %v4315_v44 = vsel %vm4306_vm13, %v4303_v15, %v4305_v8  ;;  %v10248_v47 = vpop.permute.xlu1 %4461  ;;  %4232 = vmatpush.bf16.msra.mxu1 %v4148_v55 }
 0x3a9   : > { %6966 = vmatmul.msk.bf16.vlgmr.msrb.gmra.mxu1 %vm783_vm1, %v7286_v27  ;;  %v4335_v10 = vsel %vm793_vm0, %v4314_v41, 0  ;;  %v4338_v18 = vsel %vm793_vm0, %v4315_v44, 0 }
 0x3aa   : > { %4368 = vmatpush.bf16.msra.mxu3 %v4335_v10  ;;  %4391 = vmatpush.bf16.msrb.mxu0 %v4338_v18 }
 0x3ab   : > { %v3549_v50 = vpop.f32.mrf.mxu3 }
 0x3ac   : > { %v10256_v33 = vadd.f32 %v3549_v50, %v3449_v17  ;;  %v3959_v17 = vpack.c.b16 %v3956_v60, %v3956_v60 }
 0x3ad   : > { %v3431_v48 = vpop.f32.mrf.mxu2 }
 0x3ae   : > { %v10259_v54 = vadd.f32 %v3431_v48, %v10109_v30  ;;  %v3393_v14 = vpop.f32.mrf.mxu0  ;;  %v3413_v13 = vpop.f32.mrf.mxu1  ;;  %4369 = vmatpush.bf16.msra.mxu3 %v4311_v46 }
 0x3af   : > { %v3455_v26 = vadd.f32 %v3393_v14, %v10160_v35  ;;  %v10263_v4 = vadd.f32 %v3413_v13, %v10177_v25  ;;  %v10276_v35 = vld [vmem:[#allocation5 + $0x1ac] sm:$0xff]  ;;  %v10287_v28 = vpop.permute.xlu2 %4445  ;;  %v4297_v5 = vpop.permute.xlu0 %4296 }
 0x3b0   : > { %v10272_v30 = vpop.permute.xlu1 %4443  ;;  %v4312_v39 = vsel %vm4306_vm13, %v10210_v34, %v4297_v5 }
 0x3b1   : > { %6964 = vmatmul.msk.bf16.gmra.mxu0 %vm783_vm1, %v7287_v52 }
 0x3b2   : > { %6969 = vmatmul.msk.bf16.vlgmr.msrb.gmra.mxu2 %vm783_vm1, %v7286_v27  ;;  %4370 = vmatpush.bf16.msra.mxu3 %v4308_v57  ;;  %v10346_v57 = vld [vmem:[#allocation5 + $0x1b8] sm:$0xff] }
 0x3b3   : > { %v3551_v22 = vpop.f32.mrf.mxu3  ;;  %4392 = vmatpush.bf16.msrb.mxu0 %v4312_v39 }
 0x3b4   : > { %v10274_v6 = vadd.f32 %v3551_v22, %v3452_v31  ;;  %v10312_v31 = vpack.c.b16 %v4117_v37, %v4117_v37 }
 0x3b5   : > { %v3434_v25 = vpop.f32.mrf.mxu2 }
 0x3b6   : > { %v10282_v20 = vadd.f32 %v3434_v25, %v10131_v59  ;;  %v3395_v2 = vpop.f32.mrf.mxu0  ;;  %v3416_v23 = vpop.f32.mrf.mxu1  ;;  %v4310_v59 = vsel %vm4306_vm13, %v10171_v51, %v10183_v56 }
 0x3b7   : > { %v10285_v8 = vadd.f32 %v3416_v23, %v10191_v58  ;;  %4346 = vmatpush.bf16.msra.mxu2 %v4310_v59  ;;  %v10306_v56 = vpop.permute.xlu2 %4447  ;;  %v4460_v50 = vpop.permute.xlu0 %4459 }
 0x3b8   : > { %6981 = vmatmul.msk.bf16.gmra.mxu3 %vm783_vm1, %v10276_v35  ;;  %v10295_v0 = vpop.permute.xlu1 %4455 }
 0x3b9   : > { %6967 = vmatmul.msk.bf16.gmra.mxu1 %vm783_vm1, %v7287_v52 }
 0x3bb   : > { %v3554_v27 = vpop.f32.mrf.mxu3  ;;  %4347 = vmatpush.bf16.msra.mxu2 %v4307_v42 }
 0x3bc   : > { %v10297_v9 = vadd.f32 %v3554_v27, %v3455_v26 }
 0x3bd   : > { %v3436_v58 = vpop.f32.mrf.mxu2 }
 0x3be   : > { %v10300_v19 = vadd.f32 %v3436_v58, %v10152_v36  ;;  %v3418_v24 = vpop.f32.mrf.mxu1  ;;  %v3567_v62 = vpop.f32.mrf.mxu0 }
 0x3bf   : > { %v3605_v51 = vadd.f32 %v3567_v62, %v10195_v61  ;;  %v10321_v44 = vpop.permute.xlu2 %4612  ;;  %v4454_v26 = vpop.permute.xlu0 %4453 }
 0x3c0   : > { %v10310_v36 = vpop.permute.xlu1 %4622 }
 0x3c1   : > { %6965 = vmatmul.msk.bf16.gmra.mxu0 %vm783_vm1, %v3959_v17 }
 0x3c2   : > { %6970 = vmatmul.msk.bf16.gmra.mxu2 %vm783_vm1, %v7287_v52 }
 0x3c3   : > { %v3556_v45 = vpop.f32.mrf.mxu3 }
 0x3c5   : > { %v3439_v43 = vpop.f32.mrf.mxu2 }
 0x3c6   : > { %v10315_v15 = vadd.f32 %v3439_v43, %v10173_v32  ;;  %v3569_v38 = vpop.f32.mrf.mxu0  ;;  %v3590_v61 = vpop.f32.mrf.mxu1  ;;  %v4474_v32 = vsel %vm4467_vm14, %v4460_v50, %v10248_v47 }
 0x3c7   : > { %v3608_v3 = vadd.f32 %v3569_v38, %v10208_v63  ;;  %v10319_v41 = vadd.f32 %v3590_v61, %v10229_v7  ;;  %v4493_v63 = vsel %vm793_vm0, %v4474_v32, 0  ;;  %v10337_v13 = vpop.permute.xlu2 %4606 }
 0x3c8   : > { %6982 = vmatmul.msk.bf16.gmra.mxu3 %vm783_vm1, %v10312_v31  ;;  %v10328_v18 = vpop.permute.xlu1 %4604  ;;  %4506 = vmatpush.bf16.msrb.mxu1 %v4493_v63 }
 0x3c9   : > { %6968 = vmatmul.msk.bf16.gmra.mxu1 %vm783_vm1, %v3959_v17 }
 0x3cb   : > { %v3728_v10 = vpop.f32.mrf.mxu3 }
 0x3cc   : > { %v10330_v21 = vadd.f32 %v3728_v10, %v3605_v51 }
 0x3cd   : > { %v3441_v7 = vpop.f32.mrf.mxu2 }
 0x3ce   : > { %v3572_v55 = vpop.f32.mrf.mxu0  ;;  %v3592_v48 = vpop.f32.mrf.mxu1 }
 0x3cf   : > { %v3611_v52 = vadd.f32 %v3572_v55, %v10233_v53  ;;  %v10335_v14 = vadd.f32 %v3592_v48, %v10259_v54  ;;  %v4466_v27 = vpop.permute.xlu2 %4465  ;;  %v4268_v48 = vld [vmem:[#allocation5 + $0x1c8] sm:$0xf] }
 0x3d0   : > { %v10342_v22 = vpop.permute.xlu1 %4616 }
 0x3d1   : > { %6983 = vmatmul.msk.bf16.vlgmr.msra.gmra.mxu0 %vm783_vm1, %v10226_v29 }
 0x3d2   : > { %6971 = vmatmul.msk.bf16.gmra.mxu2 %vm783_vm1, %v3959_v17 }
 0x3d3   : > { %v3730_v46 = vpop.f32.mrf.mxu3 }
 0x3d4   : > { %v10344_v25 = vadd.f32 %v3730_v46, %v3608_v3  ;;  %v4469_v46 = vsel %vm4467_vm14, %v10287_v28, %v10306_v56 }
 0x3d5   : > { %v3705_v2 = vpop.f32.mrf.mxu2 }
 0x3d6   : > { %v10349_v53 = vadd.f32 %v3705_v2, %v10204_v11  ;;  %v3574_v54 = vpop.f32.mrf.mxu0  ;;  %v3595_v23 = vpop.f32.mrf.mxu1  ;;  %v4278_v2 = vunpack.c.l.b16 %v4268_v48  ;;  %v4746_v48 = vld [vmem:[%s11242_s4] sm:$0xff] }
 0x3d7   : > { %v3614_v60 = vadd.f32 %v3574_v54, %v10263_v4  ;;  %v10355_v59 = vadd.f32 %v3595_v23, %v10282_v20  ;;  %v4464_v11 = vpop.permute.xlu0 %4463  ;;  %v4458_v45 = vpop.permute.xlu2 %4457 }
 0x3d8   : > { %7000 = vmatmul.msk.bf16.vlgmr.msra.gmra.mxu3 %vm783_vm1, %v10346_v57  ;;  %v4475_v17 = vsel %vm4467_vm14, %v10248_v47, %v4464_v11  ;;  %v4476_v34 = vsel %vm4467_vm14, %v4464_v11, %v4466_v27  ;;  %v10364_v49 = vpop.permute.xlu1 %4626  ;;  %v10424_v54 = vpack.c.b16 %v4278_v2, %v4278_v2  ;;  %v4792_v2 = vld [vmem:[%s11243_s5 + $0x8] sm:$0xff] }
 0x3d9   : > { %6986 = vmatmul.msk.bf16.vlgmr.msra.gmra.mxu1 %vm783_vm1, %v10226_v29  ;;  %v4496_v20 = vsel %vm793_vm0, %v4475_v17, 0  ;;  %v4499_v24 = vsel %vm793_vm0, %v4476_v34, 0  ;;  %v4309_v29 = vsel %vm4306_vm13, %v10218_v1, %v10235_v16  ;;  %v4473_v1 = vsel %vm4467_vm14, %v10295_v0, %v4458_v45  ;;  %vm10817_vm13 = vmor %vm5182_vm10, %vm5181_vm8 }
 0x3da   : > { %4552 = vmatpush.bf16.msrb.mxu3 %v4499_v24  ;;  %4529 = vmatpush.bf16.msrb.mxu2 %v4496_v20 }
 0x3db   : > { %v3733_v58 = vpop.f32.mrf.mxu3  ;;  %4393 = vmatpush.bf16.msrb.mxu0 %v4309_v29 }
 0x3dc   : > { %v10366_v4 = vadd.f32 %v3733_v58, %v3611_v52 }
 0x3dd   : > { %v3707_v62 = vpop.f32.mrf.mxu2 }
 0x3de   : > { %v10374_v42 = vadd.f32 %v3707_v62, %v10224_v12  ;;  %v3577_v47 = vpop.f32.mrf.mxu0  ;;  %v3597_v51 = vpop.f32.mrf.mxu1  ;;  %4553 = vmatpush.bf16.msrb.mxu3 %v4473_v1  ;;  %v4471_v12 = vsel %vm4467_vm14, %v10265_v40, %v4454_v26  ;;  %v4468_v40 = vsel %vm4467_vm14, %v10272_v30, %v10287_v28  ;;  %v11261_v62 = vmov 0  }
 0x3df   : > { %v3617_v37 = vadd.f32 %v3577_v47, %v10285_v8  ;;  %v10378_v5 = vadd.f32 %v3597_v51, %v10300_v19  ;;  %4507 = vmatpush.bf16.msrb.mxu1 %v4471_v12  ;;  %v10390_v19 = vld [vmem:[#allocation5 + $0x1c0] sm:$0xff]  ;;  %7425 = vset.pattern.permute.xlu1 %v11261_v62  ;;  %v7292_v47 = vld [vmem:[#allocation5 + $0x1cc] sm:$0xff] }
 0x3e0   : > { %v4450_v8 = vpop.permute.xlu1 %4449  ;;  %7424 = vset.pattern.permute.xlu0 %v11261_v62  ;;  %7426 = vset.pattern.permute.xlu2 %v11261_v62 }
 0x3e1   : > { %6984 = vmatmul.msk.bf16.gmra.mxu0 %vm783_vm1, %v10276_v35  ;;  %v4470_v61 = vsel %vm4467_vm14, %v10306_v56, %v4450_v8  ;;  %v4749_v8 = vld [vmem:[%s11242_s4 + $0x18] sm:$0xff] }
 0x3e2   : > { %6997 = vmatmul.msk.bf16.vlgmr.msra.gmra.mxu2 %vm783_vm1, %v10346_v57  ;;  %4554 = vmatpush.bf16.msrb.mxu3 %v4470_v61 }
 0x3e3   : > { %v3735_v16 = vpop.f32.mrf.mxu3  ;;  %4508 = vmatpush.bf16.msrb.mxu1 %v4468_v40  ;;  %v4629_v40 = vsel %vm4628_vm15, %v10328_v18, %v10337_v13 }
 0x3e4   : > { %v10388_v43 = vadd.f32 %v3735_v16, %v3614_v60 }
 0x3e5   : > { %v3710_v38 = vpop.f32.mrf.mxu2 }
 0x3e6   : > { %v10395_v3 = vadd.f32 %v3710_v38, %v10256_v33  ;;  %v3579_v50 = vpop.f32.mrf.mxu0  ;;  %v3600_v10 = vpop.f32.mrf.mxu1  ;;  %v4472_v33 = vsel %vm4467_vm14, %v4454_v26, %v10295_v0  ;;  %vm5185_vm14 = vcmask 203780  }
 0x3e7   : > { %v10401_v32 = vadd.f32 %v3600_v10, %v10315_v15  ;;  %4530 = vmatpush.bf16.msrb.mxu2 %v4472_v33  ;;  %v4621_v0 = vpop.permute.xlu0 %4620 }
 0x3e8   : > { %7001 = vmatmul.msk.bf16.gmra.mxu3 %vm783_vm1, %v10390_v19  ;;  %v4635_v26 = vsel %vm4628_vm15, %v4621_v0, %v10310_v36 }
 0x3e9   : > { %6987 = vmatmul.msk.bf16.gmra.mxu1 %vm783_vm1, %v10276_v35  ;;  %v4654_v28 = vsel %vm793_vm0, %v4635_v26, 0 }
 0x3ea   : > { %4667 = vmatpush.bf16.msra.mxu0 %v4654_v28  ;;  %v4429_v28 = vld [vmem:[#allocation5 + $0x1dc] sm:$0xf] }
 0x3eb   : > { %v3738_v63 = vpop.f32.mrf.mxu3  ;;  %4531 = vmatpush.bf16.msrb.mxu2 %v4469_v46 }
 0x3ec   : > { %v10409_v7 = vadd.f32 %v3738_v63, %v3617_v37 }
 0x3ed   : > { %v3712_v55 = vpop.f32.mrf.mxu2 }
 0x3ee   : > { %v10412_v30 = vadd.f32 %v3712_v55, %v10274_v6  ;;  %v3602_v15 = vpop.f32.mrf.mxu1  ;;  %v3751_v52 = vpop.f32.mrf.mxu0 }
 0x3ef   : > { %v3767_v35 = vadd.f32 %v3751_v52, %v10319_v41  ;;  %v4615_v11 = vpop.permute.xlu0 %4614 }
 0x3f0   : > { %v4632_v16 = vsel %vm4628_vm15, %v10321_v44, %v4615_v11 }
 0x3f1   : > { %6985 = vmatmul.msk.bf16.gmra.mxu0 %vm783_vm1, %v10312_v31 }
 0x3f2   : > { %6998 = vmatmul.msk.bf16.gmra.mxu2 %vm783_vm1, %v10390_v19  ;;  %4668 = vmatpush.bf16.msra.mxu0 %v4632_v16  ;;  %v4793_v16 = vld [vmem:[%s11243_s5 + $0x10] sm:$0xff] }
 0x3f3   : > { %v3740_v6 = vpop.f32.mrf.mxu3 }
 0x3f5   : > { %v3715_v56 = vpop.f32.mrf.mxu2 }
 0x3f6   : > { %v10428_v41 = vadd.f32 %v3715_v56, %v10297_v9  ;;  %v3753_v23 = vpop.f32.mrf.mxu0  ;;  %v3866_v39 = vpop.f32.mrf.mxu1  ;;  %4669 = vmatpush.bf16.msra.mxu0 %v4629_v40  ;;  %v4747_v40 = vld [vmem:[%s11242_s4 + $0x8] sm:$0xff] }
 0x3f7   : > { %v10431_v60 = vadd.f32 %v3753_v23, %v10335_v14  ;;  %v10434_v27 = vadd.f32 %v3866_v39, %v10349_v53  ;;  %v4795_v53 = vld [vmem:[%s11243_s5 + $0x20] sm:$0xff]  ;;  %v4611_v56 = vpop.permute.xlu2 %4610 }
 0x3f8   : > { %7002 = vmatmul.msk.bf16.gmra.mxu3 %vm783_vm1, %v10424_v54  ;;  %4818 = vperm.xlu1 %7425, %v4795_v53  }
 0x3f9   : > { %6988 = vmatmul.msk.bf16.gmra.mxu1 %vm783_vm1, %v10312_v31  ;;  %v4625_v31 = vpop.permute.xlu0 %4624 }
 0x3fa   : > { %v4636_v29 = vsel %vm4628_vm15, %v10310_v36, %v4625_v31 }
 0x3fb   : > { %v3912_v58 = vpop.f32.mrf.mxu3  ;;  %v4657_v51 = vsel %vm793_vm0, %v4636_v29, 0 }
 0x3fc   : > { %v10440_v17 = vadd.f32 %v3912_v58, %v3767_v35  ;;  %4690 = vmatpush.bf16.msra.mxu1 %v4657_v51 }
 0x3fd   : > { %v3717_v9 = vpop.f32.mrf.mxu2 }
 0x3fe   : > { %v3756_v34 = vpop.f32.mrf.mxu0  ;;  %v3868_v20 = vpop.f32.mrf.mxu1  ;;  %v5018_v9 = vld [vmem:[%s11247_s9 + $0x18] sm:$0xff] }
 0x3ff   : > { %v3773_v24 = vadd.f32 %v3756_v34, %v10355_v59  ;;  %v10444_v14 = vadd.f32 %v3868_v20, %v10374_v42  ;;  %v4637_v42 = vsel %vm4628_vm15, %v4625_v31, %v10364_v49  ;;  %v4439_v34 = vunpack.c.l.b16 %v4429_v28 }
 0x400   : > { %4768 = vperm.xlu1 %7425, %v4749_v8   ;;  %v5054_v8 = vld [vmem:[%s11248_s10 + $0x18] sm:$0xff] }
 0x401   : > { %7003 = vmatmul.msk.bf16.vlgmr.msrb.gmra.mxu0 %vm783_vm1, %v10346_v57  ;;  %v4660_v57 = vsel %vm793_vm0, %v4637_v42, 0  ;;  %v4609_v38 = vpop.permute.xlu0 %4608  ;;  %v4442_v20 = vpack.c.b16 %v4439_v34, %v4439_v34  ;;  %v4748_v42 = vld [vmem:[%s11242_s4 + $0x10] sm:$0xff] }
 0x402   : > { %6999 = vmatmul.msk.bf16.gmra.mxu2 %vm783_vm1, %v10424_v54  ;;  %v4630_v33 = vsel %vm4628_vm15, %v10337_v13, %v4609_v38  ;;  %v7293_v13 = vld [vmem:[#allocation5 + $0x1d4] sm:$0xff]  ;;  %4763 = vperm.xlu2 %7426, %v4748_v42  }
 0x403   : > { %v10456_v59 = vpop.f32.mrf.mxu3  ;;  %4713 = vmatpush.bf16.msra.mxu2 %v4660_v57 }
 0x405   : > { %v3889_v37 = vpop.f32.mrf.mxu2 }
 0x406   : > { %v10465_v45 = vadd.f32 %v3889_v37, %v10330_v21  ;;  %v3758_v1 = vpop.f32.mrf.mxu0  ;;  %v3871_v12 = vpop.f32.mrf.mxu1  ;;  %v4633_v21 = vsel %vm4628_vm15, %v4615_v11, %v10342_v22  ;;  %v4631_v11 = vsel %vm4628_vm15, %v4609_v38, %v4611_v56  ;;  %v7294_v37 = vld [vmem:[#allocation5 + $0x1e0] sm:$0xff] }
 0x407   : > { %v10470_v36 = vadd.f32 %v3758_v1, %v10378_v5  ;;  %v10473_v49 = vadd.f32 %v3871_v12, %v10395_v3  ;;  %4691 = vmatpush.bf16.msra.mxu1 %v4633_v21  ;;  %v5052_v21 = vld [vmem:[%s11248_s10 + $0x8] sm:$0xff] }
 0x408   : > { %7020 = vmatmul.msk.bf16.vlgmr.msrb.gmra.mxu3 %vm783_vm1, %v7292_v47  ;;  %4753 = vperm.xlu1 %7425, %v4746_v48   ;;  %v7295_v48 = vld [vmem:[#allocation5 + $0x1e8] sm:$0xff] }
 0x409   : > { %7014 = vmatmul.msk.bf16.vlgmr.msrb.gmra.mxu1 %vm783_vm1, %v7292_v47  ;;  %v4619_v35 = vpop.permute.xlu0 %4618 }
 0x40a   : > { %4808 = vperm.xlu2 %7426, %v4793_v16  }
 0x40b   : > { %v3917_v44 = vpop.f32.mrf.mxu3  ;;  %4692 = vmatpush.bf16.msra.mxu1 %v4630_v33  ;;  %v5051_v33 = vld [vmem:[%s11248_s10] sm:$0xff] }
 0x40c   : > { %v10482_v5 = vadd.f32 %v3917_v44, %v3773_v24 }
 0x40d   : > { %v3891_v61 = vpop.f32.mrf.mxu2 }
 0x40e   : > { %v10485_v3 = vadd.f32 %v3891_v61, %v10344_v25  ;;  %v3761_v50 = vpop.f32.mrf.mxu0  ;;  %v3873_v10 = vpop.f32.mrf.mxu1  ;;  %v4750_v25 = vld [vmem:[%s11242_s4 + $0x20] sm:$0xff] }
 0x40f   : > { %v3779_v63 = vadd.f32 %v3761_v50, %v10401_v32  ;;  %v10494_v55 = vadd.f32 %v3873_v10, %v10412_v30  ;;  %4773 = vperm.xlu0 %7424, %v4750_v25  }
 0x410   : > { %4803 = vperm.xlu1 %7425, %v4792_v2  }
 0x411   : > { %7004 = vmatmul.msk.bf16.gmra.mxu0 %vm783_vm1, %v10390_v19  ;;  %v4794_v19 = vld [vmem:[%s11243_s5 + $0x18] sm:$0xff] }
 0x412   : > { %7017 = vmatmul.msk.bf16.vlgmr.msrb.gmra.mxu2 %vm783_vm1, %v7292_v47  ;;  %v5015_v47 = vld [vmem:[%s11247_s9] sm:$0xff]  ;;  %4758 = vperm.xlu2 %7426, %v4747_v40  }
 0x413   : > { %v10505_v18 = vpop.f32.mrf.mxu3 }
 0x415   : > { %v3894_v32 = vpop.f32.mrf.mxu2 }
 0x416   : > { %v10508_v30 = vadd.f32 %v3894_v32, %v10366_v4  ;;  %v3763_v15 = vpop.f32.mrf.mxu0  ;;  %v3876_v52 = vpop.f32.mrf.mxu1  ;;  %v4634_v4 = vsel %vm4628_vm15, %v10342_v22, %v4619_v35  ;;  %v4791_v22 = vld [vmem:[%s11243_s5] sm:$0xff]  ;;  %vm10831_vm15 = vmor %vm5185_vm14, %vm793_vm0 }
 0x417   : > { %v10511_v46 = vadd.f32 %v3876_v52, %v10428_v41  ;;  %4813 = vperm.xlu0 %7424, %v4794_v19   ;;  %4714 = vmatpush.bf16.msra.mxu2 %v4634_v4  ;;  %v4861_v15 = vld [vmem:[%s11245_s7] sm:$0x3f] }
 0x418   : > { %7021 = vmatmul.msk.bf16.gmra.mxu3 %vm783_vm1, %v7293_v13  ;;  %5036 = vperm.xlu1 %7425, %v5018_v9   ;;  %v5016_v9 = vld [vmem:[%s11247_s9 + $0x8] sm:$0xff] }
 0x419   : > { %7015 = vmatmul.msk.bf16.gmra.mxu1 %vm783_vm1, %v7293_v13 }
 0x41a   : > { %4864 = vperm.xlu2 %7426, %v4861_v15  }
 0x41b   : > { %v3922_v0 = vpop.f32.mrf.mxu3  ;;  %4715 = vmatpush.bf16.msra.mxu2 %v4631_v11 }
 0x41c   : > { %v10523_v6 = vadd.f32 %v3922_v0, %v3779_v63  ;;  %v4590_v0 = vld [vmem:[#allocation5 + $0x1f0] sm:$0xf] }
 0x41d   : > { %v3896_v26 = vpop.f32.mrf.mxu2  ;;  %v4600_v28 = vunpack.c.l.b16 %v4590_v0 }
 0x41e   : > { %v10526_v41 = vadd.f32 %v3896_v26, %v10388_v43  ;;  %v3878_v23 = vpop.f32.mrf.mxu1  ;;  %v4027_v39 = vpop.f32.mrf.mxu0 }
 0x41f   : > { %v4087_v58 = vadd.f32 %v4027_v39, %v10434_v27  ;;  %4798 = vperm.xlu0 %7424, %v4791_v22   ;;  %v4603_v11 = vpack.c.b16 %v4600_v28, %v4600_v28 }
 0x420   : > { %5021 = vperm.xlu1 %7425, %v5015_v47  }
 0x421   : > { %7005 = vmatmul.msk.bf16.gmra.mxu0 %vm783_vm1, %v10424_v54  ;;  %v5017_v54 = vld [vmem:[%s11247_s9 + $0x10] sm:$0xff] }
 0x422   : > { %7018 = vmatmul.msk.bf16.gmra.mxu2 %vm783_vm1, %v7293_v13 }
 0x423   : > { %v3924_v43 = vpop.f32.mrf.mxu3 }
 0x425   : > { %v3899_v27 = vpop.f32.mrf.mxu2 }
 0x426   : > { %v3939_v24 = vadd.f32 %v3899_v27, %v10409_v7  ;;  %v10540_v53 = vpop.f32.mrf.mxu0  ;;  %v4050_v31 = vpop.f32.mrf.mxu1 }
 0x427   : > { %v10543_v29 = vadd.f32 %v4050_v31, %v10465_v45  ;;  %5031 = vperm.xlu0 %7424, %v5017_v54  }
 0x428   : > { %7022 = vmatmul.msk.bf16.gmra.mxu3 %vm783_vm1, %v4442_v20  ;;  %5062 = vperm.xlu1 %7425, %v5052_v21  }
 0x429   : > { %7016 = vmatmul.msk.bf16.gmra.mxu1 %vm783_vm1, %v4442_v20 }
 0x42b   : > { %v4188_v7 = vpop.f32.mrf.mxu3 }
 0x42c   : > { %v10556_v51 = vadd.f32 %v4188_v7, %v4087_v58 }
 0x42d   : > { %v3901_v57 = vpop.f32.mrf.mxu2 }
 0x42e   : > { %v4032_v45 = vpop.f32.mrf.mxu0  ;;  %v10558_v1 = vpop.f32.mrf.mxu1 }
 0x42f   : > { %v4093_v12 = vadd.f32 %v4032_v45, %v10473_v49  ;;  %5072 = vperm.xlu0 %7424, %v5054_v8  }
 0x431   : > { %7031 = vmatmul.msk.bf16.vlgmr.msra.gmra.mxu0 %vm783_vm1, %v7294_v37 }
 0x432   : > { %7019 = vmatmul.msk.bf16.gmra.mxu2 %vm783_vm1, %v4442_v20 }
 0x433   : > { %v10572_v49 = vpop.f32.mrf.mxu3 }
 0x435   : > { %v4073_v44 = vpop.f32.mrf.mxu2 }
 0x436   : > { %v4089_v38 = vadd.f32 %v4073_v44, %v10440_v17  ;;  %v10575_v61 = vpop.f32.mrf.mxu0  ;;  %v4055_v50 = vpop.f32.mrf.mxu1 }
 0x437   : > { %v4094_v10 = vadd.f32 %v4055_v50, %v10508_v30  ;;  %5057 = vperm.xlu0 %7424, %v5051_v33  }
 0x439   : > { %7034 = vmatmul.msk.bf16.vlgmr.msra.gmra.mxu1 %vm783_vm1, %v7294_v37 }
 0x43b   : > { %v4193_v63 = vpop.f32.mrf.mxu3 }
 0x43c   : > { %v4254_v25 = vadd.f32 %v4193_v63, %v4093_v12 }
 0x43d   : > { %v10585_v17 = vpop.f32.mrf.mxu2 }
 0x43e   : > { %v4037_v13 = vpop.f32.mrf.mxu0  ;;  %v10587_v32 = vpop.f32.mrf.mxu1 }
 0x43f   : > { %v4099_v30 = vadd.f32 %v4037_v13, %v10511_v46  ;;  %v5053_v46 = vld [vmem:[%s11248_s10 + $0x10] sm:$0xff] }
 0x440   : > { %5067 = vperm.xlu2 %7426, %v5053_v46  }
 0x441   : > { %7032 = vmatmul.msk.bf16.gmra.mxu0 %vm783_vm1, %v7295_v48 }
 0x442   : > { %7037 = vmatmul.msk.bf16.vlgmr.msra.gmra.mxu2 %vm783_vm1, %v7294_v37 }
 0x443   : > { %v10595_v52 = vpop.f32.mrf.mxu3 }
 0x445   : > { %v4078_v35 = vpop.f32.mrf.mxu2 }
 0x446   : > { %v4095_v19 = vadd.f32 %v4078_v35, %v10482_v5  ;;  %v4039_v2 = vpop.f32.mrf.mxu0  ;;  %v4060_v4 = vpop.f32.mrf.mxu1 }
 0x447   : > { %v4100_v26 = vadd.f32 %v4060_v4, %v3939_v24 }
 0x448   : > { %5026 = vperm.xlu2 %7426, %v5016_v9  }
 0x449   : > { %7035 = vmatmul.msk.bf16.gmra.mxu1 %vm783_vm1, %v7295_v48 }
 0x44b   : > { %v4198_v56 = vpop.f32.mrf.mxu3 }
 0x44c   : > { %v4260_v23 = vadd.f32 %v4198_v56, %v4099_v30 }
 0x44d   : > { %v10602_v39 = vpop.f32.mrf.mxu2 }
 0x44e   : > { %v4062_v58 = vpop.f32.mrf.mxu1  ;;  %v4211_v22 = vpop.f32.mrf.mxu0 }
 0x44f   : > { %v4249_v5 = vadd.f32 %v4211_v22, %v10543_v29 }
 0x451   : > { %7033 = vmatmul.msk.bf16.gmra.mxu0 %vm783_vm1, %v4603_v11 }
 0x452   : > { %7038 = vmatmul.msk.bf16.gmra.mxu2 %vm783_vm1, %v7295_v48 }
 0x453   : > { %v4200_v34 = vpop.f32.mrf.mxu3 }
 0x455   : > { %v4083_v43 = vpop.f32.mrf.mxu2 }
 0x456   : > { %v4101_v20 = vadd.f32 %v4083_v43, %v10523_v6  ;;  %v10611_v27 = vpop.f32.mrf.mxu0  ;;  %v4234_v24 = vpop.f32.mrf.mxu1 }
 0x457   : > { %v4250_v31 = vadd.f32 %v4234_v24, %v4089_v38 }
 0x459   : > { %7036 = vmatmul.msk.bf16.gmra.mxu1 %vm783_vm1, %v4603_v11 }
 0x45b   : > { %v4372_v29 = vpop.f32.mrf.mxu3 }
 0x45c   : > { %v4410_v42 = vadd.f32 %v4372_v29, %v4249_v5 }
 0x45d   : > { %v4085_v54 = vpop.f32.mrf.mxu2 }
 0x45e   : > { %v4216_v47 = vpop.f32.mrf.mxu0  ;;  %v10614_v7 = vpop.f32.mrf.mxu1 }
 0x45f   : > { %v4255_v57 = vadd.f32 %v4216_v47, %v4094_v10 }
 0x462   : > { %7039 = vmatmul.msk.bf16.gmra.mxu2 %vm783_vm1, %v4603_v11 }
 0x463   : > { %v10617_v37 = vpop.f32.mrf.mxu3 }
 0x465   : > { %v4349_v45 = vpop.f32.mrf.mxu2 }
 0x466   : > { %v4409_v6 = vadd.f32 %v4349_v45, %v10556_v51  ;;  %v10620_v12 = vpop.f32.mrf.mxu0  ;;  %v4239_v16 = vpop.f32.mrf.mxu1 }
 0x467   : > { %v4256_v8 = vadd.f32 %v4239_v16, %v4095_v19 }
 0x46b   : > { %v4377_v21 = vpop.f32.mrf.mxu3 }
 0x46c   : > { %v10622_v44 = vadd.f32 %v4377_v21, %v4255_v57 }
 0x46d   : > { %v4351_v38 = vpop.f32.mrf.mxu2 }
 0x46e   : > { %v4221_v50 = vpop.f32.mrf.mxu0  ;;  %v10624_v40 = vpop.f32.mrf.mxu1 }
 0x46f   : > { %v4261_v33 = vadd.f32 %v4221_v50, %v4100_v26 }
 0x473   : > { %v10626_v10 = vpop.f32.mrf.mxu3 }
 0x475   : > { %v4354_v63 = vpop.f32.mrf.mxu2 }
 0x476   : > { %v10628_v48 = vadd.f32 %v4354_v63, %v4254_v25  ;;  %v4223_v13 = vpop.f32.mrf.mxu0  ;;  %v4244_v30 = vpop.f32.mrf.mxu1 }
 0x477   : > { %v4262_v51 = vadd.f32 %v4244_v30, %v4101_v20 }
 0x47b   : > { %v4382_v15 = vpop.f32.mrf.mxu3 }
 0x47c   : > { %v10630_v35 = vadd.f32 %v4382_v15, %v4261_v33 }
 0x47d   : > { %v10632_v19 = vpop.f32.mrf.mxu2 }
 0x47e   : > { %v4246_v2 = vpop.f32.mrf.mxu1  ;;  %v4395_v4 = vpop.f32.mrf.mxu0 }
 0x47f   : > { %v4411_v0 = vadd.f32 %v4395_v4, %v4250_v31 }
 0x481   : > { %v10650_v50 = vpop.permute.xlu0 %4773 }
 0x483   : > { %v4384_v46 = vpop.f32.mrf.mxu3 }
 0x485   : > { %v4359_v28 = vpop.f32.mrf.mxu2 }
 0x486   : > { %v10634_v56 = vadd.f32 %v4359_v28, %v4260_v23  ;;  %v10636_v26 = vpop.f32.mrf.mxu0  ;;  %v4510_v11 = vpop.f32.mrf.mxu1  ;;  %v4090_v28 = vadd.f32 %v10540_v53, %v10444_v14 }
 0x487   : > { %v4570_v25 = vadd.f32 %v4510_v11, %v4409_v6  ;;  %v10644_v23 = vpop.permute.xlu1 %4818 }
 0x489   : > { %v10660_v15 = vpop.permute.xlu0 %4813 }
 0x48b   : > { %v4556_v58 = vpop.f32.mrf.mxu3 }
 0x48c   : > { %v10638_v22 = vadd.f32 %v4556_v58, %v4411_v0  ;;  %v4251_v58 = vadd.f32 %v10572_v49, %v4090_v28 }
 0x48d   : > { %v4361_v5 = vpop.f32.mrf.mxu2 }
 0x48e   : > { %v4400_v9 = vpop.f32.mrf.mxu0  ;;  %v4512_v34 = vpop.f32.mrf.mxu1 }
 0x48f   : > { %v4417_v43 = vadd.f32 %v4400_v9, %v4256_v8  ;;  %v10652_v8 = vpop.permute.xlu2 %4763  ;;  %v4412_v9 = vadd.f32 %v4351_v38, %v4251_v58 }
 0x493   : > { %v10640_v20 = vpop.f32.mrf.mxu3 }
 0x495   : > { %v4533_v24 = vpop.f32.mrf.mxu2 }
 0x496   : > { %v4571_v29 = vadd.f32 %v4533_v24, %v4410_v42  ;;  %v10642_v31 = vpop.f32.mrf.mxu0  ;;  %v4515_v54 = vpop.f32.mrf.mxu1  ;;  %v4573_v24 = vadd.f32 %v4512_v34, %v4412_v9 }
 0x497   : > { %11282 = vst [vmem:[#allocation13_spill] sm:$0xff] %v10642_v31  ;;  %v10656_v42 = vpop.permute.xlu1 %4768  ;;  %v10664_v4 = vpop.permute.xlu2 %4808 }
 0x49b   : > { %v4561_v47 = vpop.f32.mrf.mxu3 }
 0x49c   : > { %v10646_v57 = vadd.f32 %v4561_v47, %v4417_v43 }
 0x49d   : > { %v4535_v45 = vpop.f32.mrf.mxu2 }
 0x49e   : > { %11283 = vst [vmem:[#allocation14_spill] sm:$0xff] %v10646_v57  ;;  %v4405_v6 = vpop.f32.mrf.mxu0  ;;  %v4517_v16 = vpop.f32.mrf.mxu1 }
 0x49f   : > { %v10648_v21 = vadd.f32 %v4405_v6, %v4262_v51  ;;  %v4754_v11 = vpop.permute.xlu1 %4753  ;;  %v10671_v6 = vpop.permute.xlu0 %4798 }
 0x4a1   : > { %11284 = vst [vmem:[#allocation15_spill] sm:$0xff] %v10648_v21 }
 0x4a3   : > { %v10654_v33 = vpop.f32.mrf.mxu3 }
 0x4a4   : > { %11285 = vst [vmem:[#allocation16_spill] sm:$0xff] %v10654_v33  ;;  %v4759_v33 = vpop.permute.xlu2 %4758 }
 0x4a5   : > { %v4538_v63 = vpop.f32.mrf.mxu2 }
 0x4a6   : > { %v4407_v13 = vpop.f32.mrf.mxu0  ;;  %v10658_v30 = vpop.f32.mrf.mxu1 }
 0x4ab   : > { %v10662_v2 = vpop.f32.mrf.mxu3 }
 0x4ac   : > { %11286 = vst [vmem:[#allocation17_spill] sm:$0xff] %v10662_v2 }
 0x4ad   : > { %v10666_v51 = vpop.f32.mrf.mxu2 }
 0x4ae   : > { %v4522_v0 = vpop.f32.mrf.mxu1  ;;  %v4671_v46 = vpop.f32.mrf.mxu0 }
 0x4af   : > { %v4731_v5 = vadd.f32 %v4671_v46, %v4570_v25  ;;  %v4091_v0 = vadd.f32 %v10558_v1, %v10485_v3  ;;  %v4804_v25 = vpop.permute.xlu1 %4803  ;;  %v4576_v3 = vadd.f32 %v4515_v54, %v10628_v48 }
 0x4b1   : > { %v4776_v47 = vmul.f32 %v4754_v11, %v4731_v5  ;;  %v4252_v14 = vadd.f32 %v10611_v27, %v4091_v0 }
 0x4b3   : > { %v4568_v43 = vpop.f32.mrf.mxu3  ;;  %v4821_v53 = vadd.f32 %v10671_v6, %v4776_v47  ;;  %v4413_v34 = vadd.f32 %v10617_v37, %v4252_v14  ;;  %v3931_v47 = vadd.f32 %v10456_v59, %v10431_v60 }
 0x4b5   : > { %v10673_v13 = vpop.f32.mrf.mxu2  ;;  %v4574_v28 = vadd.f32 %v4535_v45, %v4413_v34  ;;  %v4836_v58 = vmax.f32 %v4821_v53, 0.0  ;;  %v4092_v54 = vadd.f32 %v10585_v17, %v3931_v47  ;;  %v4577_v53 = vadd.f32 %v4538_v63, %v10622_v44 }
 0x4b6   : > { %v4673_v62 = vpop.f32.mrf.mxu0  ;;  %v4694_v2 = vpop.f32.mrf.mxu1 }
 0x4b7   : > { %v4734_v21 = vadd.f32 %v4673_v62, %v4573_v24  ;;  %v4732_v38 = vadd.f32 %v4694_v2, %v4571_v29  ;;  %v4096_v62 = vadd.f32 %v10575_v61, %v10494_v55  ;;  %v4253_v60 = vadd.f32 %v10614_v7, %v4092_v54 }
 0x4b8   : > { %v4582_v7 = vadd.f32 %v10658_v30, %v10634_v56 }
 0x4b9   : > { %v4779_v49 = vmul.f32 %v4759_v33, %v4734_v21  ;;  %v4777_v5 = vmul.f32 %v4754_v11, %v4732_v38  ;;  %v4257_v29 = vadd.f32 %v10595_v52, %v4096_v62 }
 0x4bb   : > { %v4824_v46 = vadd.f32 %v4804_v25, %v4779_v49  ;;  %v4822_v37 = vadd.f32 %v10671_v6, %v4777_v5  ;;  %v4418_v2 = vadd.f32 %v10632_v19, %v4257_v29 }
 0x4bd   : > { %v4545_v9 = vpop.f32.mrf.mxu2  ;;  %v4839_v43 = vmax.f32 %v4824_v46, 0.0  ;;  %v4579_v0 = vadd.f32 %v4517_v16, %v4418_v2  ;;  %v4837_v14 = vmax.f32 %v4822_v37, 0.0  ;;  %v4414_v46 = vadd.f32 %v10636_v26, %v4253_v60 }
 0x4be   : > { %v4676_v31 = vpop.f32.mrf.mxu0  ;;  %v4696_v57 = vpop.f32.mrf.mxu1 }
 0x4bf   : > { %v4735_v1 = vadd.f32 %v4696_v57, %v4574_v28  ;;  %v10683_v27 = vpack.c.bf16 %v4839_v43, %v4836_v58  ;;  %v4737_v21 = vadd.f32 %v4676_v31, %v4576_v3  ;;  %v4097_v31 = vadd.f32 %v10587_v32, %v10526_v41 }
 0x4c0   : > { %v4575_v44 = vadd.f32 %v10640_v20, %v4414_v46 }
 0x4c1   : > { %v4780_v45 = vmul.f32 %v4759_v33, %v4735_v1  ;;  %v4782_v55 = vmul.f32 %v10652_v8, %v4737_v21  ;;  %v4258_v16 = vadd.f32 %v10620_v12, %v4097_v31  ;;  %v3937_v21 = vadd.f32 %v10505_v18, %v10470_v36  ;;  %v11287_v36 = vld [vmem:[#allocation14_spill] sm:$0xff] }
 0x4c3   : > { %v4825_v24 = vadd.f32 %v4804_v25, %v4780_v45  ;;  %v4827_v38 = vadd.f32 %v10664_v4, %v4782_v55  ;;  %v4419_v41 = vadd.f32 %v10626_v10, %v4258_v16 }
 0x4c5   : > { %v4717_v61 = vpop.f32.mrf.mxu2  ;;  %v4840_v48 = vmax.f32 %v4825_v24, 0.0  ;;  %v4842_v12 = vmax.f32 %v4827_v38, 0.0 }
 0x4c6   : > { %v4678_v57 = vpop.f32.mrf.mxu0  ;;  %v4699_v52 = vpop.f32.mrf.mxu1  ;;  %v4733_v59 = vadd.f32 %v4717_v61, %v10638_v22  ;;  %v4580_v22 = vadd.f32 %v10666_v51, %v4419_v41 }
 0x4c7   : > { %v4740_v19 = vadd.f32 %v4678_v57, %v4579_v0  ;;  %v10695_v49 = vpack.c.bf16 %v4840_v48, %v4837_v14  ;;  %v4738_v34 = vadd.f32 %v4699_v52, %v4577_v53  ;;  %v4098_v14 = vadd.f32 %v10602_v39, %v3937_v21  ;;  %v11289_v39 = vld [vmem:[#allocation16_spill] sm:$0xff] }
 0x4c8   : > { %v4778_v63 = vmul.f32 %v4754_v11, %v4733_v59  ;;  %v7297_v21 = vld [vmem:[%s11246_s8 + $0x8] sm:$0xff] }
 0x4c9   : > { %v4785_v17 = vmul.f32 %v10656_v42, %v4740_v19  ;;  %v4783_v28 = vmul.f32 %v10652_v8, %v4738_v34  ;;  %v4259_v52 = vadd.f32 %v10624_v40, %v4098_v14 }
 0x4ca   : > { %v4823_v1 = vadd.f32 %v10671_v6, %v4778_v63  ;;  %v4583_v6 = vadd.f32 %v10673_v13, %v10630_v35  ;;  %v11288_v13 = vld [vmem:[#allocation13_spill] sm:$0xff] }
 0x4cb   : > { %v4830_v32 = vadd.f32 %v10660_v15, %v4785_v17  ;;  %v4828_v29 = vadd.f32 %v10664_v4, %v4783_v28  ;;  %v4420_v53 = vadd.f32 %v11288_v13, %v4259_v52  ;;  %v11291_v63 = vld [vmem:[#allocation17_spill] sm:$0xff] }
 0x4cc   : > { %v4838_v45 = vmax.f32 %v4823_v1, 0.0 }
 0x4cd   : > { %v4719_v58 = vpop.f32.mrf.mxu2  ;;  %v4845_v5 = vmax.f32 %v4830_v32, 0.0  ;;  %v4581_v60 = vadd.f32 %v11289_v39, %v4420_v53 }
 0x4ce   : > { %v4736_v9 = vadd.f32 %v4719_v58, %v4575_v44  ;;  %v4681_v43 = vpop.f32.mrf.mxu0  ;;  %v4701_v26 = vpop.f32.mrf.mxu1 }
 0x4cf   : > { %v4743_v62 = vadd.f32 %v4681_v43, %v4582_v7  ;;  %v4741_v10 = vadd.f32 %v4701_v26, %v4580_v22  ;;  %v4855_v3 = vpack.c.bf16 %v4845_v5, %v4842_v12  ;;  %v11290_v7 = vld [vmem:[#allocation15_spill] sm:$0xff] }
 0x4d0   : > { %v4781_v20 = vmul.f32 %v4759_v33, %v4736_v9  ;;  %v4843_v33 = vmax.f32 %v4828_v29, 0.0  ;;  %v4584_v22 = vadd.f32 %v11291_v63, %v11290_v7 }
 0x4d1   : > { %v4788_v56 = vmul.f32 %v10650_v50, %v4743_v62  ;;  %v4786_v30 = vmul.f32 %v10656_v42, %v4741_v10 }
 0x4d2   : > { %v4826_v51 = vadd.f32 %v4804_v25, %v4781_v20  ;;  %v7296_v20 = vld [vmem:[%s11246_s8] sm:$0xff] }
 0x4d3   : > { %v4833_v11 = vadd.f32 %v10644_v23, %v4788_v56  ;;  %v4831_v37 = vadd.f32 %v10660_v15, %v4786_v30  ;;  %v4919_v30 = vld [vmem:[%s645_s21 + $0x8] sm:$0x3f] }
 0x4d4   : > { %v4841_v2 = vmax.f32 %v4826_v51, 0.0 }
 0x4d5   : > { %v4848_v24 = vmax.f32 %v4833_v11, 0.0  ;;  %v4722_v47 = vpop.f32.mrf.mxu2  ;;  %v4846_v0 = vmax.f32 %v4831_v37, 0.0 }
 0x4d6   : > { %v4683_v55 = vpop.f32.mrf.mxu0  ;;  %v4704_v25 = vpop.f32.mrf.mxu1  ;;  %v4854_v61 = vpack.c.bf16 %v4841_v2, %v4838_v45  ;;  %v4739_v18 = vadd.f32 %v4722_v47, %v11287_v36 }
 0x4d7   : > { %v4744_v48 = vadd.f32 %v4704_v25, %v4583_v6  ;;  %v4858_v54 = vpack.c.bf16 %v4848_v24, %v4848_v24  ;;  %v4856_v57 = vpack.c.bf16 %v4846_v0, %v4843_v33  ;;  %v4920_v33 = vld [vmem:[%s645_s21 + $0x10] sm:$0x3f]  ;;  %v10783_v25 = vpop.permute.xlu0 %5031 }
 0x4d8   : > { %v4784_v59 = vmul.f32 %v10652_v8, %v4739_v18  ;;  %v4851_v8 = vld [vmem:[%s11244_s6] sm:$0x7] }
 0x4d9   : > { %v4789_v31 = vmul.f32 %v10650_v50, %v4744_v48  ;;  %v4871_v35 = vsel %vm793_vm0, %v4858_v54, 0 }
 0x4da   : > { %4884 = vmatpush.bf16.msra.mxu3 %v4871_v35  ;;  %v4829_v46 = vadd.f32 %v10664_v4, %v4784_v59  ;;  %v5099_v35 = vld [vmem:[%s11293_s19] sm:$0x7] }
 0x4db   : > { %v4834_v19 = vadd.f32 %v10644_v23, %v4789_v31  ;;  %v5101_v39 = vperm.slane %v5099_v35, 0  ;;  %v5102_v59 = vperm.slane %v5099_v35, 1 }
 0x4dc   : > { %v4844_v12 = vmax.f32 %v4829_v46, 0.0 }
 0x4dd   : > { %v4849_v16 = vmax.f32 %v4834_v19, 0.0  ;;  %v4724_v38 = vpop.f32.mrf.mxu2 }
 0x4de   : > { %v4742_v17 = vadd.f32 %v4724_v38, %v4581_v60  ;;  %v4706_v34 = vpop.f32.mrf.mxu1  ;;  %4885 = vmatpush.bf16.msra.mxu3 %v4855_v3 }
 0x4df   : > { %v4859_v40 = vpack.c.bf16 %v4849_v16, %v4849_v16  ;;  %v10787_v54 = vpop.permute.xlu0 %5072 }
 0x4e0   : > { %v4787_v41 = vmul.f32 %v10656_v42, %v4742_v17 }
 0x4e1   : > { %v4874_v32 = vsel %vm793_vm0, %v4859_v40, 0 }
 0x4e2   : > { %v4832_v44 = vadd.f32 %v10660_v15, %v4787_v41  ;;  %4886 = vmatpush.bf16.msra.mxu3 %v10683_v27 }
 0x4e4   : > { %v4847_v28 = vmax.f32 %v4832_v44, 0.0 }
 0x4e5   : > { %v4727_v58 = vpop.f32.mrf.mxu2  ;;  %7040 = vmatmul.msk.bf16.vlgmr.msra.gmra.mxu3 %vm783_vm1, %v4851_v8 }
 0x4e6   : > { %4897 = vmatpush.bf16.msrb.mxu3 %v4874_v32  ;;  %v4745_v42 = vadd.f32 %v4727_v58, %v4584_v22  ;;  %v4857_v4 = vpack.c.bf16 %v4847_v28, %v4844_v12 }
 0x4e7   : > { %v5058_v18 = vpop.permute.xlu0 %5057 }
 0x4e8   : > { %v4790_v15 = vmul.f32 %v10650_v50, %v4745_v42 }
 0x4ea   : > { %4898 = vmatpush.bf16.msrb.mxu3 %v4856_v57  ;;  %v4835_v27 = vadd.f32 %v10644_v23, %v4790_v15  ;;  %v4865_v23 = vpop.permute.xlu2 %4864 }
 0x4ec   : > { %v4850_v5 = vmax.f32 %v4835_v27, 0.0 }
 0x4ed   : > { %v4729_v9 = vpop.f32.mrf.mxu2 }
 0x4ee   : > { %4899 = vmatpush.bf16.msrb.mxu3 %v10695_v49  ;;  %v4860_v43 = vpack.c.bf16 %v4850_v5, %v4850_v5  ;;  %v4918_v49 = vld [vmem:[%s645_s21] sm:$0x3f] }
 0x4f0   : > { %v4877_v26 = vsel %vm793_vm0, %v4860_v43, 0 }
 0x4f2   : > { %4910 = vmatpush.bf16.msra.mxu3 %v4877_v26  ;;  %v5068_v16 = vpop.permute.xlu2 %5067 }
 0x4f5   : > { %7041 = vmatmul.msk.bf16.vlgmr.msrb.gmra.mxu3 %vm783_vm1, %v4851_v8 }
 0x4f6   : > { %4911 = vmatpush.bf16.msra.mxu3 %v4857_v4 }
 0x4fa   : > { %4912 = vmatpush.bf16.msra.mxu3 %v4854_v61  ;;  %v10785_v61 = vpop.permute.xlu1 %5036  ;;  %v5027_v44 = vpop.permute.xlu2 %5026 }
 0x502   : > { %v5022_v57 = vpop.permute.xlu1 %5021 }
 0x505   : > { %7042 = vmatmul.msk.bf16.vlgmr.msra.gmra.mxu3 %vm783_vm1, %v4851_v8  ;;  %vm4941_vm1 = vcmask 48128  }
 0x50a   : > { %v5063_v28 = vpop.permute.xlu1 %5062 }
 0x568   : > { %v4888_v50 = vpop.f32.mrf.mxu3 }
 0x569   : > { %v4889_v62 = vadd.f32 %v4888_v50, %v4865_v23 }
 0x56b   : > { %v10756_v10 = vadd.f32 %v4918_v49, %v4889_v62 }
 0x56d   : > { %v4928_v3 = vpack.c.bf16 %v10756_v10, %v10756_v10 }
 0x56f   : > { %v4950_v1 = vsel %vm4948_vm3, %v4928_v3, 0 }
 0x570   : > { %v4890_v29 = vpop.f32.mrf.mxu3  ;;  %4965 = vmatpush.bf16.msrb.mxu0 %v4950_v1 }
 0x571   : > { %v11294_v29 = vmov 0  }
 0x572   : > { %655 = vst.msk [vmem:[#allocation2 + $0x20] sm:$0xf] %vm652_vm4, %v11294_v29 }
 0x573   : > { %7051 = vmatmul.msk.bf16.vlgmr.msrb.gmra.mxu0 %vm4941_vm1, %v7296_v20  ;;  %653 = vst.msk [vmem:[#allocation2] sm:$0xf] %vm652_vm4, %v11294_v29 }
 0x574   : > { %654 = vst.msk [vmem:[#allocation2 + $0x10] sm:$0xf] %vm652_vm4, %v11294_v29 }
 0x575   : > { %656 = vst.msk [vmem:[#allocation2 + $0x30] sm:$0xf] %vm652_vm4, %v11294_v29 }
 0x576   : > { %658 = vst.msk [vmem:[#allocation2 + $0xc] sm:$0xf] %vm657_vm5, %v11294_v29 }
 0x577   : > { %659 = vst.msk [vmem:[#allocation2 + $0x1c] sm:$0xf] %vm657_vm5, %v11294_v29 }
 0x578   : > { %v4901_v56 = vpop.f32.mrf.mxu3  ;;  %660 = vst.msk [vmem:[#allocation2 + $0x2c] sm:$0xf] %vm657_vm5, %v11294_v29 }
 0x579   : > { %v4902_v51 = vadd.f32 %v4901_v56, %v4865_v23  ;;  %661 = vst.msk [vmem:[#allocation2 + $0x3c] sm:$0xf] %vm657_vm5, %v11294_v29 }
 0x57b   : > { %v10765_v11 = vadd.f32 %v4919_v30, %v4902_v51 }
 0x57d   : > { %v4929_v37 = vpack.c.bf16 %v10765_v11, %v10765_v11 }
 0x57f   : > { %v4953_v45 = vsel %vm4948_vm3, %v4929_v37, 0 }
 0x580   : > { %v4903_v2 = vpop.f32.mrf.mxu3  ;;  %4984 = vmatpush.bf16.msrb.mxu1 %v4953_v45 }
 0x583   : > { %7052 = vmatmul.msk.bf16.gmra.mxu0 %vm4941_vm1, %v7297_v21  ;;  %7053 = vmatmul.msk.bf16.vlgmr.msrb.gmra.mxu1 %vm4941_vm1, %v7296_v20 }
 0x588   : > { %v4914_v6 = vpop.f32.mrf.mxu3 }
 0x589   : > { %v4915_v24 = vadd.f32 %v4914_v6, %v4865_v23 }
 0x58b   : > { %v10775_v47 = vadd.f32 %v4920_v33, %v4915_v24 }
 0x58d   : > { %v4930_v0 = vpack.c.bf16 %v10775_v47, %v10775_v47 }
 0x58f   : > { %v4956_v14 = vsel %vm4948_vm3, %v4930_v0, 0  ;;  %vm6062_vm3 = vcmask 646144  }
 0x590   : > { %v4916_v55 = vpop.f32.mrf.mxu3  ;;  %5003 = vmatpush.bf16.msrb.mxu2 %v4956_v14  ;;  %v5103_v14 = vperm.slane %v5099_v35, 2 }
 0x593   : > { %7054 = vmatmul.msk.bf16.gmra.mxu1 %vm4941_vm1, %v7297_v21  ;;  %7055 = vmatmul.msk.bf16.vlgmr.msrb.gmra.mxu2 %vm4941_vm1, %v7296_v20 }
 0x5a3   : > { %7056 = vmatmul.msk.bf16.gmra.mxu2 %vm4941_vm1, %v7297_v21 }
 0x5f0   : > { %v4967_v48 = vpop.f32.mrf.mxu0 }
 0x5f1   : > { %v5039_v52 = vmul.f32 %v5022_v57, %v4967_v48 }
 0x5f3   : > { %v5075_v31 = vadd.f32 %v5058_v18, %v5039_v52 }
 0x5f5   : > { %v5087_v19 = vmax.f32 %v5075_v31, 0.0 }
 0x5f7   : > { %v5107_v34 = vmul.f32 %v5101_v39, %v5087_v19 }
 0x5f8   : > { %v4969_v36 = vpop.f32.mrf.mxu0 }
 0x5f9   : > { %v5042_v58 = vmul.f32 %v5027_v44, %v4969_v36 }
 0x5fb   : > { %v5078_v43 = vadd.f32 %v5063_v28, %v5042_v58 }
 0x5fd   : > { %v5090_v56 = vmax.f32 %v5078_v43, 0.0 }
 0x5ff   : > { %v5110_v6 = vmul.f32 %v5101_v39, %v5090_v56 }
 0x600   : > { %v4986_v13 = vpop.f32.mrf.mxu1  ;;  %v4972_v17 = vpop.f32.mrf.mxu0 }
 0x601   : > { %v5040_v53 = vmul.f32 %v5022_v57, %v4986_v13  ;;  %v5045_v32 = vmul.f32 %v10783_v25, %v4972_v17 }
 0x603   : > { %v5076_v60 = vadd.f32 %v5058_v18, %v5040_v53  ;;  %v5081_v8 = vadd.f32 %v5068_v16, %v5045_v32 }
 0x605   : > { %v5088_v38 = vmax.f32 %v5076_v60, 0.0  ;;  %v5093_v42 = vmax.f32 %v5081_v8, 0.0 }
 0x607   : > { %v5108_v40 = vmul.f32 %v5102_v59, %v5088_v38  ;;  %v5113_v26 = vmul.f32 %v5101_v39, %v5093_v42 }
 0x608   : > { %v4988_v46 = vpop.f32.mrf.mxu1  ;;  %v4974_v7 = vpop.f32.mrf.mxu0 }
 0x609   : > { %v5119_v41 = vpack.c.bf16 %v5108_v40, %v5107_v34  ;;  %v5043_v63 = vmul.f32 %v5027_v44, %v4988_v46  ;;  %v5048_v4 = vmul.f32 %v10785_v61, %v4974_v7 }
 0x60b   : > { %5135 = vrot.lane.b32.xlu1 %v5119_v41, %s7588_s22  ;;  %v5079_v27 = vadd.f32 %v5063_v28, %v5043_v63  ;;  %v5084_v23 = vadd.f32 %v10787_v54, %v5048_v4 }
 0x60d   : > { %v5091_v49 = vmax.f32 %v5079_v27, 0.0  ;;  %v5096_v30 = vmax.f32 %v5084_v23, 0.0 }
 0x60f   : > { %v5111_v37 = vmul.f32 %v5102_v59, %v5091_v49  ;;  %v5116_v33 = vmul.f32 %v5101_v39, %v5096_v30 }
 0x610   : > { %v4991_v22 = vpop.f32.mrf.mxu1 }
 0x611   : > { %v5046_v12 = vmul.f32 %v10783_v25, %v4991_v22  ;;  %v5121_v55 = vpack.c.bf16 %v5111_v37, %v5110_v6 }
 0x613   : > { %v5082_v15 = vadd.f32 %v5068_v16, %v5046_v12 }
 0x615   : > { %v5094_v5 = vmax.f32 %v5082_v15, 0.0 }
 0x616   : > { %v5005_v9 = vpop.f32.mrf.mxu2 }
 0x617   : > { %v5114_v50 = vmul.f32 %v5102_v59, %v5094_v5  ;;  %v5041_v1 = vmul.f32 %v5022_v57, %v5005_v9 }
 0x618   : > { %v4993_v62 = vpop.f32.mrf.mxu1 }
 0x619   : > { %v5123_v3 = vpack.c.bf16 %v5114_v50, %v5113_v26  ;;  %v5049_v20 = vmul.f32 %v10785_v61, %v4993_v62  ;;  %v5077_v21 = vadd.f32 %v5058_v18, %v5041_v1 }
 0x61b   : > { %v5085_v51 = vadd.f32 %v10787_v54, %v5049_v20  ;;  %5143 = vrot.lane.b32.xlu2 %v5123_v3, %s7588_s22  ;;  %v5089_v0 = vmax.f32 %v5077_v21, 0.0 }
 0x61d   : > { %v5097_v45 = vmax.f32 %v5085_v51, 0.0  ;;  %v5109_v57 = vmul.f32 %v5103_v14, %v5089_v0 }
 0x61e   : > { %v5007_v2 = vpop.f32.mrf.mxu2 }
 0x61f   : > { %v5117_v24 = vmul.f32 %v5102_v59, %v5097_v45  ;;  %v5044_v36 = vmul.f32 %v5027_v44, %v5007_v2  ;;  %v5120_v31 = vpack.c.bf16 %v5109_v57, %v5109_v57 }
 0x621   : > { %v5125_v48 = vpack.c.bf16 %v5117_v24, %v5116_v33  ;;  %v5080_v53 = vadd.f32 %v5063_v28, %v5044_v36 }
 0x623   : > { %5139 = vrot.lane.b32.xlu2 %v5121_v55, %s7588_s22  ;;  %5147 = vrot.lane.b32.xlu0 %v5125_v48, %s7588_s22  ;;  %v5092_v35 = vmax.f32 %v5080_v53, 0.0 }
 0x625   : > { %v5112_v34 = vmul.f32 %v5103_v14, %v5092_v35 }
 0x626   : > { %v5010_v52 = vpop.f32.mrf.mxu2 }
 0x627   : > { %v5047_v18 = vmul.f32 %v10783_v25, %v5010_v52  ;;  %v5122_v25 = vpack.c.bf16 %v5112_v34, %v5112_v34  ;;  %v10939_v34 = vld [vmem:[#allocation7 + $0x8] sm:$0xff] }
 0x629   : > { %v5083_v13 = vadd.f32 %v5068_v16, %v5047_v18 }
 0x62b   : > { %v5095_v19 = vmax.f32 %v5083_v13, 0.0  ;;  %5137 = vrot.lane.b32.xlu2 %v5120_v31, %s7588_s22 }
 0x62d   : > { %v5115_v39 = vmul.f32 %v5103_v14, %v5095_v19 }
 0x62e   : > { %v5012_v60 = vpop.f32.mrf.mxu2 }
 0x62f   : > { %v5124_v59 = vpack.c.bf16 %v5115_v39, %v5115_v39  ;;  %v5050_v38 = vmul.f32 %v10785_v61, %v5012_v60 }
 0x631   : > { %v5086_v17 = vadd.f32 %v10787_v54, %v5050_v38  ;;  %5145 = vrot.lane.b32.xlu0 %v5124_v59, %s7588_s22  ;;  %v10927_v38 = vld [vmem:[#allocation7] sm:$0xff] }
 0x633   : > { %v5098_v40 = vmax.f32 %v5086_v17, 0.0 }
 0x635   : > { %v5118_v46 = vmul.f32 %v5103_v14, %v5098_v40 }
 0x637   : > { %v5126_v41 = vpack.c.bf16 %v5118_v46, %v5118_v46 }
 0x639   : > { %5149 = vrot.lane.b32.xlu1 %v5126_v41, %s7588_s22  ;;  %5141 = vrot.lane.b32.xlu0 %v5122_v25, %s7588_s22  ;;  %s11302_s22 = sld [smem:[#allocation26_spill]] }
 0x675   : > { %v5144_v61 = vpop.permute.xlu2 %5143 }
 0x676   : > { %v5155_v16 = vrot.slane %v5144_v61, 4 }
 0x678   : > { %v5167_v32 = vsel %vm5159_vm12, %v5155_v16, %v5144_v61 }
 0x679   : > { %5190 = vst.msk [vmem:[#allocation2 + $0x20] sm:$0xff] %vm10817_vm13, %v5167_v32 }
 0x67d   : > { %v5136_v44 = vpop.permute.xlu1 %5135  ;;  %v5140_v8 = vpop.permute.xlu2 %5139 }
 0x67e   : > { %v5151_v7 = vrot.slane %v5136_v44, 4  ;;  %v5153_v63 = vrot.slane %v5140_v8, 4 }
 0x680   : > { %v5160_v22 = vsel %vm5159_vm12, %v5151_v7, %v5136_v44  ;;  %v5164_v12 = vsel %vm5159_vm12, %v5153_v63, %v5140_v8  ;;  %v7303_v50 = vld [vmem:[#allocation2 + $0x24] sm:$0xf]  ;;  %v7083_v49 = vld [vmem:[#allocation2 + $0x20] sm:$0xf]  ;;  %v7306_v44 = vld [vmem:[#allocation7 + $0x10] sm:$0xff] }
 0x681   : > { %5184 = vst.msk [vmem:[#allocation2] sm:$0xff] %vm10817_vm13, %v5160_v22 }
 0x682   : > { %5188 = vst.msk [vmem:[#allocation2 + $0x10] sm:$0xff] %vm10817_vm13, %v5164_v12 }
 0x685   : > { %v5138_v28 = vpop.permute.xlu2 %5137 }
 0x686   : > { %v5152_v58 = vrot.slane %v5138_v28, 4 }
 0x688   : > { %v7067_v4 = vld [vmem:[#allocation2] sm:$0xf]  ;;  %v5162_v15 = vsel %vm793_vm0, %v5151_v7, %v5152_v58  ;;  %v7300_v30 = vld [vmem:[#allocation2 + $0x4] sm:$0xf] }
 0x689   : > { %v7301_v27 = vld [vmem:[#allocation2 + $0xc] sm:$0xf0]  ;;  %v5163_v5 = vsel %vm5159_vm12, %v5162_v15, %v5138_v28  ;;  %v7069_v51 = vld [vmem:[#allocation2 + $0x10] sm:$0xf0] }
 0x68a   : > { %v10837_v9 = vor.u32 %v7301_v27, %v7067_v4  ;;  %5187 = vst.msk [vmem:[#allocation2 + $0x8] sm:$0xff] %vm10831_vm15, %v5163_v5  ;;  %v10860_v45 = vor.u32 %v7300_v30, %v7069_v51  ;;  %v7307_v15 = vld [vmem:[#allocation7 + $0x18] sm:$0xff] }
 0x68c   : > { %5257 = vrot.lane.b32.xlu0 %v10837_v9, %s7589_s14 }
 0x691   : > { %v7075_v53 = vld [vmem:[#allocation2 + $0x8] sm:$0xf]  ;;  %v7308_v35 = vld [vmem:[#allocation2 + $0xc] sm:$0xf] }
 0x692   : > { %v7113_v5 = vld [vmem:[#allocation2 + $0x8] sm:$0xf] }
 0x695   : > { %v5148_v43 = vpop.permute.xlu0 %5147 }
 0x696   : > { %v5157_v26 = vrot.slane %v5148_v43, 4 }
 0x698   : > { %v5170_v23 = vsel %vm5159_vm12, %v5157_v26, %v5148_v43 }
 0x699   : > { %5192 = vst.msk [vmem:[#allocation2 + $0x30] sm:$0xff] %vm10817_vm13, %v5170_v23 }
 0x6a0   : > { %v7085_v62 = vld [vmem:[#allocation2 + $0x30] sm:$0xf0]  ;;  %v7304_v3 = vld [vmem:[#allocation2 + $0x2c] sm:$0xf0] }
 0x6a1   : > { %v10846_v1 = vor.u32 %v7304_v3, %v7083_v49  ;;  %v10848_v20 = vor.u32 %v7303_v50, %v7085_v62 }
 0x6a3   : > { %v5146_v29 = vpop.permute.xlu0 %5145  ;;  %5265 = vrot.lane.b32.xlu1 %v10846_v1, %s7589_s14  ;;  %5388 = vmatpush.bf16.msra.mxu2 %v10846_v1 }
 0x6a4   : > { %v5156_v56 = vrot.slane %v5146_v29, 4  ;;  %5267 = vrot.lane.b32.xlu2 %v10848_v20, %s7589_s14 }
 0x6a6   : > { %v5168_v37 = vsel %vm793_vm0, %v5155_v16, %v5156_v56 }
 0x6a7   : > { %v5169_v21 = vsel %vm5159_vm12, %v5168_v37, %v5146_v29  ;;  %5389 = vmatpush.bf16.msra.mxu2 %v10837_v9 }
 0x6a8   : > { %5191 = vst.msk [vmem:[#allocation2 + $0x28] sm:$0xff] %vm10831_vm15, %v5169_v21 }
 0x6aa   : > { %7119 = vmatmul.msk.bf16.vlgmr.msra.gmra.mxu2 %vm2322_vm11, %v10927_v38 }
 0x6ab   : > { %v5150_v2 = vpop.permute.xlu1 %5149  ;;  %v5142_v6 = vpop.permute.xlu0 %5141  ;;  %5259 = vrot.lane.b32.xlu1 %v10860_v45, %s7589_s14 }
 0x6ac   : > { %v5158_v33 = vrot.slane %v5150_v2, 4  ;;  %v5154_v24 = vrot.slane %v5142_v6, 4 }
 0x6ae   : > { %v5171_v0 = vsel %vm793_vm0, %v5157_v26, %v5158_v33  ;;  %v5165_v14 = vsel %vm793_vm0, %v5153_v63, %v5154_v24  ;;  %vm5273_vm0 = vcmask 1039360   ;;  %v7312_v33 = vld [vmem:[#allocation7 + $0x20] sm:$0xff] }
 0x6af   : > { %v5172_v55 = vsel %vm5159_vm12, %v5171_v0, %v5150_v2  ;;  %v5166_v48 = vsel %vm5159_vm12, %v5165_v14, %v5142_v6  ;;  %v7091_v57 = vld [vmem:[#allocation2 + $0x28] sm:$0xf]  ;;  %v7310_v36 = vld [vmem:[#allocation2 + $0x2c] sm:$0xf] }
 0x6b0   : > { %5193 = vst.msk [vmem:[#allocation2 + $0x38] sm:$0xff] %vm10831_vm15, %v5172_v55  ;;  %v7117_v58 = vld [vmem:[#allocation2 + $0x28] sm:$0xf] }
 0x6b1   : > { %5189 = vst.msk [vmem:[#allocation2 + $0x18] sm:$0xff] %vm10831_vm15, %v5166_v48 }
 0x6b7   : > { %v7311_v52 = vld [vmem:[#allocation2 + $0x34] sm:$0xf0]  ;;  %v7093_v18 = vld [vmem:[#allocation2 + $0x38] sm:$0xf0] }
 0x6b8   : > { %v10872_v31 = vor.u32 %v7311_v52, %v7091_v57  ;;  %v10874_v13 = vor.u32 %v7310_v36, %v7093_v18  ;;  %v7309_v19 = vld [vmem:[#allocation2 + $0x14] sm:$0xf0]  ;;  %v7077_v60 = vld [vmem:[#allocation2 + $0x18] sm:$0xf0]  ;;  %v7313_v36 = vld [vmem:[#allocation7 + $0x28] sm:$0xff] }
 0x6b9   : > { %v10876_v39 = vor.u32 %v7309_v19, %v7075_v53  ;;  %v10884_v59 = vor.u32 %v7308_v35, %v7077_v60  ;;  %v7305_v7 = vld [vmem:[#allocation2 + $0x34] sm:$0xf0]  ;;  %v6306_v53 = vld [vmem:[%s11251_s13 + $0x10] sm:$0xff] }
 0x6ba   : > { %5269 = vrot.lane.b32.xlu2 %v10872_v31, %s7589_s14  ;;  %5271 = vrot.lane.b32.xlu0 %v10874_v13, %s7589_s14  ;;  %v7118_v4 = vor.u32 %v7305_v7, %v7117_v58  ;;  %v7302_v27 = vld [vmem:[#allocation2 + $0x14] sm:$0xf0]  ;;  %v6407_v58 = vld [vmem:[%s11299_s26] sm:$0x3f] }
 0x6bb   : > { %5261 = vrot.lane.b32.xlu1 %v10876_v39, %s7589_s14  ;;  %7120 = vmatmul.msk.bf16.gmra.mxu2 %vm2322_vm11, %v10939_v34  ;;  %v7114_v26 = vor.u32 %v7302_v27, %v7113_v5 }
 0x6c2   : > { %5263 = vrot.lane.b32.xlu2 %v10884_v59, %s7589_s14  ;;  %5462 = vrot.lane.b32.xlu0 %v10846_v1, %s7563_s16  ;;  %s650_s14 = scalar_lea.vmem %s11302_s22, %s7329_s18 }
 0x6c3   : > { %5464 = vrot.lane.b32.xlu1 %v10848_v20, %s7563_s16 }
 0x6ca   : > { %5454 = vrot.lane.b32.xlu2 %v10837_v9, %s7563_s16  ;;  %5456 = vrot.lane.b32.xlu0 %v10860_v45, %s7563_s16 }
 0x6cb   : > { %5466 = vrot.lane.b32.xlu1 %v10872_v31, %s7563_s16 }
 0x6d2   : > { %5468 = vrot.lane.b32.xlu2 %v10874_v13, %s7563_s16  ;;  %5458 = vrot.lane.b32.xlu0 %v10876_v39, %s7563_s16 }
 0x6d3   : > { %5460 = vrot.lane.b32.xlu1 %v10884_v59, %s7563_s16  ;;  %s7591_s16 = smov 102  }
 0x6da   : > { %5580 = vrot.lane.b32.xlu2 %v10846_v1, %s7581_s17  ;;  %5582 = vrot.lane.b32.xlu0 %v10848_v20, %s7581_s17 }
 0x6db   : > { %5584 = vrot.lane.b32.xlu1 %v10872_v31, %s7581_s17 }
 0x6e2   : > { %5572 = vrot.lane.b32.xlu2 %v10837_v9, %s7581_s17  ;;  %5574 = vrot.lane.b32.xlu0 %v10860_v45, %s7581_s17 }
 0x6e3   : > { %5576 = vrot.lane.b32.xlu1 %v10876_v39, %s7581_s17 }
 0x6ea   : > { %5698 = vrot.lane.b32.xlu2 %v10846_v1, %s7590_s30  ;;  %5700 = vrot.lane.b32.xlu0 %v10848_v20, %s7590_s30 }
 0x6eb   : > { %5690 = vrot.lane.b32.xlu1 %v10837_v9, %s7590_s30 }
 0x6f2   : > { %5692 = vrot.lane.b32.xlu2 %v10860_v45, %s7590_s30  ;;  %5586 = vrot.lane.b32.xlu0 %v10874_v13, %s7581_s17 }
 0x6f3   : > { %5578 = vrot.lane.b32.xlu1 %v10884_v59, %s7581_s17  ;;  %s7592_s17 = smov 79  }
 0x6fa   : > { %5702 = vrot.lane.b32.xlu2 %v10872_v31, %s7590_s30  ;;  %5704 = vrot.lane.b32.xlu0 %v10874_v13, %s7590_s30 }
 0x6fb   : > { %5694 = vrot.lane.b32.xlu1 %v10876_v39, %s7590_s30 }
 0x6fe   : > { %v5268_v17 = vpop.permute.xlu2 %5267  ;;  %v5258_v54 = vpop.permute.xlu0 %5257 }
 0x702   : > { %5696 = vrot.lane.b32.xlu2 %v10884_v59, %s7590_s30  ;;  %5819 = vrot.lane.b32.xlu0 %v10848_v20, %s7591_s16 }
 0x703   : > { %5821 = vrot.lane.b32.xlu1 %v10872_v31, %s7591_s16 }
 0x70a   : > { %5811 = vrot.lane.b32.xlu2 %v10860_v45, %s7591_s16  ;;  %5813 = vrot.lane.b32.xlu0 %v10876_v39, %s7591_s16 }
 0x70b   : > { %5817 = vrot.lane.b32.xlu1 %v10846_v1, %s7591_s16 }
 0x712   : > { %5809 = vrot.lane.b32.xlu2 %v10837_v9, %s7591_s16  ;;  %5815 = vrot.lane.b32.xlu0 %v10884_v59, %s7591_s16 }
 0x713   : > { %5936 = vrot.lane.b32.xlu1 %v10846_v1, %s7567_s25 }
 0x714   : > { %v5270_v40 = vpop.permute.xlu2 %5269 }
 0x715   : > { %v5278_v46 = vsel %vm5273_vm0, %v5268_v17, %v5270_v40  ;;  %v5266_v25 = vpop.permute.xlu1 %5265 }
 0x716   : > { %v5277_v41 = vsel %vm5273_vm0, %v5266_v25, %v5268_v17  ;;  %5318 = vmatpush.bf16.msra.mxu0 %v5278_v46  ;;  %v6268_v17 = vld [vmem:[%s11250_s12] sm:$0xff] }
 0x717   : > { %5299 = vmatpush.bf16.msrb.mxu3 %v5277_v41 }
 0x71a   : > { %5938 = vrot.lane.b32.xlu2 %v10848_v20, %s7567_s25  ;;  %5823 = vrot.lane.b32.xlu0 %v10874_v13, %s7591_s16 }
 0x71b   : > { %5928 = vrot.lane.b32.xlu1 %v10837_v9, %s7567_s25 }
 0x71c   : > { %v5264_v61 = vpop.permute.xlu2 %5263 }
 0x71d   : > { %v5260_v16 = vpop.permute.xlu1 %5259 }
 0x71e   : > { %v5274_v32 = vsel %vm5273_vm0, %v5258_v54, %v5260_v16 }
 0x71f   : > { %5300 = vmatpush.bf16.msrb.mxu3 %v5274_v32  ;;  %v6359_v32 = vld [vmem:[%s11253_s15] sm:$0x3f] }
 0x722   : > { %5930 = vrot.lane.b32.xlu2 %v10860_v45, %s7567_s25  ;;  %5940 = vrot.lane.b32.xlu0 %v10872_v31, %s7567_s25 }
 0x723   : > { %5407 = vmatpush.bf16.msra.mxu3 %v10848_v20  ;;  %5942 = vrot.lane.b32.xlu1 %v10874_v13, %s7567_s25 }
 0x724   : > { %7097 = vmatmul.msk.bf16.vlgmr.msrb.gmra.mxu3 %vm2322_vm11, %v7306_v44  ;;  %v5455_v8 = vpop.permute.xlu2 %5454 }
 0x727   : > { %5408 = vmatpush.bf16.msra.mxu3 %v10860_v45 }
 0x72a   : > { %5932 = vrot.lane.b32.xlu2 %v10876_v39, %s7567_s25  ;;  %5934 = vrot.lane.b32.xlu0 %v10884_v59, %s7567_s25 }
 0x72b   : > { %6054 = vrot.lane.b32.xlu1 %v10846_v1, %s7592_s17 }
 0x72c   : > { %v5469_v63 = vpop.permute.xlu2 %5468  ;;  %v5272_v22 = vpop.permute.xlu0 %5271 }
 0x72d   : > { %v5279_v12 = vsel %vm5273_vm0, %v5270_v40, %v5272_v22  ;;  %v5262_v28 = vpop.permute.xlu1 %5261  ;;  %v6269_v40 = vld [vmem:[%s11250_s12 + $0x8] sm:$0xff] }
 0x72e   : > { %v5275_v42 = vsel %vm5273_vm0, %v5260_v16, %v5262_v28  ;;  %5337 = vmatpush.bf16.msra.mxu1 %v5279_v12  ;;  %v5276_v43 = vsel %vm5273_vm0, %v5262_v28, %v5264_v61  ;;  %v6305_v16 = vld [vmem:[%s11251_s13 + $0x8] sm:$0xff] }
 0x72f   : > { %5319 = vmatpush.bf16.msra.mxu0 %v5275_v42  ;;  %v6416_v42 = vld [vmem:[%s11300_s2] sm:$0x3f] }
 0x732   : > { %7099 = vmatmul.msk.bf16.vlgmr.msra.gmra.mxu0 %vm2322_vm11, %v7306_v44  ;;  %6056 = vrot.lane.b32.xlu2 %v10848_v20, %s7592_s17 }
 0x733   : > { %5426 = vmatpush.bf16.msrb.mxu0 %v7118_v4  ;;  %6058 = vrot.lane.b32.xlu0 %v10872_v31, %s7592_s17 }
 0x734   : > { %6046 = vrot.lane.b32.xlu1 %v10837_v9, %s7592_s17  ;;  %7098 = vmatmul.msk.bf16.gmra.mxu3 %vm2322_vm11, %v7307_v15  ;;  %v5581_v23 = vpop.permute.xlu2 %5580  ;;  %v5463_v50 = vpop.permute.xlu0 %5462 }
 0x735   : > { %5338 = vmatpush.bf16.msra.mxu1 %v5276_v43  ;;  %v5465_v49 = vpop.permute.xlu1 %5464 }
 0x736   : > { %v5473_v62 = vsel %vm767_vm2, %v5463_v50, %v5465_v49 }
 0x737   : > { %5427 = vmatpush.bf16.msrb.mxu0 %v7114_v26  ;;  %v7315_v26 = vld [vmem:[#allocation7 + $0x38] sm:$0xff] }
 0x738   : > { %7101 = vmatmul.msk.bf16.vlgmr.msra.gmra.mxu1 %vm2322_vm11, %v7306_v44 }
 0x739   : > { %5494 = vmatpush.bf16.msrb.mxu1 %v5473_v62 }
 0x73a   : > { %6048 = vrot.lane.b32.xlu2 %v10860_v45, %s7592_s17 }
 0x73b   : > { %6050 = vrot.lane.b32.xlu0 %v10876_v39, %s7592_s17 }
 0x73c   : > { %6173 = vrot.lane.b32.xlu1 %v10846_v1, %s7568_s23  ;;  %v5573_v3 = vpop.permute.xlu2 %5572  ;;  %v5457_v29 = vpop.permute.xlu0 %5456 }
 0x73d   : > { %v5467_v56 = vpop.permute.xlu1 %5466  ;;  %v5470_v30 = vsel %vm767_vm2, %v5455_v8, %v5457_v29  ;;  %v7314_v8 = vld [vmem:[#allocation7 + $0x30] sm:$0xff] }
 0x73e   : > { %v5474_v51 = vsel %vm767_vm2, %v5465_v49, %v5467_v56  ;;  %v5475_v37 = vsel %vm767_vm2, %v5467_v56, %v5469_v63  ;;  %5495 = vmatpush.bf16.msrb.mxu1 %v5470_v30 }
 0x73f   : > { %5513 = vmatpush.bf16.msrb.mxu2 %v5474_v51  ;;  %5532 = vmatpush.bf16.msrb.mxu3 %v5475_v37 }
 0x742   : > { %7100 = vmatmul.msk.bf16.gmra.mxu0 %vm2322_vm11, %v7307_v15  ;;  %6175 = vrot.lane.b32.xlu2 %v10848_v20, %s7568_s23 }
 0x743   : > { %6165 = vrot.lane.b32.xlu0 %v10837_v9, %s7568_s23 }
 0x744   : > { %6167 = vrot.lane.b32.xlu1 %v10860_v45, %s7568_s23  ;;  %7121 = vmatmul.msk.bf16.vlgmr.msra.gmra.mxu3 %vm2322_vm11, %v10927_v38  ;;  %v5699_v1 = vpop.permute.xlu2 %5698  ;;  %v5459_v21 = vpop.permute.xlu0 %5458 }
 0x745   : > { %v5461_v2 = vpop.permute.xlu1 %5460  ;;  %v5471_v6 = vsel %vm767_vm2, %v5457_v29, %v5459_v21  ;;  %v7316_v29 = vld [vmem:[#allocation7 + $0x40] sm:$0xff] }
 0x746   : > { %5514 = vmatpush.bf16.msrb.mxu2 %v5471_v6  ;;  %v5472_v24 = vsel %vm767_vm2, %v5459_v21, %v5461_v2  ;;  %vm5706_vm2 = vcmask 842752   ;;  %v7318_v21 = vld [vmem:[#allocation7 + $0x50] sm:$0xff] }
 0x747   : > { %5533 = vmatpush.bf16.msrb.mxu3 %v5472_v24 }
 0x748   : > { %7102 = vmatmul.msk.bf16.gmra.mxu1 %vm2322_vm11, %v7307_v15 }
 0x749   : > { %7135 = vmatmul.msk.bf16.vlgmr.msrb.gmra.mxu2 %vm2322_vm11, %v7312_v33 }
 0x74a   : > { %6060 = vrot.lane.b32.xlu2 %v10874_v13, %s7592_s17 }
 0x74b   : > { %6052 = vrot.lane.b32.xlu0 %v10884_v59, %s7592_s17 }
 0x74c   : > { %6177 = vrot.lane.b32.xlu1 %v10872_v31, %s7568_s23  ;;  %v11009_v9 = vpop.permute.xlu2 %5692  ;;  %v5583_v20 = vpop.permute.xlu0 %5582  ;;  %v6270_v31 = vld [vmem:[%s11250_s12 + $0x10] sm:$0xff] }
 0x74d   : > { %v5591_v45 = vsel %vm3823_vm9, %v5581_v23, %v5583_v20  ;;  %v5585_v0 = vpop.permute.xlu1 %5584 }
 0x74e   : > { %v5592_v14 = vsel %vm3823_vm9, %v5583_v20, %v5585_v0  ;;  %5612 = vmatpush.bf16.msra.mxu0 %v5591_v45  ;;  %v7317_v20 = vld [vmem:[#allocation7 + $0x48] sm:$0xff] }
 0x74f   : > { %5631 = vmatpush.bf16.msra.mxu1 %v5592_v14 }
 0x752   : > { %7123 = vmatmul.msk.bf16.vlgmr.msrb.gmra.mxu0 %vm2322_vm11, %v10927_v38  ;;  %6179 = vrot.lane.b32.xlu2 %v10874_v13, %s7568_s23  ;;  %v6271_v13 = vld [vmem:[%s11250_s12 + $0x18] sm:$0xff] }
 0x753   : > { %6169 = vrot.lane.b32.xlu0 %v10876_v39, %s7568_s23  ;;  %v6307_v38 = vld [vmem:[%s11251_s13 + $0x18] sm:$0xff] }
 0x754   : > { %6171 = vrot.lane.b32.xlu1 %v10884_v59, %s7568_s23  ;;  %7122 = vmatmul.msk.bf16.gmra.mxu3 %vm2322_vm11, %v10939_v34  ;;  %v5703_v55 = vpop.permute.xlu2 %5702  ;;  %v5575_v48 = vpop.permute.xlu0 %5574 }
 0x755   : > { %v5577_v57 = vpop.permute.xlu1 %5576  ;;  %v5588_v52 = vsel %vm3823_vm9, %v5573_v3, %v5575_v48 }
 0x756   : > { %5613 = vmatpush.bf16.msra.mxu0 %v5588_v52  ;;  %v5589_v18 = vsel %vm3823_vm9, %v5575_v48, %v5577_v57 }
 0x757   : > { %5632 = vmatpush.bf16.msra.mxu1 %v5589_v18 }
 0x758   : > { %7133 = vmatmul.msk.bf16.vlgmr.msrb.gmra.mxu1 %vm2322_vm11, %v7312_v33 }
 0x759   : > { %7136 = vmatmul.msk.bf16.gmra.mxu2 %vm2322_vm11, %v7313_v36 }
 0x75a   : > { %6284 = vperm.xlu2 %7426, %v6270_v31  }
 0x75b   : > { %6289 = vperm.xlu0 %7424, %v6271_v13  }
 0x75c   : > { %6320 = vperm.xlu1 %7425, %v6306_v53   ;;  %v5697_v19 = vpop.permute.xlu2 %5696  ;;  %v5701_v39 = vpop.permute.xlu0 %5700 }
 0x75d   : > { %v5710_v60 = vsel %vm5706_vm2, %v5699_v1, %v5701_v39  ;;  %v5711_v35 = vsel %vm5706_vm2, %v5701_v39, %v5703_v55  ;;  %v5691_v59 = vpop.permute.xlu1 %5690  ;;  %v5391_v39 = vpop.f32.mrf.mxu2 }
 0x75e   : > { %5731 = vmatpush.bf16.msra.mxu3 %v5710_v60  ;;  %5750 = vmatpush.bf16.msrb.mxu0 %v5711_v35  ;;  %v5707_v46 = vsel %vm5706_vm2, %v5691_v59, %v11009_v9 }
 0x762   : > { %7124 = vmatmul.msk.bf16.gmra.mxu0 %vm2322_vm11, %v10939_v34  ;;  %6325 = vperm.xlu2 %7426, %v6307_v38   ;;  %v6304_v34 = vld [vmem:[%s11251_s13] sm:$0xff] }
 0x763   : > { %6274 = vperm.xlu0 %7424, %v6268_v17   ;;  %5732 = vmatpush.bf16.msra.mxu3 %v5707_v46 }
 0x764   : > { %6279 = vperm.xlu1 %7425, %v6269_v40   ;;  %7137 = vmatmul.msk.bf16.vlgmr.msrb.gmra.mxu3 %vm2322_vm11, %v7312_v33  ;;  %v5812_v25 = vpop.permute.xlu2 %5811  ;;  %v5587_v41 = vpop.permute.xlu0 %5586 }
 0x765   : > { %v5593_v61 = vsel %vm3823_vm9, %v5585_v0, %v5587_v41  ;;  %v5579_v54 = vpop.permute.xlu1 %5578  ;;  %v7320_v41 = vld [vmem:[#allocation7 + $0x60] sm:$0xff] }
 0x766   : > { %5650 = vmatpush.bf16.msra.mxu2 %v5593_v61  ;;  %v5590_v44 = vsel %vm3823_vm9, %v5577_v57, %v5579_v54  ;;  %vm5825_vm9 = vcmask 834560   ;;  %v11111_v61 = vpop.f32.mrf.mxu2 }
 0x768   : > { %7134 = vmatmul.msk.bf16.gmra.mxu1 %vm2322_vm11, %v7313_v36 }
 0x76a   : > { %6310 = vperm.xlu2 %7426, %v6304_v34   ;;  %5651 = vmatpush.bf16.msra.mxu2 %v5590_v44 }
 0x76b   : > { %6315 = vperm.xlu0 %7424, %v6305_v16  }
 0x76c   : > { %6362 = vperm.xlu1 %7425, %v6359_v32   ;;  %v5810_v7 = vpop.permute.xlu2 %5809  ;;  %v5705_v63 = vpop.permute.xlu0 %5704 }
 0x76d   : > { %v5712_v22 = vsel %vm5706_vm2, %v5703_v55, %v5705_v63  ;;  %v5695_v12 = vpop.permute.xlu1 %5694  ;;  %7151 = vmatmul.msk.bf16.vlgmr.msra.gmra.mxu2 %vm2322_vm11, %v7314_v8  ;;  %v5826_v56 = vsel %vm5825_vm9, %v5810_v7, %v5812_v25 }
 0x76e   : > { %v5708_v28 = vsel %vm5706_vm2, %v11009_v9, %v5695_v12  ;;  %5769 = vmatpush.bf16.msrb.mxu1 %v5712_v22  ;;  %v5709_v4 = vsel %vm5706_vm2, %v5695_v12, %v5697_v19  ;;  %v5396_v63 = vpop.f32.mrf.mxu2 }
 0x76f   : > { %5751 = vmatpush.bf16.msrb.mxu0 %v5708_v28 }
 0x772   : > { %7147 = vmatmul.msk.bf16.vlgmr.msra.gmra.mxu0 %vm2322_vm11, %v7314_v8  ;;  %6410 = vperm.xlu2 %7426, %v6407_v58  }
 0x773   : > { %6419 = vperm.xlu0 %7424, %v6416_v42   ;;  %5770 = vmatpush.bf16.msrb.mxu1 %v5709_v4 }
 0x774   : > { %7138 = vmatmul.msk.bf16.gmra.mxu3 %vm2322_vm11, %v7313_v36  ;;  %v5939_v15 = vpop.permute.xlu2 %5938  ;;  %v5820_v27 = vpop.permute.xlu0 %5819  ;;  %v11097_v36 = vld [vmem:[#allocation7 + $0x58] sm:$0xff] }
 0x775   : > { %v5822_v5 = vpop.permute.xlu1 %5821 }
 0x776   : > { %v5830_v43 = vsel %vm5825_vm9, %v5820_v27, %v5822_v5 }
 0x777   : > { %5869 = vmatpush.bf16.msrb.mxu3 %v5830_v43 }
 0x778   : > { %7149 = vmatmul.msk.bf16.vlgmr.msra.gmra.mxu1 %vm2322_vm11, %v7314_v8 }
 0x77c   : > { %v5931_v23 = vpop.permute.xlu2 %5930  ;;  %v5814_v50 = vpop.permute.xlu0 %5813 }
 0x77d   : > { %v5818_v49 = vpop.permute.xlu1 %5817  ;;  %7152 = vmatmul.msk.bf16.gmra.mxu2 %vm2322_vm11, %v7315_v26  ;;  %v5827_v62 = vsel %vm5825_vm9, %v5812_v25, %v5814_v50 }
 0x77e   : > { %v5829_v3 = vsel %vm5825_vm9, %v5818_v49, %v5820_v27  ;;  %5870 = vmatpush.bf16.msrb.mxu3 %v5827_v62 }
 0x77f   : > { %5850 = vmatpush.bf16.msrb.mxu2 %v5829_v3 }
 0x782   : > { %7148 = vmatmul.msk.bf16.gmra.mxu0 %vm2322_vm11, %v7315_v26 }
 0x783   : > { %5851 = vmatpush.bf16.msrb.mxu2 %v5826_v56  ;;  %v5398_v56 = vpop.f32.mrf.mxu2 }
 0x784   : > { %7161 = vmatmul.msk.bf16.vlgmr.msra.gmra.mxu3 %vm2322_vm11, %v7316_v29  ;;  %v5933_v30 = vpop.permute.xlu2 %5932  ;;  %v5816_v51 = vpop.permute.xlu0 %5815 }
 0x785   : > { %v5937_v37 = vpop.permute.xlu1 %5936  ;;  %v5828_v45 = vsel %vm5825_vm9, %v5814_v50, %v5816_v51  ;;  %v5945_v52 = vsel %vm1517_vm6, %v5931_v23, %v5933_v30 }
 0x786   : > { %v5947_v1 = vsel %vm1517_vm6, %v5937_v37, %v5939_v15 }
 0x787   : > { %5968 = vmatpush.bf16.msra.mxu1 %v5947_v1 }
 0x788   : > { %7150 = vmatmul.msk.bf16.gmra.mxu1 %vm2322_vm11, %v7315_v26 }
 0x78c   : > { %v6057_v2 = vpop.permute.xlu2 %6056  ;;  %v5824_v6 = vpop.permute.xlu0 %5823 }
 0x78d   : > { %v5831_v33 = vsel %vm5825_vm9, %v5822_v5, %v5824_v6  ;;  %v5929_v24 = vpop.permute.xlu1 %5928  ;;  %7175 = vmatmul.msk.bf16.vlgmr.msrb.gmra.mxu2 %vm2322_vm11, %v7318_v21 }
 0x78e   : > { %5888 = vmatpush.bf16.msra.mxu0 %v5831_v33  ;;  %v5944_v9 = vsel %vm1517_vm6, %v5929_v24, %v5931_v23  ;;  %v7322_v33 = vld [vmem:[#allocation7 + $0x70] sm:$0xff] }
 0x78f   : > { %5969 = vmatpush.bf16.msra.mxu1 %v5944_v9 }
 0x792   : > { %7163 = vmatmul.msk.bf16.vlgmr.msrb.gmra.mxu0 %vm2322_vm11, %v7316_v29 }
 0x793   : > { %5889 = vmatpush.bf16.msra.mxu0 %v5828_v45 }
 0x794   : > { %7162 = vmatmul.msk.bf16.gmra.mxu3 %vm2322_vm11, %v7317_v20  ;;  %v6049_v0 = vpop.permute.xlu2 %6048  ;;  %v5941_v14 = vpop.permute.xlu0 %5940 }
 0x795   : > { %v5948_v55 = vsel %vm1517_vm6, %v5939_v15, %v5941_v14  ;;  %v5943_v48 = vpop.permute.xlu1 %5942  ;;  %v7321_v15 = vld [vmem:[#allocation7 + $0x68] sm:$0xff] }
 0x796   : > { %v5949_v57 = vsel %vm1517_vm6, %v5941_v14, %v5943_v48  ;;  %5987 = vmatpush.bf16.msra.mxu2 %v5948_v55 }
 0x797   : > { %6006 = vmatpush.bf16.msra.mxu3 %v5949_v57 }
 0x798   : > { %7165 = vmatmul.msk.bf16.vlgmr.msrb.gmra.mxu1 %vm2322_vm11, %v7316_v29 }
 0x79a   : > { %5988 = vmatpush.bf16.msra.mxu2 %v5945_v52 }
 0x79c   : > { %v6176_v18 = vpop.permute.xlu2 %6175  ;;  %v5935_v31 = vpop.permute.xlu0 %5934 }
 0x79d   : > { %v6055_v13 = vpop.permute.xlu1 %6054  ;;  %7176 = vmatmul.msk.bf16.gmra.mxu2 %vm2322_vm11, %v11097_v36  ;;  %v5946_v53 = vsel %vm1517_vm6, %v5933_v30, %v5935_v31 }
 0x79e   : > { %v6066_v19 = vsel %vm6062_vm3, %v6055_v13, %v6057_v2  ;;  %6007 = vmatpush.bf16.msra.mxu3 %v5946_v53 }
 0x79f   : > { %6087 = vmatpush.bf16.msrb.mxu0 %v6066_v19  ;;  %v7323_v19 = vld [vmem:[#allocation7 + $0x78] sm:$0xff] }
 0x7a2   : > { %7164 = vmatmul.msk.bf16.gmra.mxu0 %vm2322_vm11, %v7317_v20 }
 0x7a4   : > { %7177 = vmatmul.msk.bf16.vlgmr.msrb.gmra.mxu3 %vm2322_vm11, %v7318_v21  ;;  %v6061_v60 = vpop.permute.xlu2 %6060 }
 0x7a5   : > { %v6059_v35 = vpop.permute.xlu0 %6058 }
 0x7a6   : > { %v6047_v59 = vpop.permute.xlu1 %6046  ;;  %v6067_v38 = vsel %vm6062_vm3, %v6057_v2, %v6059_v35  ;;  %v6068_v17 = vsel %vm6062_vm3, %v6059_v35, %v6061_v60 }
 0x7a7   : > { %v5302_v40 = vpop.f32.mrf.mxu3  ;;  %v6063_v46 = vsel %vm6062_vm3, %v6047_v59, %v6049_v0  ;;  %6106 = vmatpush.bf16.msrb.mxu1 %v6067_v38  ;;  %6125 = vmatpush.bf16.msrb.mxu2 %v6068_v17 }
 0x7a8   : > { %7166 = vmatmul.msk.bf16.gmra.mxu1 %vm2322_vm11, %v7317_v20  ;;  %6088 = vmatpush.bf16.msrb.mxu0 %v6063_v46  ;;  %v11109_v25 = vadd.f32 %v5391_v39, %v5302_v40 }
 0x7ac   : > { %v6180_v27 = vpop.permute.xlu2 %6179 }
 0x7ad   : > { %v6051_v54 = vpop.permute.xlu0 %6050  ;;  %7191 = vmatmul.msk.bf16.vlgmr.msra.gmra.mxu2 %vm2322_vm11, %v7320_v41 }
 0x7ae   : > { %v6174_v34 = vpop.permute.xlu1 %6173  ;;  %v6064_v44 = vsel %vm6062_vm3, %v6049_v0, %v6051_v54 }
 0x7af   : > { %v6184_v16 = vsel %vm1678_vm7, %v6174_v34, %v6176_v18  ;;  %v11115_v32 = vpop.f32.mrf.mxu3  ;;  %v5321_v8 = vpop.f32.mrf.mxu0  ;;  %6107 = vmatpush.bf16.msrb.mxu1 %v6064_v44 }
 0x7b0   : > { %6205 = vmatpush.bf16.msrb.mxu3 %v6184_v16  ;;  %v5394_v39 = vadd.f32 %v11111_v61, %v11115_v32 }
 0x7b2   : > { %7179 = vmatmul.msk.bf16.vlgmr.msra.gmra.mxu0 %vm2322_vm11, %v7318_v21 }
 0x7b4   : > { %7178 = vmatmul.msk.bf16.gmra.mxu3 %vm2322_vm11, %v11097_v36 }
 0x7b5   : > { %v5340_v7 = vpop.f32.mrf.mxu1  ;;  %v6166_v22 = vpop.permute.xlu0 %6165 }
 0x7b6   : > { %v6168_v12 = vpop.permute.xlu1 %6167 }
 0x7b7   : > { %v6181_v28 = vsel %vm1678_vm7, %v6166_v22, %v6168_v12  ;;  %v5307_v58 = vpop.f32.mrf.mxu3  ;;  %v5323_v42 = vpop.f32.mrf.mxu0 }
 0x7b8   : > { %7189 = vmatmul.msk.bf16.vlgmr.msra.gmra.mxu1 %vm2322_vm11, %v7320_v41  ;;  %6206 = vmatpush.bf16.msrb.mxu3 %v6181_v28  ;;  %v11123_v4 = vadd.f32 %v5396_v63, %v5307_v58 }
 0x7bd   : > { %v5342_v5 = vpop.f32.mrf.mxu1  ;;  %v6053_v43 = vpop.permute.xlu0 %6052  ;;  %7192 = vmatmul.msk.bf16.gmra.mxu2 %vm2322_vm11, %v7321_v15 }
 0x7be   : > { %v6178_v26 = vpop.permute.xlu1 %6177  ;;  %v6065_v49 = vsel %vm6062_vm3, %v6051_v54, %v6053_v43 }
 0x7bf   : > { %v6185_v23 = vsel %vm1678_vm7, %v6176_v18, %v6178_v26  ;;  %v6186_v50 = vsel %vm1678_vm7, %v6178_v26, %v6180_v27  ;;  %v5309_v62 = vpop.f32.mrf.mxu3  ;;  %v5326_v3 = vpop.f32.mrf.mxu0  ;;  %6126 = vmatpush.bf16.msrb.mxu2 %v6065_v49 }
 0x7c0   : > { %6224 = vmatpush.bf16.msra.mxu0 %v6185_v23  ;;  %6243 = vmatpush.bf16.msra.mxu1 %v6186_v50  ;;  %v5399_v63 = vadd.f32 %v5398_v56, %v5309_v62 }
 0x7c2   : > { %7180 = vmatmul.msk.bf16.gmra.mxu0 %vm2322_vm11, %v11097_v36 }
 0x7c4   : > { %7193 = vmatmul.msk.bf16.vlgmr.msra.gmra.mxu3 %vm2322_vm11, %v7320_v41  ;;  %v7324_v41 = vld [vmem:[#allocation7 + $0x80] sm:$0xff] }
 0x7c5   : > { %v5345_v29 = vpop.f32.mrf.mxu1  ;;  %v6170_v30 = vpop.permute.xlu0 %6169 }
 0x7c6   : > { %v6172_v51 = vpop.permute.xlu1 %6171  ;;  %v6182_v37 = vsel %vm1678_vm7, %v6168_v12, %v6170_v30 }
 0x7c7   : > { %v6183_v1 = vsel %vm1678_vm7, %v6170_v30, %v6172_v51  ;;  %v5410_v21 = vpop.f32.mrf.mxu3  ;;  %v5328_v2 = vpop.f32.mrf.mxu0  ;;  %6225 = vmatpush.bf16.msra.mxu0 %v6182_v37 }
 0x7c8   : > { %7190 = vmatmul.msk.bf16.gmra.mxu1 %vm2322_vm11, %v7321_v15  ;;  %v5411_v6 = vadd.f32 %v5410_v21, %v5321_v8 }
 0x7c9   : > { %6244 = vmatpush.bf16.msra.mxu1 %v6183_v1 }
 0x7cc   : > { %v5516_v9 = vpop.f32.mrf.mxu2 }
 0x7cd   : > { %v5347_v24 = vpop.f32.mrf.mxu1  ;;  %7207 = vmatmul.msk.bf16.vlgmr.msrb.gmra.mxu2 %vm2322_vm11, %v7322_v33  ;;  %v5546_v20 = vadd.f32 %v5516_v9, %v5411_v6 }
 0x7cf   : > { %v5412_v45 = vpop.f32.mrf.mxu3  ;;  %v5429_v0 = vpop.f32.mrf.mxu0 }
 0x7d0   : > { %v5430_v14 = vadd.f32 %v5429_v0, %v5340_v7  ;;  %v5413_v55 = vadd.f32 %v5412_v45, %v5323_v42 }
 0x7d2   : > { %7203 = vmatmul.msk.bf16.vlgmr.msrb.gmra.mxu0 %vm2322_vm11, %v7322_v33 }
 0x7d4   : > { %7194 = vmatmul.msk.bf16.gmra.mxu3 %vm2322_vm11, %v7321_v15  ;;  %v5518_v52 = vpop.f32.mrf.mxu2 }
 0x7d5   : > { %v5497_v48 = vpop.f32.mrf.mxu1  ;;  %v5549_v36 = vadd.f32 %v5518_v52, %v5413_v55 }
 0x7d6   : > { %v5545_v57 = vadd.f32 %v5497_v48, %v11109_v25 }
 0x7d7   : > { %v5415_v18 = vpop.f32.mrf.mxu3  ;;  %v5431_v31 = vpop.f32.mrf.mxu0 }
 0x7d8   : > { %7205 = vmatmul.msk.bf16.vlgmr.msrb.gmra.mxu1 %vm2322_vm11, %v7322_v33  ;;  %v5416_v13 = vadd.f32 %v5415_v18, %v5326_v3  ;;  %v5432_v53 = vadd.f32 %v5431_v31, %v5342_v5  ;;  %v7325_v5 = vld [vmem:[#allocation7 + $0x88] sm:$0xff] }
 0x7dc   : > { %v5521_v59 = vpop.f32.mrf.mxu2 }
 0x7dd   : > { %v5499_v60 = vpop.f32.mrf.mxu1  ;;  %7208 = vmatmul.msk.bf16.gmra.mxu2 %vm2322_vm11, %v7323_v19  ;;  %v5552_v38 = vadd.f32 %v5521_v59, %v5416_v13 }
 0x7de   : > { %v5548_v35 = vadd.f32 %v5499_v60, %v5394_v39 }
 0x7df   : > { %v5417_v17 = vpop.f32.mrf.mxu3  ;;  %v5434_v40 = vpop.f32.mrf.mxu0 }
 0x7e0   : > { %v5418_v46 = vadd.f32 %v5417_v17, %v5328_v2  ;;  %v5435_v25 = vadd.f32 %v5434_v40, %v5345_v29 }
 0x7e2   : > { %7204 = vmatmul.msk.bf16.gmra.mxu0 %vm2322_vm11, %v7323_v19 }
 0x7e4   : > { %7217 = vmatmul.msk.bf16.vlgmr.msrb.gmra.mxu3 %vm2322_vm11, %v7324_v41  ;;  %v5523_v16 = vpop.f32.mrf.mxu2 }
 0x7e5   : > { %v5502_v54 = vpop.f32.mrf.mxu1  ;;  %v5555_v61 = vadd.f32 %v5523_v16, %v5418_v46 }
 0x7e6   : > { %v5551_v34 = vadd.f32 %v5502_v54, %v11123_v4 }
 0x7e7   : > { %v5535_v32 = vpop.f32.mrf.mxu3  ;;  %v5436_v44 = vpop.f32.mrf.mxu0 }
 0x7e8   : > { %7206 = vmatmul.msk.bf16.gmra.mxu1 %vm2322_vm11, %v7323_v19  ;;  %v5547_v8 = vadd.f32 %v5535_v32, %v5430_v14  ;;  %v5437_v7 = vadd.f32 %v5436_v44, %v5347_v24 }
 0x7ed   : > { %v5504_v22 = vpop.f32.mrf.mxu1 }
 0x7ee   : > { %v5554_v12 = vadd.f32 %v5504_v22, %v5399_v63 }
 0x7ef   : > { %v5537_v28 = vpop.f32.mrf.mxu3  ;;  %v5615_v58 = vpop.f32.mrf.mxu0 }
 0x7f0   : > { %v5550_v42 = vadd.f32 %v5537_v28, %v5432_v53  ;;  %v5663_v15 = vadd.f32 %v5615_v58, %v5545_v57  ;;  %v5653_v27 = vpop.f32.mrf.mxu2 }
 0x7f1   : > { %v5665_v43 = vadd.f32 %v5653_v27, %v5547_v8 }
 0x7f2   : > { %7219 = vmatmul.msk.bf16.vlgmr.msra.gmra.mxu0 %vm2322_vm11, %v7324_v41 }
 0x7f4   : > { %7218 = vmatmul.msk.bf16.gmra.mxu3 %vm2322_vm11, %v7325_v5 }
 0x7f5   : > { %v5634_v4 = vpop.f32.mrf.mxu1 }
 0x7f6   : > { %v5664_v26 = vadd.f32 %v5634_v4, %v5546_v20 }
 0x7f7   : > { %v5540_v23 = vpop.f32.mrf.mxu3  ;;  %v5617_v50 = vpop.f32.mrf.mxu0 }
 0x7f8   : > { %7221 = vmatmul.msk.bf16.vlgmr.msra.gmra.mxu1 %vm2322_vm11, %v7324_v41  ;;  %v5553_v49 = vadd.f32 %v5540_v23, %v5435_v25  ;;  %v5666_v62 = vadd.f32 %v5617_v50, %v5548_v35  ;;  %v5655_v3 = vpop.f32.mrf.mxu2 }
 0x7f9   : > { %v5668_v29 = vadd.f32 %v5655_v3, %v5550_v42 }
 0x7fd   : > { %v5636_v56 = vpop.f32.mrf.mxu1 }
 0x7fe   : > { %v5667_v30 = vadd.f32 %v5636_v56, %v5549_v36 }
 0x7ff   : > { %v5542_v51 = vpop.f32.mrf.mxu3  ;;  %v5620_v37 = vpop.f32.mrf.mxu0 }
 0x800   : > { %v5556_v1 = vadd.f32 %v5542_v51, %v5437_v7  ;;  %v5669_v21 = vadd.f32 %v5620_v37, %v5551_v34  ;;  %v5658_v2 = vpop.f32.mrf.mxu2 }
 0x801   : > { %v5671_v6 = vadd.f32 %v5658_v2, %v5553_v49 }
 0x802   : > { %7220 = vmatmul.msk.bf16.gmra.mxu0 %vm2322_vm11, %v7325_v5 }
 0x805   : > { %v5639_v33 = vpop.f32.mrf.mxu1 }
 0x806   : > { %v5670_v24 = vadd.f32 %v5639_v33, %v5552_v38 }
 0x807   : > { %v5734_v9 = vpop.f32.mrf.mxu3  ;;  %v5622_v20 = vpop.f32.mrf.mxu0 }
 0x808   : > { %7222 = vmatmul.msk.bf16.gmra.mxu1 %vm2322_vm11, %v7325_v5  ;;  %v5782_v45 = vadd.f32 %v5734_v9, %v5663_v15  ;;  %v5672_v0 = vadd.f32 %v5622_v20, %v5554_v12  ;;  %v5660_v14 = vpop.f32.mrf.mxu2 }
 0x809   : > { %v5674_v55 = vadd.f32 %v5660_v14, %v5556_v1 }
 0x80d   : > { %v5641_v48 = vpop.f32.mrf.mxu1 }
 0x80e   : > { %v5673_v57 = vadd.f32 %v5641_v48, %v5555_v61  ;;  %v11172_v48 = vpop.permute.xlu2 %6284 }
 0x80f   : > { %v5736_v52 = vpop.f32.mrf.mxu3  ;;  %v5753_v36 = vpop.f32.mrf.mxu0 }
 0x810   : > { %v5785_v18 = vadd.f32 %v5736_v52, %v5666_v62  ;;  %v5783_v31 = vadd.f32 %v5753_v36, %v5664_v26  ;;  %v5853_v13 = vpop.f32.mrf.mxu2  ;;  %v11174_v52 = vpop.permute.xlu0 %6289 }
 0x811   : > { %v5901_v53 = vadd.f32 %v5853_v13, %v5782_v45 }
 0x815   : > { %v5772_v19 = vpop.f32.mrf.mxu1 }
 0x816   : > { %v5784_v39 = vadd.f32 %v5772_v19, %v5665_v43  ;;  %v11182_v19 = vpop.permute.xlu1 %6320 }
 0x817   : > { %v5739_v60 = vpop.f32.mrf.mxu3  ;;  %v5755_v35 = vpop.f32.mrf.mxu0 }
 0x818   : > { %v11152_v59 = vadd.f32 %v5739_v60, %v5669_v21  ;;  %v5786_v38 = vadd.f32 %v5755_v35, %v5667_v30  ;;  %v5855_v17 = vpop.f32.mrf.mxu2 }
 0x819   : > { %v5904_v40 = vadd.f32 %v5855_v17, %v5785_v18 }
 0x81d   : > { %v5774_v46 = vpop.f32.mrf.mxu1 }
 0x81e   : > { %v5787_v25 = vadd.f32 %v5774_v46, %v5668_v29 }
 0x81f   : > { %v5741_v41 = vpop.f32.mrf.mxu3  ;;  %v5758_v54 = vpop.f32.mrf.mxu0 }
 0x820   : > { %v11154_v34 = vadd.f32 %v5741_v41, %v5672_v0  ;;  %v5789_v16 = vadd.f32 %v5758_v54, %v5670_v24  ;;  %v5858_v28 = vpop.f32.mrf.mxu2 }
 0x825   : > { %v5777_v61 = vpop.f32.mrf.mxu1 }
 0x826   : > { %v5790_v32 = vadd.f32 %v5777_v61, %v5671_v6 }
 0x827   : > { %v5872_v44 = vpop.f32.mrf.mxu3  ;;  %v5760_v8 = vpop.f32.mrf.mxu0 }
 0x828   : > { %v5902_v7 = vadd.f32 %v5872_v44, %v5783_v31  ;;  %v5792_v63 = vadd.f32 %v5760_v8, %v5673_v57  ;;  %v11158_v23 = vpop.f32.mrf.mxu2 }
 0x82d   : > { %v5779_v22 = vpop.f32.mrf.mxu1 }
 0x82e   : > { %v11156_v12 = vadd.f32 %v5779_v22, %v5674_v55 }
 0x82f   : > { %v5874_v58 = vpop.f32.mrf.mxu3  ;;  %v5891_v42 = vpop.f32.mrf.mxu0 }
 0x830   : > { %v5905_v15 = vadd.f32 %v5874_v58, %v5786_v38  ;;  %v5903_v27 = vadd.f32 %v5891_v42, %v5784_v39  ;;  %v5990_v37 = vpop.f32.mrf.mxu2  ;;  %v6275_v38 = vpop.permute.xlu0 %6274 }
 0x835   : > { %v5971_v5 = vpop.f32.mrf.mxu1 }
 0x836   : > { %v6019_v43 = vadd.f32 %v5971_v5, %v5901_v53  ;;  %v11180_v53 = vpop.permute.xlu2 %6325  ;;  %v5907_v5 = vadd.f32 %v5858_v28, %v11152_v59  ;;  %v5910_v59 = vadd.f32 %v11158_v23, %v11154_v34 }
 0x837   : > { %v5877_v4 = vpop.f32.mrf.mxu3  ;;  %v5893_v26 = vpop.f32.mrf.mxu0 }
 0x838   : > { %v11160_v50 = vadd.f32 %v5877_v4, %v5789_v16  ;;  %v11162_v49 = vadd.f32 %v5893_v26, %v5787_v25  ;;  %v5992_v33 = vpop.f32.mrf.mxu2  ;;  %v6020_v25 = vadd.f32 %v5990_v37, %v5902_v7 }
 0x83d   : > { %v5973_v62 = vpop.f32.mrf.mxu1 }
 0x83e   : > { %v6022_v3 = vadd.f32 %v5973_v62, %v5904_v40  ;;  %v6311_v8 = vpop.permute.xlu2 %6310 }
 0x83f   : > { %v5879_v29 = vpop.f32.mrf.mxu3  ;;  %v5896_v56 = vpop.f32.mrf.mxu0 }
 0x840   : > { %v11164_v30 = vadd.f32 %v5879_v29, %v5792_v63  ;;  %v11166_v51 = vadd.f32 %v5896_v56, %v5790_v32  ;;  %v5995_v0 = vpop.f32.mrf.mxu2  ;;  %v6280_v63 = vpop.permute.xlu1 %6279 }
 0x845   : > { %v5976_v1 = vpop.f32.mrf.mxu1 }
 0x846   : > { %v6025_v29 = vadd.f32 %v5976_v1, %v5907_v5 }
 0x847   : > { %v6009_v21 = vpop.f32.mrf.mxu3  ;;  %v11168_v2 = vpop.f32.mrf.mxu0 }
 0x848   : > { %v6021_v6 = vadd.f32 %v6009_v21, %v5903_v27  ;;  %v11178_v31 = vpop.f32.mrf.mxu2  ;;  %v6316_v27 = vpop.permute.xlu0 %6315 }
 0x84d   : > { %v5978_v24 = vpop.f32.mrf.mxu1 }
 0x84f   : > { %v6011_v9 = vpop.f32.mrf.mxu3  ;;  %v6090_v20 = vpop.f32.mrf.mxu0 }
 0x850   : > { %v6138_v35 = vadd.f32 %v6090_v20, %v6019_v43  ;;  %v6128_v17 = vpop.f32.mrf.mxu2  ;;  %v6023_v43 = vadd.f32 %v5992_v33, %v5905_v15 }
 0x851   : > { %v6140_v7 = vadd.f32 %v6128_v17, %v6021_v6 }
 0x855   : > { %v6109_v45 = vpop.f32.mrf.mxu1 }
 0x856   : > { %v6139_v32 = vadd.f32 %v6109_v45, %v6020_v25  ;;  %v6024_v25 = vadd.f32 %v6011_v9, %v11162_v49 }
 0x857   : > { %v11170_v14 = vpop.f32.mrf.mxu3  ;;  %v6092_v55 = vpop.f32.mrf.mxu0 }
 0x858   : > { %v6141_v41 = vadd.f32 %v6092_v55, %v6022_v3  ;;  %v6130_v4 = vpop.f32.mrf.mxu2 }
 0x859   : > { %v6143_v1 = vadd.f32 %v6130_v4, %v6024_v25 }
 0x85d   : > { %v6111_v57 = vpop.f32.mrf.mxu1 }
 0x85e   : > { %v6142_v3 = vadd.f32 %v6111_v57, %v6023_v43  ;;  %v6028_v57 = vadd.f32 %v5978_v24, %v5910_v59  ;;  %v6352_v59 = vld [vmem:[%s11301_s27] sm:$0x7] }
 0x85f   : > { %v11176_v36 = vpop.f32.mrf.mxu3  ;;  %v6095_v18 = vpop.f32.mrf.mxu0 }
 0x865   : > { %v6114_v13 = vpop.f32.mrf.mxu1 }
 0x867   : > { %v6208_v39 = vpop.f32.mrf.mxu3  ;;  %v6097_v60 = vpop.f32.mrf.mxu0 }
 0x868   : > { %v6256_v40 = vadd.f32 %v6208_v39, %v6138_v35  ;;  %v6144_v39 = vadd.f32 %v6095_v18, %v6025_v29  ;;  %v6147_v18 = vadd.f32 %v6097_v60, %v6028_v57  ;;  %v6411_v57 = vpop.permute.xlu2 %6410 }
 0x86a   : > { %v6292_v54 = vmul.f32 %v6275_v38, %v6256_v40 }
 0x86c   : > { %v6328_v22 = vadd.f32 %v6311_v8, %v6292_v54  ;;  %v6026_v54 = vadd.f32 %v5995_v0, %v11160_v50  ;;  %v6027_v0 = vadd.f32 %v11170_v14, %v11166_v51 }
 0x86d   : > { %v11184_v46 = vpop.f32.mrf.mxu1 }
 0x86e   : > { %v6340_v56 = vmax.f32 %v6328_v22, 0.0 }
 0x86f   : > { %v6210_v16 = vpop.f32.mrf.mxu3  ;;  %v6227_v61 = vpop.f32.mrf.mxu0 }
 0x870   : > { %v6259_v44 = vadd.f32 %v6210_v16, %v6141_v41  ;;  %v6257_v42 = vadd.f32 %v6227_v61, %v6139_v32  ;;  %v6133_v61 = vpop.f32.mrf.mxu2 }
 0x872   : > { %v6295_v58 = vmul.f32 %v6280_v63, %v6259_v44  ;;  %v6293_v21 = vmul.f32 %v6275_v38, %v6257_v42 }
 0x874   : > { %v6331_v26 = vadd.f32 %v6316_v27, %v6295_v58  ;;  %v6329_v28 = vadd.f32 %v6311_v8, %v6293_v21  ;;  %v6145_v58 = vadd.f32 %v6114_v13, %v6026_v54  ;;  %v6146_v13 = vadd.f32 %v6133_v61, %v6027_v0 }
 0x875   : > { %v6246_v62 = vpop.f32.mrf.mxu1 }
 0x876   : > { %v6343_v37 = vmax.f32 %v6331_v26, 0.0  ;;  %v6258_v20 = vadd.f32 %v6246_v62, %v6140_v7  ;;  %v6341_v32 = vmax.f32 %v6329_v28, 0.0 }
 0x877   : > { %v6213_v45 = vpop.f32.mrf.mxu3  ;;  %v6229_v55 = vpop.f32.mrf.mxu0 }
 0x878   : > { %v6260_v35 = vadd.f32 %v6229_v55, %v6142_v3  ;;  %v6353_v40 = vpack.c.bf16 %v6343_v37, %v6340_v56  ;;  %v6262_v15 = vadd.f32 %v6213_v45, %v6144_v39  ;;  %v6294_v6 = vmul.f32 %v6275_v38, %v6258_v20  ;;  %v6135_v37 = vpop.f32.mrf.mxu2 }
 0x879   : > { %v5912_v56 = vadd.f32 %v11168_v2, %v11156_v12 }
 0x87a   : > { %v6296_v33 = vmul.f32 %v6280_v63, %v6260_v35  ;;  %v6298_v44 = vmul.f32 %v11172_v48, %v6262_v15  ;;  %v6330_v9 = vadd.f32 %v6311_v8, %v6294_v6  ;;  %v6029_v8 = vadd.f32 %v11178_v31, %v11164_v30 }
 0x87b   : > { %v6030_v30 = vadd.f32 %v11176_v36, %v5912_v56 }
 0x87c   : > { %v6332_v17 = vadd.f32 %v6316_v27, %v6296_v33  ;;  %v6334_v24 = vadd.f32 %v11182_v19, %v6298_v44  ;;  %v6342_v60 = vmax.f32 %v6330_v9, 0.0 }
 0x87d   : > { %v6248_v41 = vpop.f32.mrf.mxu1 }
 0x87e   : > { %v6261_v16 = vadd.f32 %v6248_v41, %v6143_v1  ;;  %v6344_v49 = vmax.f32 %v6332_v17, 0.0  ;;  %v6346_v29 = vmax.f32 %v6334_v24, 0.0 }
 0x87f   : > { %v6215_v34 = vpop.f32.mrf.mxu3  ;;  %v6232_v23 = vpop.f32.mrf.mxu0 }
 0x880   : > { %v6297_v22 = vmul.f32 %v6280_v63, %v6261_v16  ;;  %v6265_v42 = vadd.f32 %v6215_v34, %v6147_v18  ;;  %v6354_v5 = vpack.c.bf16 %v6344_v49, %v6341_v32  ;;  %v6263_v50 = vadd.f32 %v6232_v23, %v6145_v58 }
 0x882   : > { %v6333_v38 = vadd.f32 %v6316_v27, %v6297_v22  ;;  %v6301_v43 = vmul.f32 %v11174_v52, %v6265_v42  ;;  %v6148_v27 = vadd.f32 %v11184_v46, %v6029_v8  ;;  %v6299_v3 = vmul.f32 %v11172_v48, %v6263_v50 }
 0x883   : > { %v6149_v46 = vadd.f32 %v6135_v37, %v6030_v30 }
 0x884   : > { %v6345_v4 = vmax.f32 %v6333_v38, 0.0  ;;  %v6337_v63 = vadd.f32 %v11180_v53, %v6301_v43  ;;  %v6335_v31 = vadd.f32 %v11182_v19, %v6299_v3 }
 0x885   : > { %v6251_v26 = vpop.f32.mrf.mxu1 }
 0x886   : > { %v6355_v62 = vpack.c.bf16 %v6345_v4, %v6342_v60  ;;  %v6349_v7 = vmax.f32 %v6337_v63, 0.0  ;;  %v6264_v51 = vadd.f32 %v6251_v26, %v6146_v13  ;;  %v6347_v12 = vmax.f32 %v6335_v31, 0.0 }
 0x887   : > { %v6234_v14 = vpop.f32.mrf.mxu0 }
 0x888   : > { %v6356_v21 = vpack.c.bf16 %v6349_v7, %v6346_v29  ;;  %v6266_v20 = vadd.f32 %v6234_v14, %v6148_v27  ;;  %v6300_v55 = vmul.f32 %v11172_v48, %v6264_v51 }
 0x88a   : > { %v6302_v45 = vmul.f32 %v11174_v52, %v6266_v20  ;;  %6374 = vmatpush.bf16.msra.mxu2 %v6356_v21  ;;  %v6336_v36 = vadd.f32 %v11182_v19, %v6300_v55  ;;  %v6363_v19 = vpop.permute.xlu1 %6362 }
 0x88c   : > { %v6338_v39 = vadd.f32 %v11180_v53, %v6302_v45  ;;  %v6348_v48 = vmax.f32 %v6336_v36, 0.0 }
 0x88d   : > { %v6253_v35 = vpop.f32.mrf.mxu1 }
 0x88e   : > { %v6267_v25 = vadd.f32 %v6253_v35, %v6149_v46  ;;  %v6350_v2 = vmax.f32 %v6338_v39, 0.0  ;;  %6375 = vmatpush.bf16.msra.mxu2 %v6353_v40 }
 0x890   : > { %v6303_v28 = vmul.f32 %v11174_v52, %v6267_v25  ;;  %v6357_v15 = vpack.c.bf16 %v6350_v2, %v6347_v12 }
 0x891   : > { %7223 = vmatmul.msk.bf16.vlgmr.msra.gmra.mxu2 %vm2322_vm11, %v6352_v59 }
 0x892   : > { %v6339_v33 = vadd.f32 %v11180_v53, %v6303_v28  ;;  %6387 = vmatpush.bf16.msra.mxu3 %v6357_v15  ;;  %v6420_v53 = vpop.permute.xlu0 %6419 }
 0x894   : > { %v6351_v1 = vmax.f32 %v6339_v33, 0.0 }
 0x896   : > { %v6358_v6 = vpack.c.bf16 %v6351_v1, %v6348_v48  ;;  %6388 = vmatpush.bf16.msra.mxu3 %v6354_v5 }
 0x898   : > { %6400 = vmatpush.bf16.msrb.mxu2 %v6358_v6 }
 0x899   : > { %7224 = vmatmul.msk.bf16.vlgmr.msra.gmra.mxu3 %vm2322_vm11, %v6352_v59 }
 0x89c   : > { %6401 = vmatpush.bf16.msrb.mxu2 %v6355_v62 }
 0x8a1   : > { %7225 = vmatmul.msk.bf16.vlgmr.msrb.gmra.mxu2 %vm2322_vm11, %v6352_v59 }
 0x914   : > { %v6377_v40 = vpop.f32.mrf.mxu2 }
 0x915   : > { %v6378_v52 = vadd.f32 %v6377_v40, %v6363_v19 }
 0x917   : > { %v6413_v17 = vmul.f32 %v6411_v57, %v6378_v52 }
 0x919   : > { %v6422_v41 = vadd.f32 %v6420_v53, %v6413_v17 }
 0x91b   : > { %v6425_v54 = vadd.f32 %v6422_v41, %v10756_v10 }
 0x91c   : > { %v6379_v16 = vpop.f32.mrf.mxu2  ;;  %v6390_v61 = vpop.f32.mrf.mxu3 }
 0x91d   : > { %v6428_v18 = vmax.f32 %v6425_v54, 0.0  ;;  %v6391_v32 = vadd.f32 %v6390_v61, %v6363_v19 }
 0x91f   : > { %6431 = vst [vmem:[%s650_s14] sm:$0x3f] %v6428_v18  ;;  %v6414_v44 = vmul.f32 %v6411_v57, %v6391_v32 }
 0x921   : > { %v6423_v49 = vadd.f32 %v6420_v53, %v6414_v44 }
 0x923   : > { %v6426_v9 = vadd.f32 %v6423_v49, %v10765_v11 }
 0x924   : > { %v6403_v22 = vpop.f32.mrf.mxu2  ;;  %v6392_v34 = vpop.f32.mrf.mxu3 }
 0x925   : > { %v6429_v23 = vmax.f32 %v6426_v9, 0.0  ;;  %v6404_v58 = vadd.f32 %v6403_v22, %v6363_v19 }
 0x927   : > { %6432 = vst [vmem:[%s650_s14 + $0x8] sm:$0x3f] %v6429_v23  ;;  %v6415_v10 = vmul.f32 %v6411_v57, %v6404_v58 }
 0x929   : > { %v6424_v42 = vadd.f32 %v6420_v53, %v6415_v10 }
 0x92b   : > { %v6427_v5 = vadd.f32 %v6424_v42, %v10775_v47 }
 0x92c   : > { %v6405_v38 = vpop.f32.mrf.mxu2 }
 0x92d   : > { %v6430_v24 = vmax.f32 %v6427_v5, 0.0 }
 0x92f   : > { %6433 = vst [vmem:[%s650_s14 + $0x10] sm:$0x3f] %v6430_v24 }
 0x930 PF: > { %s11303_s30 = sld [smem:[#allocation11_spill]]  ;;  %s11306_s27 = smov %s7547_s28 }
 0x931   : > { %s11304_s0 = sld [smem:[#allocation10_spill]] }
 0x932   : > { %s11305_s29 = sld [smem:[#allocation12_spill]] }
 0x936   : > { %p29_p4 = scmp.ge.s32.totalorder %s11303_s30, 4  }
 0x937   : > { %s11307_s28 = smov %s11304_s0 }
 0x938   :  { %31 = sbr.rel (!%p29_p4) target bundleno = 14 (0xe), region = 175 }
 0x93d   :  { %6455 = vsyncpa [#allocation4], 1 }
 0x93e   :  { %6457 = vsyncpa [#allocation4 + $0x1], 1 }
 0x93f   :  { %6458 = vsyncpa [#allocation6], 1 }

</bundles_post_ra>
